<compile_context>
chip_gen: v5e
topology: v5e:2x2
jax: 0.10.0
libtpu: 0.0.40
codegen_flags: <defaults>
</compile_context>

<pallas_src>
import functools
import math

import jax
import jax.numpy as jnp
from jax import lax
from jax.experimental import pallas as pl
from jax.experimental.pallas import tpu as pltpu


def _round_up(x, m):
    return (x + m - 1) // m * m


# --------------------------------------------------------------------------
# Stage 1: h_aug = [x | 1] @ W_aug   (one MXU pass yields h, ones, s1, s2)
# --------------------------------------------------------------------------
def _project_kernel(x_ref, w_ref, o_ref):
    o_ref[...] = jnp.dot(x_ref[...], w_ref[...],
                         preferred_element_type=jnp.float32)


# --------------------------------------------------------------------------
# Stage 2: tiled edge-softmax aggregation over the N x N plane
# --------------------------------------------------------------------------
def _gat_tile_kernel(flags_ref, rowtbl_ref, coltbl_ref,      # scalar prefetch (SMEM)
                     s1_ref, s2_ref, hb_ref, adj_ref,        # inputs
                     out_ref,                                # output (resident over j)
                     *, alpha, concat, n_out, block_cols, hb_resident):
    i = pl.program_id(0)
    j = pl.program_id(1)
    nj = pl.num_programs(1)
    step = i * nj + j

    @pl.when(j == 0)
    def _init():
        out_ref[...] = jnp.zeros_like(out_ref)

    # Block-sparse skip: tiles with no edges neither compute nor (via the
    # repeated block-index tables used by the adj/hb index_maps) re-DMA data.
    @pl.when(flags_ref[step] > 0)
    def _accumulate():
        s1 = s1_ref[...]                      # (TM, 1)  f32 row scores
        s2 = s2_ref[...]                      # (1, TN)  f32 col scores, lane-dense
        scores = s1 + s2                      # (TM, TN) VPU broadcast add
        # -leakyrelu(s) == min(-s, -alpha*s) for 0 < alpha < 1  (one VPU op).
        if 0.0 < alpha < 1.0:
            arg = jnp.minimum(-scores, (-alpha) * scores)
        else:
            arg = jnp.where(scores > 0, -scores, (-alpha) * scores)
        e = jnp.exp(arg)                                           # EUP slot
        e = jnp.where(adj_ref[...] != 0, e, 0.0).astype(jnp.bfloat16)
        if hb_resident:
            hb = hb_ref[pl.ds(pl.multiple_of(j * block_cols, 128), block_cols), :]
        else:
            hb = hb_ref[...]
        # bf16 x bf16 MXU pass with f32 accumulation; columns [:n_out] are the
        # numerator e @ h, column n_out (the folded ones column) is the rowsum.
        out_ref[...] += jnp.dot(e, hb, preferred_element_type=jnp.float32)

    @pl.when(j == nj - 1)
    def _finalize():
        acc = out_ref[...]                    # (TM, Fpad) f32
        rowsum = acc[:, n_out:n_out + 1]      # (TM, 1)
        # eps guard: padded / edge-less rows give 0 instead of NaN.
        inv = pl.reciprocal(jnp.maximum(rowsum, 1e-30), approx=True)
        hp = acc * inv
        if concat:
            hp = jnp.where(hp > 0, hp, jnp.exp(hp) - 1.0)          # F.elu
        out_ref[...] = hp


# --------------------------------------------------------------------------
# Wrapper
# --------------------------------------------------------------------------
@functools.partial(jax.jit,
                   static_argnames=("alpha", "concat", "block_rows", "block_cols"))
def sp_graph_attention_layer(x, adj, W, a, *, alpha, concat=True,
                             block_rows=512, block_cols=512):
    """Pallas forward of SpGraphAttentionLayer (eval mode: dropout = identity)."""
    N, f_in = x.shape
    f_out = W.shape[1]
    alpha = float(alpha)
    concat = bool(concat)

    # Clamp tiles for small N; keep (32, 128) friendliness (int8 adjacency).
    block_rows = max(32, min(block_rows, _round_up(N, 32)))
    block_cols = max(128, min(block_cols, _round_up(N, 128)))
    assert block_rows % 32 == 0 and block_cols % 128 == 0

    x = x.astype(jnp.float32)
    W = W.astype(jnp.float32)
    a = a.astype(jnp.float32)
    a1 = a[:, :f_out]                                   # (1, f_out)
    a2 = a[:, f_out:]                                   # (1, f_out)

    # Independent row / col padding (no lcm blow-up for awkward N).
    n_pad_r = _round_up(N, block_rows)                  # output / adjacency rows
    n_pad_c = _round_up(N, block_cols)                  # adjacency cols / neighbor rows
    n_i = n_pad_r // block_rows
    n_j = n_pad_c // block_cols
    # TODO(synk): when f_out % 128 == 0 the folded ones/s1/s2 columns cost an
    # extra full 128-lane MXU block; switch to an XLU rowsum in that case.
    f_pad = _round_up(f_out + 3, 128)                   # h | ones | s1 | s2 | 0-pad

    # ---- host-side parameter folding (O(f_in * f_out), no N-scale work) ----
    w_aug = jnp.zeros((f_in + 1, f_pad), jnp.float32)
    w_aug = w_aug.at[:f_in, :f_out].set(W)
    w_aug = w_aug.at[f_in, f_out].set(1.0)                      # ones column -> rowsum
    w_aug = w_aug.at[:f_in, f_out + 1].set((W @ a1.T)[:, 0])    # s1 = x @ (W a1^T)
    w_aug = w_aug.at[:f_in, f_out + 2].set((W @ a2.T)[:, 0])    # s2 = x @ (W a2^T)

    proj_rows = min(256, block_rows)
    n_pad_h = _round_up(max(n_pad_r, n_pad_c), proj_rows)
    x_aug = jnp.zeros((n_pad_h, f_in + 1), jnp.float32)
    x_aug = x_aug.at[:N, :f_in].set(x)
    x_aug = x_aug.at[:, f_in].set(1.0)

    # int8 adjacency (4x less DMA than f32), zero-padded to the tile grid.
    # TODO(synk): accept adj as int8/bool upstream to avoid this dense N^2 cast.
    adj_i8 = jnp.zeros((n_pad_r, n_pad_c), jnp.int8)
    adj_i8 = adj_i8.at[:N, :N].set((adj != 0).astype(jnp.int8))

    # ---- stage 1: projection (Pallas, MXU) ----
    h_aug = pl.pallas_call(
        _project_kernel,
        out_shape=jax.ShapeDtypeStruct((n_pad_h, f_pad), jnp.float32),
        grid=(n_pad_h // proj_rows,),
        in_specs=[pl.BlockSpec((proj_rows, f_in + 1), lambda i: (i, 0)),
                  pl.BlockSpec((f_in + 1, f_pad), lambda i: (0, 0))],
        out_specs=pl.BlockSpec((proj_rows, f_pad), lambda i: (i, 0)),
        compiler_params=pltpu.CompilerParams(
            dimension_semantics=("parallel",)),
    )(x_aug, w_aug)

    # Lane-dense score vectors (f32) and the bf16 neighbor operand, extracted
    # once outside the N^2 loop (O(N*f) XLA glue).
    s1 = h_aug[:n_pad_r, f_out + 1:f_out + 2]                        # (n_pad_r, 1)
    s2_row = h_aug[:n_pad_c, f_out + 2:f_out + 3].reshape(1, n_pad_c)
    hb = h_aug[:n_pad_c, :].astype(jnp.bfloat16)                     # (n_pad_c, f_pad)

    # ---- block-sparsity metadata (scalar-prefetched to SMEM) ----
    # flags: does tile (i, j) contain any edge.  rowtbl/coltbl: adjacency block
    # index presented at step (i, j); zero tiles repeat the previous nonzero
    # tile's index so the block index is unchanged and Pallas elides the DMA.
    nz = (adj_i8.reshape(n_i, block_rows, n_j, block_cols) != 0).any(axis=(1, 3))
    flags = nz.astype(jnp.int32).reshape(-1)                         # (n_i * n_j,)
    steps = jnp.arange(n_i * n_j, dtype=jnp.int32)
    last_nz = jnp.maximum(lax.cummax(jnp.where(flags > 0, steps, -1), axis=0), 0)
    rowtbl = (last_nz // n_j).astype(jnp.int32)
    coltbl = (last_nz % n_j).astype(jnp.int32)

    # ---- VMEM budgeting: keep hb resident when it fits (v7x: 64 MiB/TC) ----
    hb_bytes = n_pad_c * f_pad * 2                                   # bf16
    tile_bytes = (2 * block_rows * block_cols                        # adj int8 x2
                  + 2 * block_rows * f_pad * 4                       # out f32 x2
                  + 2 * 4 * (block_rows + block_cols))               # s1 / s2
    hb_resident = (tile_bytes + 2 * hb_bytes) <= (24 << 20)
    vmem_need = tile_bytes + 2 * (hb_bytes if hb_resident
                                  else block_cols * f_pad * 2)
    vmem_limit = int(min(60 << 20, max(32 << 20, 2 * vmem_need)))

    if hb_resident:
        # Whole-array block, constant index -> fetched once, VMEM-resident.
        hb_spec = pl.BlockSpec((n_pad_c, f_pad), lambda i, j, f, r, c: (0, 0))
    else:
        # Streamed per column tile; zero tiles repeat the index (DMA elided).
        hb_spec = pl.BlockSpec((block_cols, f_pad),
                               lambda i, j, f, r, c: (c[i * n_j + j], 0))

    kernel = functools.partial(_gat_tile_kernel, alpha=alpha, concat=concat,
                               n_out=f_out, block_cols=block_cols,
                               hb_resident=hb_resident)

    out_pad = pl.pallas_call(
        kernel,
        out_shape=jax.ShapeDtypeStruct((n_pad_r, f_pad), jnp.float32),
        grid_spec=pltpu.PrefetchScalarGridSpec(
            num_scalar_prefetch=3,
            grid=(n_i, n_j),
            in_specs=[
                pl.BlockSpec((block_rows, 1), lambda i, j, f, r, c: (i, 0)),
                pl.BlockSpec((1, block_cols), lambda i, j, f, r, c: (0, j)),
                hb_spec,
                pl.BlockSpec((block_rows, block_cols),
                             lambda i, j, f, r, c: (r[i * n_j + j],
                                                    c[i * n_j + j])),
            ],
            out_specs=pl.BlockSpec((block_rows, f_pad),
                                   lambda i, j, f, r, c: (i, 0)),
        ),
        compiler_params=pltpu.CompilerParams(
            dimension_semantics=("parallel", "arbitrary"),
            vmem_limit_bytes=vmem_limit),
    )(flags, rowtbl, coltbl, s1, s2_row, hb, adj_i8)

    return out_pad[:N, :f_out]


# --------------------------------------------------------------------------
# Pure-JAX reference mirroring the PyTorch sparse forward (densified, f32)
# --------------------------------------------------------------------------
def _reference(x, adj, W, a, *, alpha, concat=True):
    out_features = W.shape[1]
    h = x @ W
    s1 = h @ a[0, :out_features]
    s2 = h @ a[0, out_features:]
    scores = s1[:, None] + s2[None, :]
    lrelu = jnp.where(scores > 0, scores, alpha * scores)
    e = jnp.where(adj != 0, jnp.exp(-lrelu), 0.0)
    rowsum = jnp.sum(e, axis=-1, keepdims=True)
    h_prime = (e @ h) / rowsum
    if concat:
        h_prime = jnp.where(h_prime > 0, h_prime, jnp.exp(h_prime) - 1.0)
    return h_prime


def _xavier_normal(key, shape, gain):
    fan_in, fan_out = shape[0], shape[1]
    std = gain * math.sqrt(2.0 / (fan_in + fan_out))
    return std * jax.random.normal(key, shape, dtype=jnp.float32)


if __name__ == "__main__":
    # Small deterministic example; banded sparsity so the grid has both
    # nonzero and all-zero adjacency tiles (exercises the skip + DMA-elide path).
    N, in_features, out_features = 600, 8, 32
    alpha = 0.2          # LeakyReLU negative slope
    concat = True

    key = jax.random.PRNGKey(0)
    k_x, k_adj, k_w, k_a = jax.random.split(key, 4)

    x = jax.random.normal(k_x, (N, in_features), dtype=jnp.float32)

    # Banded random adjacency with self-loops (every row has >= 1 edge, so the
    # no-NaN asserts of the PyTorch forward would hold).
    idx = jnp.arange(N)
    band = jnp.abs(idx[:, None] - idx[None, :]) <= 64
    adj = ((jax.random.uniform(k_adj, (N, N)) < 0.3) & band).astype(jnp.float32)
    adj = jnp.maximum(adj, jnp.eye(N, dtype=jnp.float32))

    # Deterministic parameter init mirroring nn.init.xavier_normal_(gain=1.414).
    W = _xavier_normal(k_w, (in_features, out_features), gain=1.414)
    a_param = _xavier_normal(k_a, (1, 2 * out_features), gain=1.414)

    out = sp_graph_attention_layer(x, adj, W, a_param, alpha=alpha,
                                   concat=concat, block_rows=256,
                                   block_cols=256)
    out = jax.block_until_ready(out)

    ref = _reference(x, adj, W, a_param, alpha=alpha, concat=concat)
    assert out.shape == (N, out_features)
    max_err = float(jnp.max(jnp.abs(out - ref)))
    # bf16 e/h MXU matmul (f32 accumulation): expected max error ~1e-3 vs the
    # all-f32 reference, so the tolerance is relaxed from 5e-4 to 5e-3.
    assert jnp.allclose(out, ref, atol=5e-3, rtol=5e-3), max_err

    print("KERNEL_OK")
</pallas_src>

<mosaic_0001>
module attributes {stable_mosaic.version = 11 : i64} {
  func.func @_project_kernel(%arg0: i32, %arg1: memref<256x9xf32, #tpu.memory_space<vmem>>, %arg2: memref<9x128xf32, #tpu.memory_space<vmem>>, %arg3: memref<256x128xf32, #tpu.memory_space<vmem>>) attributes {dimension_semantics = [#tpu.dimension_semantics<parallel>], iteration_bounds = array<i64: 3>, scalar_prefetch = 0 : i64, scratch_operands = 0 : i64, tpu.core_type = #tpu.core_type<tc>, window_params = [{transform_indices = @transform_0, window_bounds = array<i64: 256, 9>}, {pipeline_mode = #tpu.pipeline_mode<synchronous>, transform_indices = @transform_1, window_bounds = array<i64: 9, 128>}, {transform_indices = @transform_2, window_bounds = array<i64: 256, 128>}]} {
    %c0 = arith.constant 0 : index
    %c0_0 = arith.constant 0 : index
    %0 = vector.load %arg1[%c0, %c0_0] : memref<256x9xf32, #tpu.memory_space<vmem>>, vector<256x9xf32>
    %c0_1 = arith.constant 0 : index
    %c0_2 = arith.constant 0 : index
    %1 = vector.load %arg2[%c0_1, %c0_2] : memref<9x128xf32, #tpu.memory_space<vmem>>, vector<9x128xf32>
    %cst = arith.constant dense<0.000000e+00> : vector<256x128xf32>
    %2 = tpu.matmul %0, %1, %cst {dimension_numbers = #tpu.dot_dimension_numbers<[1], [0], [0], [1], [0, 0, 1, 1], [], []>} : vector<256x9xf32>, vector<9x128xf32>, vector<256x128xf32> -> vector<256x128xf32>
    %c0_3 = arith.constant 0 : index
    %c0_4 = arith.constant 0 : index
    %3 = vector.load %arg3[%c0_3, %c0_4] : memref<256x128xf32, #tpu.memory_space<vmem>>, vector<256x128xf32>
    tpu.vector_store %arg3[%c0_3, %c0_4], %2 {strides = array<i32>} : memref<256x128xf32, #tpu.memory_space<vmem>>, vector<256x128xf32>,
    return
  }
  func.func @transform_0(%arg0: i32) -> (i32, i32) {
    %c0_i32 = arith.constant 0 : i32
    %c0_i32_0 = arith.constant 0 : i32
    return %arg0, %c0_i32 : i32, i32
  }
  func.func @transform_1(%arg0: i32) -> (i32, i32) {
    %c0_i32 = arith.constant 0 : i32
    %c0_i32_0 = arith.constant 0 : i32
    %c0_i32_1 = arith.constant 0 : i32
    return %c0_i32, %c0_i32_0 : i32, i32
  }
  func.func @transform_2(%arg0: i32) -> (i32, i32) {
    %c0_i32 = arith.constant 0 : i32
    %c0_i32_0 = arith.constant 0 : i32
    return %arg0, %c0_i32 : i32, i32
  }
}

module attributes {stable_mosaic.version = 11 : i64} {
  func.func @_gat_tile_kernel(%arg0: i32, %arg1: i32, %arg2: memref<9xi32, #tpu.memory_space<smem>>, %arg3: memref<9xi32, #tpu.memory_space<smem>>, %arg4: memref<9xi32, #tpu.memory_space<smem>>, %arg5: memref<256x1xf32, #tpu.memory_space<vmem>>, %arg6: memref<1x256xf32, #tpu.memory_space<vmem>>, %arg7: memref<768x128xbf16, #tpu.memory_space<vmem>>, %arg8: memref<256x256xi8, #tpu.memory_space<vmem>>, %arg9: memref<256x128xf32, #tpu.memory_space<vmem>>) attributes {dimension_semantics = [#tpu.dimension_semantics<parallel>, #tpu.dimension_semantics<arbitrary>], iteration_bounds = array<i64: 3, 3>, scalar_prefetch = 3 : i64, scratch_operands = 0 : i64, tpu.core_type = #tpu.core_type<tc>, window_params = [{transform_indices = @transform_0, window_bounds = array<i64: 256, 1>}, {transform_indices = @transform_1, window_bounds = array<i64: 1, 256>}, {pipeline_mode = #tpu.pipeline_mode<synchronous>, transform_indices = @transform_2, window_bounds = array<i64: 768, 128>}, {transform_indices = @transform_3, window_bounds = array<i64: 256, 256>}, {transform_indices = @transform_4, window_bounds = array<i64: 256, 128>}]} {
    %c3_i32 = arith.constant 3 : i32
    %0 = arith.muli %arg0, %c3_i32 : i32
    %1 = arith.addi %0, %arg1 : i32
    %c0_i32 = arith.constant 0 : i32
    %2 = arith.cmpi eq, %arg1, %c0_i32 : i32
    %3 = arith.extui %2 : i1 to i32
    %c0_i32_0 = arith.constant 0 : i32
    %4 = arith.cmpi ne, %3, %c0_i32_0 : i32
    scf.if %4 {
      %cst = arith.constant 0.000000e+00 : f32
      %13 = vector.broadcast %cst : f32 to vector<256x128xf32>
      %c0 = arith.constant 0 : index
      %c0_4 = arith.constant 0 : index
      %14 = vector.load %arg9[%c0, %c0_4] : memref<256x128xf32, #tpu.memory_space<vmem>>, vector<256x128xf32>
      tpu.vector_store %arg9[%c0, %c0_4], %13 {strides = array<i32>} : memref<256x128xf32, #tpu.memory_space<vmem>>, vector<256x128xf32>,
    } else {
    }
    %5 = arith.index_cast %1 : i32 to index
    %6 = memref.load %arg2[%5] : memref<9xi32, #tpu.memory_space<smem>>
    %c0_i32_1 = arith.constant 0 : i32
    %7 = arith.cmpi sgt, %6, %c0_i32_1 : i32
    %8 = arith.extui %7 : i1 to i32
    %c0_i32_2 = arith.constant 0 : i32
    %9 = arith.cmpi ne, %8, %c0_i32_2 : i32
    scf.if %9 {
      %c0 = arith.constant 0 : index
      %c0_4 = arith.constant 0 : index
      %13 = vector.load %arg5[%c0, %c0_4] : memref<256x1xf32, #tpu.memory_space<vmem>>, vector<256x1xf32>
      %c0_5 = arith.constant 0 : index
      %c0_6 = arith.constant 0 : index
      %14 = vector.load %arg6[%c0_5, %c0_6] : memref<1x256xf32, #tpu.memory_space<vmem>>, vector<1x256xf32>
      %15 = vector.broadcast %13 : vector<256x1xf32> to vector<256x256xf32>
      %16 = vector.broadcast %14 : vector<1x256xf32> to vector<256x256xf32>
      %17 = arith.addf %15, %16 : vector<256x256xf32>
      %cst = arith.constant 0.000000e+00 : f32
      %18 = vector.broadcast %cst : f32 to vector<256x256xf32>
      %19 = arith.subf %18, %17 : vector<256x256xf32>
      %cst_7 = arith.constant -2.000000e-01 : f32
      %20 = vector.broadcast %cst_7 : f32 to vector<256x256xf32>
      %21 = arith.mulf %20, %17 : vector<256x256xf32>
      %22 = arith.minimumf %19, %21 : vector<256x256xf32>
      %23 = math.exp %22 : vector<256x256xf32>
      %c0_8 = arith.constant 0 : index
      %c0_9 = arith.constant 0 : index
      %24 = vector.load %arg8[%c0_8, %c0_9] : memref<256x256xi8, #tpu.memory_space<vmem>>, vector<256x256xi8>
      %c0_i8 = arith.constant 0 : i8
      %25 = vector.broadcast %c0_i8 : i8 to vector<256x256xi8>
      %26 = arith.cmpi ne, %24, %25 : vector<256x256xi8>
      %cst_10 = arith.constant 0.000000e+00 : f32
      %27 = vector.broadcast %cst_10 : f32 to vector<256x256xf32>
      %28 = arith.select %26, %23, %27 : vector<256x256xi1>, vector<256x256xf32>
      %29 = arith.truncf %28 : vector<256x256xf32> to vector<256x256xbf16>
      %c256_i32 = arith.constant 256 : i32
      %30 = arith.muli %arg1, %c256_i32 : i32
      %31 = tpu.assume_multiple %30, 128 : i32
      %32 = arith.index_cast %31 : i32 to index
      %c0_11 = arith.constant 0 : index
      %33 = vector.load %arg7[%32, %c0_11] : memref<768x128xbf16, #tpu.memory_space<vmem>>, vector<256x128xbf16>
      %c0_12 = arith.constant 0 : index
      %c0_13 = arith.constant 0 : index
      %34 = vector.load %arg9[%c0_12, %c0_13] : memref<256x128xf32, #tpu.memory_space<vmem>>, vector<256x128xf32>
      %cst_14 = arith.constant dense<0.000000e+00> : vector<256x128xf32>
      %35 = tpu.matmul %29, %33, %cst_14 {dimension_numbers = #tpu.dot_dimension_numbers<[1], [0], [0], [1], [0, 0, 1, 1], [], []>} : vector<256x256xbf16>, vector<256x128xbf16>, vector<256x128xf32> -> vector<256x128xf32>
      %36 = arith.addf %34, %35 : vector<256x128xf32>
      %c0_15 = arith.constant 0 : index
      %c0_16 = arith.constant 0 : index
      %37 = vector.load %arg9[%c0_15, %c0_16] : memref<256x128xf32, #tpu.memory_space<vmem>>, vector<256x128xf32>
      tpu.vector_store %arg9[%c0_15, %c0_16], %36 {strides = array<i32>} : memref<256x128xf32, #tpu.memory_space<vmem>>, vector<256x128xf32>,
    } else {
    }
    %c2_i32 = arith.constant 2 : i32
    %10 = arith.cmpi eq, %arg1, %c2_i32 : i32
    %11 = arith.extui %10 : i1 to i32
    %c0_i32_3 = arith.constant 0 : i32
    %12 = arith.cmpi ne, %11, %c0_i32_3 : i32
    scf.if %12 {
      %c0 = arith.constant 0 : index
      %c0_4 = arith.constant 0 : index
      %13 = vector.load %arg9[%c0, %c0_4] : memref<256x128xf32, #tpu.memory_space<vmem>>, vector<256x128xf32>
      %14 = vector.extract_strided_slice %13 {offsets = [0, 32], sizes = [256, 1], strides = [1, 1]} : vector<256x128xf32> to vector<256x1xf32>
      %cst = arith.constant 1.000000e-30 : f32
      %15 = vector.broadcast %cst : f32 to vector<256x1xf32>
      %16 = arith.maximumf %14, %15 : vector<256x1xf32>
      %17 = tpu.reciprocal %16 {approx = true} : vector<256x1xf32> -> vector<256x1xf32>
      %18 = vector.broadcast %17 : vector<256x1xf32> to vector<256x128xf32>
      %19 = arith.mulf %13, %18 : vector<256x128xf32>
      %cst_5 = arith.constant 0.000000e+00 : f32
      %20 = vector.broadcast %cst_5 : f32 to vector<256x128xf32>
      %21 = arith.cmpf ogt, %19, %20 : vector<256x128xf32>
      %22 = math.exp %19 : vector<256x128xf32>
      %cst_6 = arith.constant 1.000000e+00 : f32
      %23 = vector.broadcast %cst_6 : f32 to vector<256x128xf32>
      %24 = arith.subf %22, %23 : vector<256x128xf32>
      %25 = arith.select %21, %19, %24 : vector<256x128xi1>, vector<256x128xf32>
      %c0_7 = arith.constant 0 : index
      %c0_8 = arith.constant 0 : index
      %26 = vector.load %arg9[%c0_7, %c0_8] : memref<256x128xf32, #tpu.memory_space<vmem>>, vector<256x128xf32>
      tpu.vector_store %arg9[%c0_7, %c0_8], %25 {strides = array<i32>} : memref<256x128xf32, #tpu.memory_space<vmem>>, vector<256x128xf32>,
    } else {
    }
    return
  }
  func.func @transform_0(%arg0: i32, %arg1: i32, %arg2: memref<9xi32, #tpu.memory_space<smem>>, %arg3: memref<9xi32, #tpu.memory_space<smem>>, %arg4: memref<9xi32, #tpu.memory_space<smem>>) -> (i32, i32) {
    %c0_i32 = arith.constant 0 : i32
    %c0_i32_0 = arith.constant 0 : i32
    return %arg0, %c0_i32 : i32, i32
  }
  func.func @transform_1(%arg0: i32, %arg1: i32, %arg2: memref<9xi32, #tpu.memory_space<smem>>, %arg3: memref<9xi32, #tpu.memory_space<smem>>, %arg4: memref<9xi32, #tpu.memory_space<smem>>) -> (i32, i32) {
    %c0_i32 = arith.constant 0 : i32
    %c0_i32_0 = arith.constant 0 : i32
    return %c0_i32, %arg1 : i32, i32
  }
  func.func @transform_2(%arg0: i32, %arg1: i32, %arg2: memref<9xi32, #tpu.memory_space<smem>>, %arg3: memref<9xi32, #tpu.memory_space<smem>>, %arg4: memref<9xi32, #tpu.memory_space<smem>>) -> (i32, i32) {
    %c0_i32 = arith.constant 0 : i32
    %c0_i32_0 = arith.constant 0 : i32
    %c0_i32_1 = arith.constant 0 : i32
    return %c0_i32, %c0_i32_0 : i32, i32
  }
  func.func @transform_3(%arg0: i32, %arg1: i32, %arg2: memref<9xi32, #tpu.memory_space<smem>>, %arg3: memref<9xi32, #tpu.memory_space<smem>>, %arg4: memref<9xi32, #tpu.memory_space<smem>>) -> (i32, i32) {
    %c3_i32 = arith.constant 3 : i32
    %0 = arith.muli %arg0, %c3_i32 : i32
    %1 = arith.addi %0, %arg1 : i32
    %2 = arith.index_cast %1 : i32 to index
    %3 = memref.load %arg3[%2] : memref<9xi32, #tpu.memory_space<smem>>
    %c3_i32_0 = arith.constant 3 : i32
    %4 = arith.muli %arg0, %c3_i32_0 : i32
    %5 = arith.addi %4, %arg1 : i32
    %6 = arith.index_cast %5 : i32 to index
    %7 = memref.load %arg4[%6] : memref<9xi32, #tpu.memory_space<smem>>
    %c0_i32 = arith.constant 0 : i32
    return %3, %7 : i32, i32
  }
  func.func @transform_4(%arg0: i32, %arg1: i32, %arg2: memref<9xi32, #tpu.memory_space<smem>>, %arg3: memref<9xi32, #tpu.memory_space<smem>>, %arg4: memref<9xi32, #tpu.memory_space<smem>>) -> (i32, i32) {
    %c0_i32 = arith.constant 0 : i32
    %c0_i32_0 = arith.constant 0 : i32
    return %arg0, %c0_i32 : i32, i32
  }
}

</mosaic_0001>

<bundles_post_ra>
// kernel: sp_graph_attention_layer.2
= control target key start
LH: loop header
LB: loop body
LE: loop exit
PB: predicated region body
PF: predicated region fallthrough
CT: control target
= control target key end

     0   :  { %s564_s9 = smov 0   ;;  %s694_s0 = inlined_call_operand.vmem [shape: f32[768,9], index: 0, kind: input, shape index: {}]   ;;  %s695_s1 = inlined_call_operand.vmem [shape: f32[9,128], index: 1, kind: input, shape index: {}]   ;;  %s696_s2 = inlined_call_operand.vmem [shape: f32[768,128], index: 2, kind: output, shape index: {}]  }
   0x1 LB: > { %s483_s10 = sadd.s32 4294967295, %s547_s9   ;;  %p487_p0 = scmp.ge.s32.totalorder %s547_s9, 1  ;;  %s547_s9 = sphi %s564_s9, %s12_s9  }
   0x2   : > { %p113_p1 = scmp.lt.s32.totalorder %s547_s9, 4 }
   0x4   : > { %p114_p2 = pnand %p487_p0, %p113_p1 }
   0x5   : > { %s488_s15 = sshll.u32 (!%p114_p2), %s483_s10, 5 }
   0x6   : > { %117 = sbr.rel (%p114_p2) target bundleno = 206 (0xce), region = 28  ;;  %p136_p3 = scmp.lt.s32.totalorder (!%p114_p2), %s488_s15, 95 }
   0xb   : > { %v180_v0 = vld [vmem:[%s695_s1 + $0x8] sm:$0x1]  ;;  %vm278_vm0 = vcmask 1040384   ;;  %v179_v1 = vld [vmem:[%s695_s1] sm:$0xff]  ;;  %s698_s15 = smov (!%p136_p3, %s488_s15), 95  ;;  %vm181_vm1 = vcmask 72704  }
   0xc   : > { %528 = vmatpush.msk.msra.mxu2 %vm278_vm0, %v180_v0  ;;  %529 = vmatpush.msk.msra.mxu3 %vm278_vm0, %v180_v0  ;;  %s489_s16 = sshll.u32 %s698_s15, 3 }
   0xd   : > { %492 = vmatpush.msk.msra.mxu0 %vm278_vm0, %v180_v0  ;;  %527 = vmatpush.msk.msra.mxu1 %vm278_vm0, %v180_v0  ;;  %s586_s19 = scalar_lea.vmem %s694_s0, %s489_s16  ;;  %s657_s22 = scalar_lea.vmem %s696_s2, %s489_s16 }
   0xe   : > { %531 = vmatpush.msra.mxu2 %v179_v1  ;;  %532 = vmatpush.msra.mxu3 %v179_v1  ;;  %v163_v2 = vld [vmem:[%s586_s19 + $0x80] sm:$0xff]  ;;  %v164_v6 = vld [vmem:[%s586_s19 + $0x88] sm:$0xff]  ;;  %v165_v10 = vld [vmem:[%s586_s19 + $0x90] sm:$0xff] }
   0xf   : > { %297 = vmatpush.msra.mxu0 %v179_v1  ;;  %530 = vmatpush.msra.mxu1 %v179_v1  ;;  %v171_v3 = vld [vmem:[%s586_s19 + $0xc0] sm:$0xff]  ;;  %v172_v7 = vld [vmem:[%s586_s19 + $0xc8] sm:$0xff]  ;;  %v173_v11 = vld [vmem:[%s586_s19 + $0xd0] sm:$0xff] }
  0x10   : > { %v147_v4 = vld [vmem:[%s586_s19] sm:$0xff]  ;;  %509 = vmatmul.msk.f32.vlgmr.msra.gmra.mxu2 %vm181_vm1, %v163_v2  ;;  %517 = vmatmul.msk.f32.vlgmr.msra.gmra.mxu3 %vm181_vm1, %v171_v3  ;;  %v148_v8 = vld [vmem:[%s586_s19 + $0x8] sm:$0xff]  ;;  %v149_v12 = vld [vmem:[%s586_s19 + $0x10] sm:$0xff] }
  0x11   : > { %v155_v5 = vld [vmem:[%s586_s19 + $0x40] sm:$0xff]  ;;  %493 = vmatmul.msk.f32.vlgmr.msra.gmra.mxu0 %vm181_vm1, %v147_v4  ;;  %v156_v9 = vld [vmem:[%s586_s19 + $0x48] sm:$0xff]  ;;  %v157_v13 = vld [vmem:[%s586_s19 + $0x50] sm:$0xff] }
  0x12   : > { %501 = vmatmul.msk.f32.vlgmr.msra.gmra.mxu1 %vm181_vm1, %v155_v5  ;;  %v166_v14 = vld [vmem:[%s586_s19 + $0x98] sm:$0xff]  ;;  %v167_v18 = vld [vmem:[%s586_s19 + $0xa0] sm:$0xff]  ;;  %v168_v22 = vld [vmem:[%s586_s19 + $0xa8] sm:$0xff] }
  0x13   : > { %v174_v15 = vld [vmem:[%s586_s19 + $0xd8] sm:$0xff]  ;;  %v175_v19 = vld [vmem:[%s586_s19 + $0xe0] sm:$0xff]  ;;  %v176_v23 = vld [vmem:[%s586_s19 + $0xe8] sm:$0xff] }
  0x14   : > { %v150_v16 = vld [vmem:[%s586_s19 + $0x18] sm:$0xff]  ;;  %v151_v20 = vld [vmem:[%s586_s19 + $0x20] sm:$0xff]  ;;  %v152_v24 = vld [vmem:[%s586_s19 + $0x28] sm:$0xff] }
  0x15   : > { %v158_v17 = vld [vmem:[%s586_s19 + $0x58] sm:$0xff]  ;;  %v159_v21 = vld [vmem:[%s586_s19 + $0x60] sm:$0xff]  ;;  %v160_v25 = vld [vmem:[%s586_s19 + $0x68] sm:$0xff] }
  0x16   : > { %v169_v26 = vld [vmem:[%s586_s19 + $0xb0] sm:$0xff]  ;;  %v170_v30 = vld [vmem:[%s586_s19 + $0xb8] sm:$0xff] }
  0x17   : > { %v177_v27 = vld [vmem:[%s586_s19 + $0xf0] sm:$0xff]  ;;  %v178_v31 = vld [vmem:[%s586_s19 + $0xf8] sm:$0xff] }
  0x18   : > { %510 = vmatmul.msk.f32.gmra.mxu2 %vm181_vm1, %v164_v6  ;;  %518 = vmatmul.msk.f32.gmra.mxu3 %vm181_vm1, %v172_v7  ;;  %v153_v28 = vld [vmem:[%s586_s19 + $0x30] sm:$0xff]  ;;  %v154_v32 = vld [vmem:[%s586_s19 + $0x38] sm:$0xff] }
  0x19   : > { %494 = vmatmul.msk.f32.gmra.mxu0 %vm181_vm1, %v148_v8  ;;  %v161_v29 = vld [vmem:[%s586_s19 + $0x70] sm:$0xff]  ;;  %v162_v33 = vld [vmem:[%s586_s19 + $0x78] sm:$0xff] }
  0x1a   : > { %502 = vmatmul.msk.f32.gmra.mxu1 %vm181_vm1, %v156_v9 }
  0x20   : > { %511 = vmatmul.msk.f32.gmra.mxu2 %vm181_vm1, %v165_v10  ;;  %519 = vmatmul.msk.f32.gmra.mxu3 %vm181_vm1, %v173_v11 }
  0x21   : > { %495 = vmatmul.msk.f32.gmra.mxu0 %vm181_vm1, %v149_v12 }
  0x22   : > { %503 = vmatmul.msk.f32.gmra.mxu1 %vm181_vm1, %v157_v13 }
  0x28   : > { %512 = vmatmul.msk.f32.gmra.mxu2 %vm181_vm1, %v166_v14  ;;  %520 = vmatmul.msk.f32.gmra.mxu3 %vm181_vm1, %v174_v15 }
  0x29   : > { %496 = vmatmul.msk.f32.gmra.mxu0 %vm181_vm1, %v150_v16 }
  0x2a   : > { %504 = vmatmul.msk.f32.gmra.mxu1 %vm181_vm1, %v158_v17 }
  0x30   : > { %513 = vmatmul.msk.f32.gmra.mxu2 %vm181_vm1, %v167_v18  ;;  %521 = vmatmul.msk.f32.gmra.mxu3 %vm181_vm1, %v175_v19 }
  0x31   : > { %497 = vmatmul.msk.f32.gmra.mxu0 %vm181_vm1, %v151_v20 }
  0x32   : > { %505 = vmatmul.msk.f32.gmra.mxu1 %vm181_vm1, %v159_v21 }
  0x38   : > { %514 = vmatmul.msk.f32.gmra.mxu2 %vm181_vm1, %v168_v22  ;;  %522 = vmatmul.msk.f32.gmra.mxu3 %vm181_vm1, %v176_v23 }
  0x39   : > { %498 = vmatmul.msk.f32.gmra.mxu0 %vm181_vm1, %v152_v24 }
  0x3a   : > { %506 = vmatmul.msk.f32.gmra.mxu1 %vm181_vm1, %v160_v25 }
  0x40   : > { %515 = vmatmul.msk.f32.gmra.mxu2 %vm181_vm1, %v169_v26  ;;  %523 = vmatmul.msk.f32.gmra.mxu3 %vm181_vm1, %v177_v27 }
  0x41   : > { %499 = vmatmul.msk.f32.gmra.mxu0 %vm181_vm1, %v153_v28 }
  0x42   : > { %507 = vmatmul.msk.f32.gmra.mxu1 %vm181_vm1, %v161_v29 }
  0x48   : > { %516 = vmatmul.msk.f32.gmra.mxu2 %vm181_vm1, %v170_v30  ;;  %524 = vmatmul.msk.f32.gmra.mxu3 %vm181_vm1, %v178_v31 }
  0x49   : > { %500 = vmatmul.msk.f32.gmra.mxu0 %vm181_vm1, %v154_v32 }
  0x4a   : > { %508 = vmatmul.msk.f32.gmra.mxu1 %vm181_vm1, %v162_v33 }
  0x8e   : > { %v299_v34 = vpop.f32.mrf.mxu0 }
  0x8f   : > { %v323_v35 = vpop.f32.mrf.mxu1  ;;  %395 = vst [vmem:[%s657_s22] sm:$0xff] %v299_v34 }
  0x90   : > { %403 = vst [vmem:[%s657_s22 + $0x40] sm:$0xff] %v323_v35 }
  0x93   : > { %v347_v36 = vpop.f32.mrf.mxu2  ;;  %v371_v37 = vpop.f32.mrf.mxu3 }
  0x94   : > { %411 = vst [vmem:[%s657_s22 + $0x80] sm:$0xff] %v347_v36 }
  0x95   : > { %419 = vst [vmem:[%s657_s22 + $0xc0] sm:$0xff] %v371_v37 }
  0x96   : > { %v302_v38 = vpop.f32.mrf.mxu0 }
  0x97   : > { %v326_v39 = vpop.f32.mrf.mxu1  ;;  %396 = vst [vmem:[%s657_s22 + $0x8] sm:$0xff] %v302_v38 }
  0x98   : > { %404 = vst [vmem:[%s657_s22 + $0x48] sm:$0xff] %v326_v39 }
  0x9b   : > { %v350_v40 = vpop.f32.mrf.mxu2  ;;  %v374_v41 = vpop.f32.mrf.mxu3 }
  0x9c   : > { %412 = vst [vmem:[%s657_s22 + $0x88] sm:$0xff] %v350_v40 }
  0x9d   : > { %420 = vst [vmem:[%s657_s22 + $0xc8] sm:$0xff] %v374_v41 }
  0x9e   : > { %v305_v42 = vpop.f32.mrf.mxu0 }
  0x9f   : > { %v329_v43 = vpop.f32.mrf.mxu1  ;;  %397 = vst [vmem:[%s657_s22 + $0x10] sm:$0xff] %v305_v42 }
  0xa0   : > { %405 = vst [vmem:[%s657_s22 + $0x50] sm:$0xff] %v329_v43 }
  0xa3   : > { %v353_v44 = vpop.f32.mrf.mxu2  ;;  %v377_v45 = vpop.f32.mrf.mxu3 }
  0xa4   : > { %413 = vst [vmem:[%s657_s22 + $0x90] sm:$0xff] %v353_v44 }
  0xa5   : > { %421 = vst [vmem:[%s657_s22 + $0xd0] sm:$0xff] %v377_v45 }
  0xa6   : > { %v308_v46 = vpop.f32.mrf.mxu0 }
  0xa7   : > { %v332_v47 = vpop.f32.mrf.mxu1  ;;  %398 = vst [vmem:[%s657_s22 + $0x18] sm:$0xff] %v308_v46 }
  0xa8   : > { %406 = vst [vmem:[%s657_s22 + $0x58] sm:$0xff] %v332_v47 }
  0xab   : > { %v356_v48 = vpop.f32.mrf.mxu2  ;;  %v380_v49 = vpop.f32.mrf.mxu3 }
  0xac   : > { %414 = vst [vmem:[%s657_s22 + $0x98] sm:$0xff] %v356_v48 }
  0xad   : > { %422 = vst [vmem:[%s657_s22 + $0xd8] sm:$0xff] %v380_v49 }
  0xae   : > { %v311_v50 = vpop.f32.mrf.mxu0 }
  0xaf   : > { %v335_v51 = vpop.f32.mrf.mxu1  ;;  %399 = vst [vmem:[%s657_s22 + $0x20] sm:$0xff] %v311_v50 }
  0xb0   : > { %407 = vst [vmem:[%s657_s22 + $0x60] sm:$0xff] %v335_v51 }
  0xb3   : > { %v359_v52 = vpop.f32.mrf.mxu2  ;;  %v383_v53 = vpop.f32.mrf.mxu3 }
  0xb4   : > { %415 = vst [vmem:[%s657_s22 + $0xa0] sm:$0xff] %v359_v52 }
  0xb5   : > { %423 = vst [vmem:[%s657_s22 + $0xe0] sm:$0xff] %v383_v53 }
  0xb6   : > { %v314_v54 = vpop.f32.mrf.mxu0 }
  0xb7   : > { %v338_v55 = vpop.f32.mrf.mxu1  ;;  %400 = vst [vmem:[%s657_s22 + $0x28] sm:$0xff] %v314_v54 }
  0xb8   : > { %408 = vst [vmem:[%s657_s22 + $0x68] sm:$0xff] %v338_v55 }
  0xbb   : > { %v362_v56 = vpop.f32.mrf.mxu2  ;;  %v386_v57 = vpop.f32.mrf.mxu3 }
  0xbc   : > { %416 = vst [vmem:[%s657_s22 + $0xa8] sm:$0xff] %v362_v56 }
  0xbd   : > { %424 = vst [vmem:[%s657_s22 + $0xe8] sm:$0xff] %v386_v57 }
  0xbe   : > { %v317_v58 = vpop.f32.mrf.mxu0 }
  0xbf   : > { %v341_v59 = vpop.f32.mrf.mxu1  ;;  %401 = vst [vmem:[%s657_s22 + $0x30] sm:$0xff] %v317_v58 }
  0xc0   : > { %409 = vst [vmem:[%s657_s22 + $0x70] sm:$0xff] %v341_v59 }
  0xc3   : > { %v365_v60 = vpop.f32.mrf.mxu2  ;;  %v389_v61 = vpop.f32.mrf.mxu3 }
  0xc4   : > { %417 = vst [vmem:[%s657_s22 + $0xb0] sm:$0xff] %v365_v60 }
  0xc5   : > { %425 = vst [vmem:[%s657_s22 + $0xf0] sm:$0xff] %v389_v61 }
  0xc6   : > { %v320_v62 = vpop.f32.mrf.mxu0 }
  0xc7   : > { %v344_v63 = vpop.f32.mrf.mxu1  ;;  %402 = vst [vmem:[%s657_s22 + $0x38] sm:$0xff] %v320_v62 }
  0xc8   : > { %410 = vst [vmem:[%s657_s22 + $0x78] sm:$0xff] %v344_v63 }
  0xcb   : > { %v368_v0 = vpop.f32.mrf.mxu2  ;;  %v392_v1 = vpop.f32.mrf.mxu3 }
  0xcc   : > { %418 = vst [vmem:[%s657_s22 + $0xb8] sm:$0xff] %v368_v0 }
  0xcd   : > { %426 = vst [vmem:[%s657_s22 + $0xf8] sm:$0xff] %v392_v1 }
  0xce PF: > { %s12_s9 = sadd.s32 1, %s547_s9  }
  0xcf   : > { %p9_p4 = scmp.ge.s32.totalorder %s12_s9, 5  }
  0xd1   :  { %11 = sbr.rel (!%p9_p4) target bundleno = 1 (0x1), region = 58 }

// kernel: sp_graph_attention_layer.3
= control target key start
LH: loop header
LB: loop body
LE: loop exit
PB: predicated region body
PF: predicated region fallthrough
CT: control target
= control target key end

     0   :  { %s3094_s30 = smov [#allocation3]   ;;  %s3095_s8 = smov [#allocation4]   ;;  %s4410_s0 = inlined_call_operand.vmem [shape: s32[9], index: 0, kind: input, shape index: {}]   ;;  %s4411_s3 = inlined_call_operand.vmem [shape: f32[768,1], index: 3, kind: input, shape index: {}]   ;;  %s4412_s4 = inlined_call_operand.vmem [shape: f32[1,768], index: 4, kind: input, shape index: {}]   ;;  %s4413_s5 = inlined_call_operand.vmem [shape: bf16[768,128], index: 5, kind: input, shape index: {}]   ;;  %s4414_s6 = inlined_call_operand.vmem [shape: s8[768,768], index: 6, kind: input, shape index: {}]   ;;  %s4415_s7 = inlined_call_operand.vmem [shape: f32[768,128], index: 7, kind: output, shape index: {}]   ;;  %s4416_s1 = inlined_call_operand.vmem [shape: s32[9], index: 1, kind: input, shape index: {}]   ;;  %s4417_s2 = inlined_call_operand.vmem [shape: s32[9], index: 2, kind: input, shape index: {}]  }
   0x1   :  { %s13_s26 = sshll.u32 %s4410_s0, 4  ;;  %s18_s29 = sshll.u32 %s4416_s1, 4  ;;  %s14_s26 = int_to_ptr.vmem [resolvable:$true] %s13_s26  ;;  %s19_s29 = int_to_ptr.vmem [resolvable:$true] %s18_s29 }
   0x2   :  { %16 = dma.vmem_to_smem %s14_s26, 16, %s3094_s30, [#allocation2] }
   0x3   :  { %21 = dma.vmem_to_smem %s19_s29, 16, %s3095_s8, [#allocation2] }
   0x4   :  { %s23_s11 = sshll.u32 %s4417_s2, 4  ;;  %s3096_s12 = smov [#allocation5]   ;;  %s24_s11 = int_to_ptr.vmem [resolvable:$true] %s23_s11 }
   0x5   :  { %26 = dma.vmem_to_smem %s24_s11, 16, %s3096_s12, [#allocation2] }
   0x6   :  { %3064 = dma.done.wait [#allocation2], 48 }
   0x7   :  { %3065 = vsyncadd [#allocation2], 4294967248 }
   0x8   :  { %29 = sfence }
   0x9   :  { %s3149_s0 = smov 0   ;;  %s3151_s13 = smov 0  }
   0xa   :  { %s3153_s1 = smov 0   ;;  %s3155_s14 = smov 0  }
   0xb   :  { %s3157_s15 = smov 0   ;;  %s3159_s16 = smov 0  }
   0xc   :  { %s3161_s17 = smov 0  }
   0xd LB: > { %s44_s2 = sadd.s32 1, %s3084_s15  ;;  %s47_s18 = sadd.s32 1, %s3088_s16  ;;  %s3092_s17 = sphi %s3161_s17, %s35_s17   ;;  %s3088_s16 = sphi %s3159_s16, %s4518_s16   ;;  %s3084_s15 = sphi %s3157_s15, %s4517_s15   ;;  %s3080_s14 = sphi %s3155_s14, %s4516_s14   ;;  %s3076_s1 = sphi %s3153_s1, %s4515_s1   ;;  %s3072_s13 = sphi %s3151_s13, %s4514_s13   ;;  %s3068_s0 = sphi %s3149_s0, %s4513_s0  }
   0xe   : > { %p45_p0 = scmp.ge.s32.totalorder %s44_s2, 3  ;;  %s124_s19 = smul.u32 3, %s3088_s16 }
   0xf   : > { %p144_p1 = scmp.ne.s32.totalorder %s3072_s13, %s3068_s0  ;;  %p145_p2 = scmp.eq.s32.totalorder %s3092_s17, 0 }
  0x10   : > { %s4520_s2 = smov (%p45_p0, %s44_s2), 0  ;;  %s4522_s18 = smov (!%p45_p0, %s47_s18), %s3088_s16 }
  0x11   : > { %p49_p3 = scmp.ge.s32.totalorder %s4522_s18, 3  ;;  %s125_s20 = sadd.s32 %s3084_s15, %s124_s19 }
  0x12   : > { %p3194_p4 = por %p145_p2, %p144_p1  ;;  %s126_s23 = sld [smem:[#allocation4 + %s125_s20]] }
  0x13   : > { %s4524_s18 = smov (%p49_p3, %s4522_s18), 0  ;;  %s127_s24 = sld [smem:[#allocation5 + %s125_s20]] }
  0x14   : > { %s128_s22 = smul.u32 3, %s4524_s18  ;;  %s137_s8 = sadd.s32 1, %s3072_s13 }
  0x15   : > { %p2431_p6 = scmp.ge.s32.totalorder %s3092_s17, 9 }
  0x16   : > { %s129_s25 = sadd.s32 %s128_s22, %s4520_s2 }
  0x17   : > { %s130_s26 = sld [smem:[#allocation4 + %s129_s25]] }
  0x18   : > { %s131_s27 = sld [smem:[#allocation5 + %s129_s25]] }
  0x1d   : > { %s132_s28 = ssub.s32 %s126_s23, %s130_s26 }
  0x1e   : > { %s133_s29 = ssub.s32 %s127_s24, %s131_s27  ;;  %199 = sbr.rel (%p2431_p6) target bundleno = 63 (0x3f), region = 20 }
  0x1f   : > { %s134_s30 = sor.u32 %s133_s29, %s132_s28 }
  0x20   : > { %p135_p5 = scmp.eq.s32.totalorder %s134_s30, 0 }
  0x22   : > { %s3204_s9 = scalar_select %p135_p5, %s3072_s13, %s137_s8  }
  0x23   : > { %219 = sbr.rel (!%p3194_p4) target bundleno = 63 (0x3f), region = 32  ;;  %s226_s10 = sld [smem:[#allocation4 + %s125_s20]] (%p3194_p4) }
  0x24   : > { %s227_s11 = sld [smem:[#allocation5 + %s125_s20]] (%p3194_p4)  ;;  %s221_s12 = sand.u32 (%p3194_p4), 1, %s3072_s13  }
  0x25   : > { %s2432_s19 = sshll.u32 (%p3194_p4), %s221_s12, 7 }
  0x26   : > { %s223_s20 = scalar_lea.vmem (%p3194_p4), [#allocation6], %s2432_s19 }
  0x29   : > { %s2675_s22 = smul.u32 48, %s226_s10 }
  0x2a   : > { %s2434_s25 = sshll.u32 %s227_s11, 1 }
  0x2b   : > { %s231_s23 = sadd.s32 %s2675_s22, %s2434_s25 }
  0x2c   : > { %s2436_s24 = sshll.u32 %s231_s23, 3 }
  0x2d   : > { %s3213_s28 = scalar_lea.vmem %s4414_s6, %s2436_s24 }
  0x2e   : > { %v246_v0 = vld [vmem:[%s3213_s28] sm:$0xff]  ;;  %v248_v1 = vld [vmem:[%s3213_s28 + $0x8] sm:$0xff]  ;;  %v250_v2 = vld [vmem:[%s3213_s28 + $0x30] sm:$0xff] }
  0x2f   : > { %247 = vst [vmem:[%s223_s20] sm:$0xff] %v246_v0  ;;  %v252_v3 = vld [vmem:[%s3213_s28 + $0x38] sm:$0xff]  ;;  %v254_v4 = vld [vmem:[%s3213_s28 + $0x60] sm:$0xff]  ;;  %v256_v5 = vld [vmem:[%s3213_s28 + $0x68] sm:$0xff] }
  0x30   : > { %249 = vst [vmem:[%s223_s20 + $0x8] sm:$0xff] %v248_v1  ;;  %v258_v6 = vld [vmem:[%s3213_s28 + $0x90] sm:$0xff]  ;;  %v260_v7 = vld [vmem:[%s3213_s28 + $0x98] sm:$0xff]  ;;  %v262_v8 = vld [vmem:[%s3213_s28 + $0xc0] sm:$0xff] }
  0x31   : > { %251 = vst [vmem:[%s223_s20 + $0x10] sm:$0xff] %v250_v2  ;;  %v264_v9 = vld [vmem:[%s3213_s28 + $0xc8] sm:$0xff]  ;;  %v266_v10 = vld [vmem:[%s3213_s28 + $0xf0] sm:$0xff]  ;;  %v268_v11 = vld [vmem:[%s3213_s28 + $0xf8] sm:$0xff] }
  0x32   : > { %253 = vst [vmem:[%s223_s20 + $0x18] sm:$0xff] %v252_v3  ;;  %v270_v12 = vld [vmem:[%s3213_s28 + $0x120] sm:$0xff]  ;;  %v272_v13 = vld [vmem:[%s3213_s28 + $0x128] sm:$0xff]  ;;  %v274_v14 = vld [vmem:[%s3213_s28 + $0x150] sm:$0xff] }
  0x33   : > { %255 = vst [vmem:[%s223_s20 + $0x20] sm:$0xff] %v254_v4  ;;  %v276_v15 = vld [vmem:[%s3213_s28 + $0x158] sm:$0xff] }
  0x34   : > { %257 = vst [vmem:[%s223_s20 + $0x28] sm:$0xff] %v256_v5 }
  0x35   : > { %259 = vst [vmem:[%s223_s20 + $0x30] sm:$0xff] %v258_v6 }
  0x36   : > { %261 = vst [vmem:[%s223_s20 + $0x38] sm:$0xff] %v260_v7 }
  0x37   : > { %263 = vst [vmem:[%s223_s20 + $0x40] sm:$0xff] %v262_v8 }
  0x38   : > { %265 = vst [vmem:[%s223_s20 + $0x48] sm:$0xff] %v264_v9 }
  0x39   : > { %267 = vst [vmem:[%s223_s20 + $0x50] sm:$0xff] %v266_v10 }
  0x3a   : > { %269 = vst [vmem:[%s223_s20 + $0x58] sm:$0xff] %v268_v11 }
  0x3b   : > { %271 = vst [vmem:[%s223_s20 + $0x60] sm:$0xff] %v270_v12 }
  0x3c   : > { %273 = vst [vmem:[%s223_s20 + $0x68] sm:$0xff] %v272_v13 }
  0x3d   : > { %275 = vst [vmem:[%s223_s20 + $0x70] sm:$0xff] %v274_v14 }
  0x3e   : > { %277 = vst [vmem:[%s223_s20 + $0x78] sm:$0xff] %v276_v15 }
  0x3f PF: > { %p2437_p7 = scmp.ge.s32.totalorder %s3092_s17, 1  ;;  %p282_p8 = scmp.lt.s32.totalorder %s3092_s17, 10 }
  0x41   : > { %p283_p9 = pnand %p2437_p7, %p282_p8 }
  0x42   : > { %s289_s21 = sand.u32 (!%p283_p9), 1, %s3068_s0   ;;  %s2439_s29 = sshll.u32 (!%p283_p9), %s3080_s14, 5 }
  0x43   : > { %286 = sbr.rel (%p283_p9) target bundleno = 804 (0x324), region = 55  ;;  %s2438_s30 = sshll.u32 (!%p283_p9), %s289_s21, 7 }
  0x44   : > { %p324_p10 = scmp.lt.s32.totalorder (!%p283_p9), %s2439_s29, 95  ;;  %s2441_s8 = sshll.u32 (!%p283_p9), %s3076_s1, 1 }
  0x45   : > { %p330_p11 = scmp.lt.s32.totalorder (!%p283_p9), %s2441_s8, 5  ;;  %s348_s10 = smul.u32 (!%p283_p9), 3, %s3080_s14 }
  0x46   : > { %s3256_s28 = scalar_lea.vmem (!%p283_p9), [#allocation6], %s2438_s30  ;;  %p2444_p12 = scmp.ne.s32.totalorder (!%p283_p9), %s3076_s1, 0 }
  0x47   : > { %s3250_s0 = sadd.s32 (!%p283_p9), %s3076_s1, %s348_s10 }
  0x48   : > { %s4526_s29 = smov (!%p324_p10, %s2439_s29), 95  ;;  %s4528_s8 = smov (!%p330_p11, %s2441_s8), 5 }
  0x49   : > { %s2440_s11 = sshll.u32 %s4526_s29, 3  ;;  %s332_s14 = scalar_lea.vmem %s4412_s4, %s4528_s8 }
  0x4a   : > { %s3240_s22 = scalar_lea.vmem %s4411_s3, %s2440_s11  ;;  %s3245_s24 = scalar_lea.vmem %s4415_s7, %s2440_s11 }
  0x4b   : > { %353 = sbr.rel (%p2444_p12) target bundleno = 113 (0x71), region = 63 }
  0x50   : > { %v3097_v16 = vmov 0.0  }
  0x51   : > { %354 = vst [vmem:[%s3245_s24] sm:$0xff] %v3097_v16 }
  0x52   : > { %355 = vst [vmem:[%s3245_s24 + $0x8] sm:$0xff] %v3097_v16 }
  0x53   : > { %356 = vst [vmem:[%s3245_s24 + $0x10] sm:$0xff] %v3097_v16 }
  0x54   : > { %357 = vst [vmem:[%s3245_s24 + $0x18] sm:$0xff] %v3097_v16 }
  0x55   : > { %358 = vst [vmem:[%s3245_s24 + $0x20] sm:$0xff] %v3097_v16 }
  0x56   : > { %359 = vst [vmem:[%s3245_s24 + $0x28] sm:$0xff] %v3097_v16 }
  0x57   : > { %360 = vst [vmem:[%s3245_s24 + $0x30] sm:$0xff] %v3097_v16 }
  0x58   : > { %361 = vst [vmem:[%s3245_s24 + $0x38] sm:$0xff] %v3097_v16 }
  0x59   : > { %362 = vst [vmem:[%s3245_s24 + $0x40] sm:$0xff] %v3097_v16 }
  0x5a   : > { %363 = vst [vmem:[%s3245_s24 + $0x48] sm:$0xff] %v3097_v16 }
  0x5b   : > { %364 = vst [vmem:[%s3245_s24 + $0x50] sm:$0xff] %v3097_v16 }
  0x5c   : > { %365 = vst [vmem:[%s3245_s24 + $0x58] sm:$0xff] %v3097_v16 }
  0x5d   : > { %366 = vst [vmem:[%s3245_s24 + $0x60] sm:$0xff] %v3097_v16 }
  0x5e   : > { %367 = vst [vmem:[%s3245_s24 + $0x68] sm:$0xff] %v3097_v16 }
  0x5f   : > { %368 = vst [vmem:[%s3245_s24 + $0x70] sm:$0xff] %v3097_v16 }
  0x60   : > { %369 = vst [vmem:[%s3245_s24 + $0x78] sm:$0xff] %v3097_v16 }
  0x61   : > { %370 = vst [vmem:[%s3245_s24 + $0x80] sm:$0xff] %v3097_v16 }
  0x62   : > { %371 = vst [vmem:[%s3245_s24 + $0x88] sm:$0xff] %v3097_v16 }
  0x63   : > { %372 = vst [vmem:[%s3245_s24 + $0x90] sm:$0xff] %v3097_v16 }
  0x64   : > { %373 = vst [vmem:[%s3245_s24 + $0x98] sm:$0xff] %v3097_v16 }
  0x65   : > { %374 = vst [vmem:[%s3245_s24 + $0xa0] sm:$0xff] %v3097_v16 }
  0x66   : > { %375 = vst [vmem:[%s3245_s24 + $0xa8] sm:$0xff] %v3097_v16 }
  0x67   : > { %376 = vst [vmem:[%s3245_s24 + $0xb0] sm:$0xff] %v3097_v16 }
  0x68   : > { %377 = vst [vmem:[%s3245_s24 + $0xb8] sm:$0xff] %v3097_v16 }
  0x69   : > { %378 = vst [vmem:[%s3245_s24 + $0xc0] sm:$0xff] %v3097_v16 }
  0x6a   : > { %379 = vst [vmem:[%s3245_s24 + $0xc8] sm:$0xff] %v3097_v16 }
  0x6b   : > { %380 = vst [vmem:[%s3245_s24 + $0xd0] sm:$0xff] %v3097_v16 }
  0x6c   : > { %381 = vst [vmem:[%s3245_s24 + $0xd8] sm:$0xff] %v3097_v16 }
  0x6d   : > { %382 = vst [vmem:[%s3245_s24 + $0xe0] sm:$0xff] %v3097_v16 }
  0x6e   : > { %383 = vst [vmem:[%s3245_s24 + $0xe8] sm:$0xff] %v3097_v16 }
  0x6f   : > { %384 = vst [vmem:[%s3245_s24 + $0xf0] sm:$0xff] %v3097_v16 }
  0x70   : > { %385 = vst [vmem:[%s3245_s24 + $0xf8] sm:$0xff] %v3097_v16 }
  0x71 PF: > { %s386_s20 = sld [smem:[#allocation3 + %s3250_s0]] }
  0x77   : > { %p2445_p13 = scmp.le.s32.totalorder %s386_s20, 0 }
  0x79   : > { %390 = sbr.rel (%p2445_p13) target bundleno = 575 (0x23f), region = 67 }
  0x7e   : > { %v409_v17 = vld [vmem:[%s3240_s22 + $0x90] sm:$0xff]  ;;  %v407_v18 = vld [vmem:[%s3240_s22 + $0x80] sm:$0xff]  ;;  %v3098_v20 = vmov 0   ;;  %v410_v21 = vld [vmem:[%s3240_s22 + $0x98] sm:$0xff]  ;;  %s2446_s21 = sshll.u32 %s3076_s1, 8 }
  0x7f   : > { %v391_v19 = vld [vmem:[%s3240_s22] sm:$0xff]  ;;  %2740 = vset.pattern.permute.xlu2 %v3098_v20  ;;  %2739 = vset.pattern.permute.xlu1 %v3098_v20  ;;  %v408_v22 = vld [vmem:[%s3240_s22 + $0x88] sm:$0xff]  ;;  %v393_v25 = vld [vmem:[%s3240_s22 + $0x10] sm:$0xff]  ;;  %s1438_s29 = sshra.s32 %s2446_s21, 3 }
  0x80   : > { %2738 = vset.pattern.permute.xlu0 %v3098_v20  ;;  %516 = vperm.xlu2 %2740, %v409_v17   ;;  %v392_v23 = vld [vmem:[%s3240_s22 + $0x8] sm:$0xff]  ;;  %v411_v24 = vld [vmem:[%s3240_s22 + $0xa0] sm:$0xff]  ;;  %v394_v26 = vld [vmem:[%s3240_s22 + $0x18] sm:$0xff]  ;;  %s2447_s30 = sshll.u32 %s1438_s29, 2 }
  0x81   : > { %506 = vperm.xlu0 %2738, %v407_v18   ;;  %426 = vperm.xlu1 %2739, %v391_v19   ;;  %v396_v27 = vld [vmem:[%s3240_s22 + $0x28] sm:$0xff]  ;;  %v395_v29 = vld [vmem:[%s3240_s22 + $0x20] sm:$0xff]  ;;  %v397_v30 = vld [vmem:[%s3240_s22 + $0x30] sm:$0xff]  ;;  %s3329_s12 = scalar_lea.vmem %s4413_s5, %s2447_s30 }
  0x82   : > { %v412_v28 = vld [vmem:[%s3240_s22 + $0xa8] sm:$0xff]  ;;  %v413_v31 = vld [vmem:[%s3240_s22 + $0xb0] sm:$0xff]  ;;  %v414_v32 = vld [vmem:[%s3240_s22 + $0xb8] sm:$0xff] }
  0x83   : > { %v416_v33 = vld [vmem:[%s3240_s22 + $0xc8] sm:$0xff]  ;;  %v398_v34 = vld [vmem:[%s3240_s22 + $0x38] sm:$0xff]  ;;  %v415_v35 = vld [vmem:[%s3240_s22 + $0xc0] sm:$0xff] }
  0x84   : > { %v417_v36 = vld [vmem:[%s3240_s22 + $0xd0] sm:$0xff]  ;;  %v399_v37 = vld [vmem:[%s3240_s22 + $0x40] sm:$0xff]  ;;  %v400_v38 = vld [vmem:[%s3240_s22 + $0x48] sm:$0xff] }
  0x85   : > { %v402_v39 = vld [vmem:[%s3240_s22 + $0x58] sm:$0xff]  ;;  %v401_v41 = vld [vmem:[%s3240_s22 + $0x50] sm:$0xff]  ;;  %v403_v42 = vld [vmem:[%s3240_s22 + $0x60] sm:$0xff] }
  0x86   : > { %v418_v40 = vld [vmem:[%s3240_s22 + $0xd8] sm:$0xff]  ;;  %v419_v43 = vld [vmem:[%s3240_s22 + $0xe0] sm:$0xff]  ;;  %v420_v44 = vld [vmem:[%s3240_s22 + $0xe8] sm:$0xff] }
  0x87   : > { %v422_v45 = vld [vmem:[%s3240_s22 + $0xf8] sm:$0xff]  ;;  %v404_v46 = vld [vmem:[%s3240_s22 + $0x68] sm:$0xff]  ;;  %v421_v47 = vld [vmem:[%s3240_s22 + $0xf0] sm:$0xff] }
  0x88   : > { %521 = vperm.xlu2 %2740, %v410_v21   ;;  %v2650_v48 = vld [vmem:[%s3329_s12 + $0x38] sm:$0xff]  ;;  %v405_v50 = vld [vmem:[%s3240_s22 + $0x70] sm:$0xff]  ;;  %v2648_v54 = vld [vmem:[%s3329_s12 + $0x28] sm:$0xff] }
  0x89   : > { %511 = vperm.xlu0 %2738, %v408_v22   ;;  %431 = vperm.xlu1 %2739, %v392_v23   ;;  %v2658_v49 = vld [vmem:[%s3329_s12 + $0x78] sm:$0xff]  ;;  %v2649_v52 = vld [vmem:[%s3329_s12 + $0x30] sm:$0xff]  ;;  %v2656_v55 = vld [vmem:[%s3329_s12 + $0x68] sm:$0xff] }
  0x8a   : > { %v406_v51 = vld [vmem:[%s3240_s22 + $0x78] sm:$0xff]  ;;  %1602 = vmatpush.bf16.msra.mxu0 %v2650_v48  ;;  %2659 = vmatpush.bf16.msra.mxu2 %v2650_v48  ;;  %v2657_v53 = vld [vmem:[%s3329_s12 + $0x70] sm:$0xff]  ;;  %v423_v56 = vld [vmem:[%s332_s14] sm:$0x3] }
  0x8b   : > { %1691 = vmatpush.bf16.msra.mxu1 %v2658_v49  ;;  %2667 = vmatpush.bf16.msra.mxu3 %v2658_v49  ;;  %v3344_v57 = vperm.slane %v423_v56, 0  ;;  %v2647_v58 = vld [vmem:[%s3329_s12 + $0x20] sm:$0xff]  ;;  %v3348_v60 = vperm.slane %v423_v56, 1  ;;  %v2646_v6 = vld [vmem:[%s3329_s12 + $0x18] sm:$0xff]  ;;  %v2645_v16 = vld [vmem:[%s3329_s12 + $0x10] sm:$0xff] }
  0x8c   : > { %v2655_v59 = vld [vmem:[%s3329_s12 + $0x60] sm:$0xff]  ;;  %v2654_v7 = vld [vmem:[%s3329_s12 + $0x58] sm:$0xff]  ;;  %v2653_v17 = vld [vmem:[%s3329_s12 + $0x50] sm:$0xff] }
  0x8d   : > { %v973_v18 = vld [vmem:[%s3256_s28] sm:$0xff]  ;;  %v974_v21 = vld [vmem:[%s3256_s28 + $0x8] sm:$0xff] }
  0x8e   : > { %1603 = vmatpush.bf16.msra.mxu0 %v2649_v52  ;;  %2660 = vmatpush.bf16.msra.mxu2 %v2649_v52  ;;  %vm989_vm0 = vnez %v973_v18  ;;  %vm990_vm1 = vnez %v974_v21  ;;  %v2651_v52 = vld [vmem:[%s3329_s12 + $0x40] sm:$0xff] }
  0x8f   : > { %1692 = vmatpush.bf16.msra.mxu1 %v2657_v53  ;;  %2668 = vmatpush.bf16.msra.mxu3 %v2657_v53  ;;  %v3361_v23 = vsel %vm989_vm0, 16843009, %v3098_v20 }
  0x90   : > { %526 = vperm.xlu2 %2740, %v411_v24  }
  0x91   : > { %436 = vperm.xlu0 %2738, %v393_v25   ;;  %441 = vperm.xlu1 %2739, %v394_v26   ;;  %v3364_v25 = vsel %vm990_vm1, 16843009, %v3098_v20  ;;  %v1021_v26 = vunpack.c.0.s8 %v3361_v23 }
  0x92   : > { %1604 = vmatpush.bf16.msra.mxu0 %v2648_v54  ;;  %2661 = vmatpush.bf16.msra.mxu2 %v2648_v54 }
  0x93   : > { %1693 = vmatpush.bf16.msra.mxu1 %v2656_v55  ;;  %2669 = vmatpush.bf16.msra.mxu3 %v2656_v55 }
  0x96   : > { %1605 = vmatpush.bf16.msra.mxu0 %v2647_v58  ;;  %2662 = vmatpush.bf16.msra.mxu2 %v2647_v58 }
  0x97   : > { %1694 = vmatpush.bf16.msra.mxu1 %v2655_v59  ;;  %2670 = vmatpush.bf16.msra.mxu3 %v2655_v59 }
  0x98   : > { %451 = vperm.xlu2 %2740, %v396_v27  }
  0x99   : > { %531 = vperm.xlu0 %2738, %v412_v28   ;;  %446 = vperm.xlu1 %2739, %v395_v29   ;;  %v1022_v28 = vunpack.c.0.s8 %v3364_v25  ;;  %v1023_v29 = vunpack.c.1.s8 %v3361_v23 }
  0x9a   : > { %1606 = vmatpush.bf16.msra.mxu0 %v2646_v6  ;;  %2663 = vmatpush.bf16.msra.mxu2 %v2646_v6 }
  0x9b   : > { %1695 = vmatpush.bf16.msra.mxu1 %v2654_v7  ;;  %2671 = vmatpush.bf16.msra.mxu3 %v2654_v7 }
  0x9e   : > { %1607 = vmatpush.bf16.msra.mxu0 %v2645_v16  ;;  %2664 = vmatpush.bf16.msra.mxu2 %v2645_v16 }
  0x9f   : > { %1696 = vmatpush.bf16.msra.mxu1 %v2653_v17  ;;  %2672 = vmatpush.bf16.msra.mxu3 %v2653_v17 }
  0xa0   : > { %456 = vperm.xlu2 %2740, %v397_v30   ;;  %v1024_v30 = vunpack.c.1.s8 %v3364_v25 }
  0xa1   : > { %536 = vperm.xlu0 %2738, %v413_v31   ;;  %541 = vperm.xlu1 %2739, %v414_v32   ;;  %v981_v31 = vld [vmem:[%s3256_s28 + $0x40] sm:$0xff]  ;;  %v982_v32 = vld [vmem:[%s3256_s28 + $0x48] sm:$0xff] }
  0xa2   : > { %vm997_vm2 = vnez %v981_v31  ;;  %vm998_vm3 = vnez %v982_v32 }
  0xa3   : > { %v3380_v48 = vsel %vm998_vm3, 16843009, %v3098_v20 }
  0xa4   : > { %v1054_v56 = vunpack.c.0.s8 %v3380_v48 }
  0xa8   : > { %551 = vperm.xlu2 %2740, %v416_v33  }
  0xa9   : > { %461 = vperm.xlu0 %2738, %v398_v34   ;;  %546 = vperm.xlu1 %2739, %v415_v35  }
  0xb0   : > { %556 = vperm.xlu2 %2740, %v417_v36   ;;  %v2644_v36 = vld [vmem:[%s3329_s12 + $0x8] sm:$0xff] }
  0xb1   : > { %466 = vperm.xlu0 %2738, %v399_v37   ;;  %471 = vperm.xlu1 %2739, %v400_v38   ;;  %v2652_v37 = vld [vmem:[%s3329_s12 + $0x48] sm:$0xff] }
  0xb2   : > { %1608 = vmatpush.bf16.msra.mxu0 %v2644_v36  ;;  %2665 = vmatpush.bf16.msra.mxu2 %v2644_v36 }
  0xb3   : > { %1697 = vmatpush.bf16.msra.mxu1 %v2652_v37  ;;  %2673 = vmatpush.bf16.msra.mxu3 %v2652_v37 }
  0xb7   : > { %1698 = vmatpush.bf16.msra.mxu1 %v2651_v52  ;;  %2674 = vmatpush.bf16.msra.mxu3 %v2651_v52 }
  0xb8   : > { %481 = vperm.xlu2 %2740, %v402_v39   ;;  %v1085_v39 = vpack.c.b16 %v1022_v28, %v1021_v26 }
  0xb9   : > { %561 = vperm.xlu0 %2738, %v418_v40   ;;  %476 = vperm.xlu1 %2739, %v401_v41   ;;  %v1087_v40 = vpack.c.b16 %v1024_v30, %v1023_v29 }
  0xc0   : > { %486 = vperm.xlu2 %2740, %v403_v42  }
  0xc1   : > { %566 = vperm.xlu0 %2738, %v419_v43   ;;  %571 = vperm.xlu1 %2739, %v420_v44  }
  0xc8   : > { %581 = vperm.xlu2 %2740, %v422_v45   ;;  %v1086_v45 = vpack.c.b8 %v1085_v39, %v1085_v39 }
  0xc9   : > { %491 = vperm.xlu0 %2738, %v404_v46   ;;  %576 = vperm.xlu1 %2739, %v421_v47   ;;  %v1088_v46 = vpack.c.b8 %v1087_v40, %v1087_v40  ;;  %v3377_v47 = vsel %vm997_vm2, 16843009, %v3098_v20 }
  0xca   : > { %vm3386_vm4 = vnez %v1086_v45  ;;  %v1053_v55 = vunpack.c.0.s8 %v3377_v47 }
  0xcb   : > { %vm3392_vm5 = vnez %v1088_v46 }
  0xcc   : > { %v3420_v31 = vsel %vm3392_vm5, 16843009, %v3098_v20 }
  0xd1   : > { %496 = vperm.xlu0 %2738, %v405_v50   ;;  %501 = vperm.xlu1 %2739, %v406_v51   ;;  %v2643_v51 = vld [vmem:[%s3329_s12] sm:$0xff] }
  0xd2   : > { %1609 = vmatpush.bf16.msra.mxu0 %v2643_v51  ;;  %2666 = vmatpush.bf16.msra.mxu2 %v2643_v51 }
  0xda   : > { %v517_v61 = vpop.permute.xlu2 %516 }
  0xdb   : > { %v625_v62 = vadd.f32 %v3344_v57, %v517_v61  ;;  %v626_v63 = vadd.f32 %v3348_v60, %v517_v61 }
  0xdd   : > { %v689_v0 = vsub.f32 0.0, %v625_v62  ;;  %v753_v1 = vmul.f32 -0.2, %v625_v62  ;;  %v690_v2 = vsub.f32 0.0, %v626_v63  ;;  %v754_v3 = vmul.f32 -0.2, %v626_v63 }
  0xde   : > { %v1055_v62 = vunpack.c.1.s8 %v3377_v47  ;;  %v1056_v63 = vunpack.c.1.s8 %v3380_v48 }
  0xdf   : > { %v817_v4 = vmin.f32 %v689_v0, %v753_v1  ;;  %v818_v10 = vmin.f32 %v690_v2, %v754_v3 }
  0xe1   : > { %v917_v15 = vmul.f32 1.442695, %v817_v4  ;;  %v919_v24 = vmul.f32 1.442695, %v818_v10 }
  0xe2   : > { %v522_v5 = vpop.permute.xlu2 %521 }
  0xe3   : > { %v627_v8 = vadd.f32 %v3344_v57, %v522_v5  ;;  %v628_v9 = vadd.f32 %v3348_v60, %v522_v5  ;;  %2741 = vpow2.f32 %v917_v15  ;;  %v3403_v5 = vsel %vm3386_vm4, 16843009, %v3098_v20 }
  0xe4   : > { %2743 = vpow2.f32 %v919_v24 }
  0xe5   : > { %v691_v11 = vsub.f32 0.0, %v627_v8  ;;  %v692_v12 = vsub.f32 0.0, %v628_v9  ;;  %v755_v13 = vmul.f32 -0.2, %v627_v8  ;;  %v756_v14 = vmul.f32 -0.2, %v628_v9 }
  0xe6   : > { %v3408_v9 = vpack.c.b16 %v1054_v56, %v1053_v55 }
  0xe7   : > { %v819_v19 = vmin.f32 %v691_v11, %v755_v13  ;;  %v820_v22 = vmin.f32 %v692_v12, %v756_v14 }
  0xe9   : > { %v921_v33 = vmul.f32 1.442695, %v819_v19  ;;  %v923_v38 = vmul.f32 1.442695, %v820_v22  ;;  %v3384_v53 = vpop.eup %2741 }
  0xea   : > { %v527_v27 = vpop.permute.xlu2 %526  ;;  %v3410_v10 = vpop.eup %2743 }
  0xeb   : > { %v629_v34 = vadd.f32 %v3344_v57, %v527_v27  ;;  %v630_v35 = vadd.f32 %v3348_v60, %v527_v27  ;;  %2745 = vpow2.f32 %v921_v33 }
  0xec   : > { %2747 = vpow2.f32 %v923_v38 }
  0xed   : > { %v693_v41 = vsub.f32 0.0, %v629_v34  ;;  %v694_v42 = vsub.f32 0.0, %v630_v35  ;;  %v757_v43 = vmul.f32 -0.2, %v629_v34  ;;  %v758_v44 = vmul.f32 -0.2, %v630_v35 }
  0xee   : > { %v1213_v34 = vunpack.c.0.s8 %v3403_v5 }
  0xef   : > { %v821_v49 = vmin.f32 %v693_v41, %v757_v43  ;;  %v822_v50 = vmin.f32 %v694_v42, %v758_v44 }
  0xf0   : > { %vm3460_vm6 = vcmp.ne.s32.totalorder %v1213_v34, 0 }
  0xf1   : > { %v925_v58 = vmul.f32 1.442695, %v821_v49  ;;  %v927_v0 = vmul.f32 1.442695, %v822_v50  ;;  %v3412_v15 = vpop.eup %2745  ;;  %v1215_v49 = vunpack.c.0.s8 %v3420_v31 }
  0xf2   : > { %v452_v59 = vpop.permute.xlu2 %451  ;;  %v3414_v21 = vpop.eup %2747 }
  0xf3   : > { %v507_v1 = vpop.permute.xlu0 %506  ;;  %v599_v2 = vadd.f32 %v3344_v57, %v452_v59  ;;  %v600_v3 = vadd.f32 %v3348_v60, %v452_v59  ;;  %v427_v4 = vpop.permute.xlu1 %426  ;;  %2749 = vpow2.f32 %v925_v58  ;;  %vm3466_vm7 = vcmp.ne.s32.totalorder %v1215_v49, 0 }
  0xf4   : > { %v621_v6 = vadd.f32 %v3344_v57, %v507_v1  ;;  %v622_v7 = vadd.f32 %v3348_v60, %v507_v1  ;;  %v589_v8 = vadd.f32 %v3344_v57, %v427_v4  ;;  %v590_v26 = vadd.f32 %v3348_v60, %v427_v4  ;;  %vm2512_vm8 = vmpackc.low %vm3466_vm7, %vm3460_vm6 }
  0xf5   : > { %v663_v11 = vsub.f32 0.0, %v599_v2  ;;  %v664_v12 = vsub.f32 0.0, %v600_v3  ;;  %v727_v13 = vmul.f32 -0.2, %v599_v2  ;;  %v728_v14 = vmul.f32 -0.2, %v600_v3 }
  0xf6   : > { %v685_v16 = vsub.f32 0.0, %v621_v6  ;;  %v686_v17 = vsub.f32 0.0, %v622_v7  ;;  %v749_v18 = vmul.f32 -0.2, %v621_v6  ;;  %v750_v19 = vmul.f32 -0.2, %v622_v7 }
  0xf7   : > { %v791_v22 = vmin.f32 %v663_v11, %v727_v13  ;;  %v792_v24 = vmin.f32 %v664_v12, %v728_v14  ;;  %v653_v27 = vsub.f32 0.0, %v589_v8  ;;  %v717_v30 = vmul.f32 -0.2, %v589_v8 }
  0xf8   : > { %v813_v28 = vmin.f32 %v685_v16, %v749_v18  ;;  %v814_v29 = vmin.f32 %v686_v17, %v750_v19  ;;  %v654_v33 = vsub.f32 0.0, %v590_v26  ;;  %v718_v37 = vmul.f32 -0.2, %v590_v26 }
  0xf9   : > { %v865_v32 = vmul.f32 1.442695, %v791_v22  ;;  %v781_v38 = vmin.f32 %v653_v27, %v717_v30  ;;  %2751 = vpow2.f32 %v927_v0  ;;  %v867_v40 = vmul.f32 1.442695, %v792_v24  ;;  %v3428_v58 = vpop.eup %2749 }
  0xfa   : > { %v909_v35 = vmul.f32 1.442695, %v813_v28  ;;  %v911_v36 = vmul.f32 1.442695, %v814_v29  ;;  %v457_v39 = vpop.permute.xlu2 %456  ;;  %v782_v44 = vmin.f32 %v654_v33, %v718_v37 }
  0xfb   : > { %v512_v41 = vpop.permute.xlu0 %511  ;;  %v601_v42 = vadd.f32 %v3344_v57, %v457_v39  ;;  %v602_v43 = vadd.f32 %v3348_v60, %v457_v39  ;;  %2753 = vpow2.f32 %v865_v32  ;;  %v432_v46 = vpop.permute.xlu1 %431  ;;  %v845_v50 = vmul.f32 1.442695, %v781_v38 }
  0xfc   : > { %v623_v45 = vadd.f32 %v3344_v57, %v512_v41  ;;  %2755 = vpow2.f32 %v909_v35  ;;  %v624_v51 = vadd.f32 %v3348_v60, %v512_v41  ;;  %v847_v1 = vmul.f32 1.442695, %v782_v44 }
  0xfd   : > { %v665_v52 = vsub.f32 0.0, %v601_v42  ;;  %2757 = vpow2.f32 %v911_v36  ;;  %v666_v56 = vsub.f32 0.0, %v602_v43  ;;  %v729_v0 = vmul.f32 -0.2, %v601_v42 }
  0xfe   : > { %v687_v54 = vsub.f32 0.0, %v623_v45  ;;  %v751_v55 = vmul.f32 -0.2, %v623_v45  ;;  %2759 = vpow2.f32 %v867_v40  ;;  %v688_v59 = vsub.f32 0.0, %v624_v51 }
  0xff   : > { %v752_v61 = vmul.f32 -0.2, %v624_v51  ;;  %v730_v3 = vmul.f32 -0.2, %v602_v43  ;;  %v591_v4 = vadd.f32 %v3344_v57, %v432_v46  ;;  %v3431_v6 = vpop.eup %2751  ;;  %2761 = vpow2.f32 %v845_v50 }
 0x100   : > { %v815_v2 = vmin.f32 %v687_v54, %v751_v55  ;;  %v793_v8 = vmin.f32 %v665_v52, %v729_v0  ;;  %v592_v11 = vadd.f32 %v3348_v60, %v432_v46  ;;  %2763 = vpow2.f32 %v847_v1 }
 0x101   : > { %v816_v7 = vmin.f32 %v688_v59, %v752_v61  ;;  %v3434_v12 = vpop.eup %2753  ;;  %v794_v14 = vmin.f32 %v666_v56, %v730_v3  ;;  %v655_v16 = vsub.f32 0.0, %v591_v4  ;;  %v719_v17 = vmul.f32 -0.2, %v591_v4 }
 0x102   : > { %v913_v13 = vmul.f32 1.442695, %v815_v2  ;;  %v552_v18 = vpop.permute.xlu2 %551  ;;  %v3436_v19 = vpop.eup %2755  ;;  %v869_v24 = vmul.f32 1.442695, %v793_v8  ;;  %v656_v26 = vsub.f32 0.0, %v592_v11  ;;  %v3452_v52 = vpack.c.b16 %v1056_v63, %v1055_v62 }
 0x103   : > { %v915_v22 = vmul.f32 1.442695, %v816_v7  ;;  %v639_v27 = vadd.f32 %v3344_v57, %v552_v18  ;;  %v437_v28 = vpop.permute.xlu0 %436  ;;  %v3439_v29 = vpop.eup %2757  ;;  %v871_v30 = vmul.f32 1.442695, %v794_v14  ;;  %v720_v32 = vmul.f32 -0.2, %v592_v11 }
 0x104   : > { %v783_v33 = vmin.f32 %v655_v16, %v719_v17  ;;  %v3441_v35 = vpop.eup %2759  ;;  %2765 = vpow2.f32 %v913_v13  ;;  %v640_v36 = vadd.f32 %v3348_v60, %v552_v18  ;;  %v593_v41 = vadd.f32 %v3344_v57, %v437_v28  ;;  %v442_v42 = vpop.permute.xlu1 %441 }
 0x105   : > { %v703_v37 = vsub.f32 0.0, %v639_v27  ;;  %v767_v38 = vmul.f32 -0.2, %v639_v27  ;;  %2767 = vpow2.f32 %v915_v22  ;;  %v784_v39 = vmin.f32 %v656_v26, %v720_v32  ;;  %v3445_v43 = vpop.eup %2761 }
 0x106   : > { %v849_v40 = vmul.f32 1.442695, %v783_v33  ;;  %2769 = vpow2.f32 %v869_v24  ;;  %v704_v44 = vsub.f32 0.0, %v640_v36  ;;  %v768_v45 = vmul.f32 -0.2, %v640_v36  ;;  %v3455_v61 = vpop.eup %2763 }
 0x107   : > { %v831_v46 = vmin.f32 %v703_v37, %v767_v38  ;;  %2771 = vpow2.f32 %v871_v30  ;;  %v594_v50 = vadd.f32 %v3348_v60, %v437_v28  ;;  %v657_v51 = vsub.f32 0.0, %v593_v41 }
 0x108   : > { %v851_v54 = vmul.f32 1.442695, %v784_v39  ;;  %v832_v55 = vmin.f32 %v704_v44, %v768_v45  ;;  %v721_v56 = vmul.f32 -0.2, %v593_v41  ;;  %v595_v59 = vadd.f32 %v3344_v57, %v442_v42 }
 0x109   : > { %2773 = vpow2.f32 %v849_v40  ;;  %v658_v0 = vsub.f32 0.0, %v594_v50  ;;  %v722_v1 = vmul.f32 -0.2, %v594_v50  ;;  %v596_v2 = vadd.f32 %v3348_v60, %v442_v42 }
 0x10a   : > { %v557_v3 = vpop.permute.xlu2 %556  ;;  %v3470_v63 = vpop.eup %2765  ;;  %v945_v7 = vmul.f32 1.442695, %v831_v46  ;;  %v947_v8 = vmul.f32 1.442695, %v832_v55  ;;  %v785_v11 = vmin.f32 %v657_v51, %v721_v56  ;;  %v659_v13 = vsub.f32 0.0, %v595_v59 }
 0x10b   : > { %v532_v14 = vpop.permute.xlu0 %531  ;;  %v3472_v16 = vpop.eup %2767  ;;  %v786_v17 = vmin.f32 %v658_v0, %v722_v1  ;;  %v660_v34 = vsub.f32 0.0, %v596_v2  ;;  %v723_v18 = vmul.f32 -0.2, %v595_v59  ;;  %v724_v22 = vmul.f32 -0.2, %v596_v2 }
 0x10c   : > { %v3474_v24 = vpop.eup %2769  ;;  %2775 = vpow2.f32 %v851_v54  ;;  %v641_v49 = vadd.f32 %v3344_v57, %v557_v3  ;;  %v642_v26 = vadd.f32 %v3348_v60, %v557_v3  ;;  %v1118_v27 = vpack.c.b8 %v3408_v9, %v3408_v9  ;;  %v447_v45 = vpop.permute.xlu1 %446 }
 0x10d   : > { %v3480_v28 = vpop.eup %2771  ;;  %v853_v30 = vmul.f32 1.442695, %v785_v11  ;;  %v787_v32 = vmin.f32 %v659_v13, %v723_v18  ;;  %v788_v33 = vmin.f32 %v660_v34, %v724_v22  ;;  %v631_v36 = vadd.f32 %v3344_v57, %v532_v14 }
 0x10e   : > { %2777 = vpow2.f32 %v945_v7  ;;  %v705_v37 = vsub.f32 0.0, %v641_v49  ;;  %v706_v38 = vsub.f32 0.0, %v642_v26  ;;  %v769_v39 = vmul.f32 -0.2, %v641_v49 }
 0x10f   : > { %v2774_v40 = vpop.eup %2773  ;;  %2779 = vpow2.f32 %v947_v8  ;;  %v855_v41 = vmul.f32 1.442695, %v786_v17  ;;  %v857_v42 = vmul.f32 1.442695, %v787_v32  ;;  %v770_v44 = vmul.f32 -0.2, %v642_v26 }
 0x110   : > { %v833_v46 = vmin.f32 %v705_v37, %v769_v39  ;;  %v632_v9 = vadd.f32 %v3348_v60, %v532_v14  ;;  %v695_v50 = vsub.f32 0.0, %v631_v36  ;;  %v759_v51 = vmul.f32 -0.2, %v631_v36 }
 0x111   : > { %2781 = vpow2.f32 %v853_v30  ;;  %v859_v54 = vmul.f32 1.442695, %v788_v33  ;;  %v834_v55 = vmin.f32 %v706_v38, %v770_v44  ;;  %v1120_v56 = vpack.c.b8 %v3452_v52, %v3452_v52 }
 0x112   : > { %v2776_v59 = vpop.eup %2775  ;;  %v696_v0 = vsub.f32 0.0, %v632_v9  ;;  %v760_v1 = vmul.f32 -0.2, %v632_v9  ;;  %v597_v2 = vadd.f32 %v3344_v57, %v447_v45  ;;  %v598_v3 = vadd.f32 %v3348_v60, %v447_v45  ;;  %v482_v22 = vpop.permute.xlu2 %481 }
 0x113   : > { %2783 = vpow2.f32 %v855_v41  ;;  %v949_v7 = vmul.f32 1.442695, %v833_v46  ;;  %v823_v11 = vmin.f32 %v695_v50, %v759_v51  ;;  %v2513_v14 = vpack.c.bf16 %v2774_v40, %v3445_v43  ;;  %v537_v46 = vpop.permute.xlu0 %536 }
 0x114   : > { %v3488_v8 = vpop.eup %2777  ;;  %2785 = vpow2.f32 %v857_v42  ;;  %v824_v13 = vmin.f32 %v696_v0, %v760_v1  ;;  %vm1165_vm9 = vnez %v1118_v27  ;;  %v951_v17 = vmul.f32 1.442695, %v834_v55  ;;  %v542_v9 = vpop.permute.xlu1 %541 }
 0x115   : > { %v3494_v52 = vpop.eup %2779  ;;  %2787 = vpow2.f32 %v859_v54  ;;  %v661_v34 = vsub.f32 0.0, %v597_v2  ;;  %v662_v18 = vsub.f32 0.0, %v598_v3  ;;  %vm1166_vm10 = vnez %v1120_v56  ;;  %2514 = vmatmul.msk.bf16.vlgmr.msra.gmra.mxu0 %vm2512_vm8, %v2513_v14 }
 0x116   : > { %2789 = vpow2.f32 %v949_v7  ;;  %v725_v26 = vmul.f32 -0.2, %v597_v2  ;;  %v1197_v4 = vsel %vm1165_vm9, 16843009, %v3098_v20  ;;  %v1198_v62 = vsel %vm1166_vm10, 16843009, %v3098_v20 }
 0x117   : > { %v3497_v49 = vpop.eup %2781  ;;  %v929_v30 = vmul.f32 1.442695, %v823_v11  ;;  %v931_v32 = vmul.f32 1.442695, %v824_v13  ;;  %v726_v33 = vmul.f32 -0.2, %v598_v3  ;;  %v1245_v36 = vunpack.c.0.s8 %v1197_v4 }
 0x118   : > { %v1247_v27 = vunpack.c.0.s8 %v1198_v62  ;;  %v2537_v37 = vpack.c.bf16 %v3470_v63, %v3436_v19  ;;  %v1214_v38 = vunpack.c.1.s8 %v3403_v5  ;;  %v1216_v39 = vunpack.c.1.s8 %v3420_v31 }
 0x119   : > { %v3501_v43 = vpop.eup %2783  ;;  %vm3509_vm11 = vcmp.ne.s32.totalorder %v1245_v36, 0  ;;  %v2561_v42 = vpack.c.bf16 %v2776_v59, %v3455_v61  ;;  %v1246_v44 = vunpack.c.1.s8 %v1197_v4  ;;  %v1248_v45 = vunpack.c.1.s8 %v1198_v62 }
 0x11a   : > { %v3507_v40 = vpop.eup %2785  ;;  %v789_v51 = vmin.f32 %v661_v34, %v725_v26  ;;  %vm1311_vm12 = vcmp.ne.s32.totalorder %v1247_v27, 0  ;;  %vm3516_vm13 = vcmp.ne.s32.totalorder %v1214_v38, 0  ;;  %vm1280_vm14 = vcmp.ne.s32.totalorder %v1216_v39, 0 }
 0x11b   : > { %v3514_v50 = vpop.eup %2787  ;;  %vm2536_vm15 = vmpackc.low %vm1311_vm12, %vm3509_vm11  ;;  %vm3522_vm0 = vcmp.ne.s32.totalorder %v1246_v44, 0  ;;  %vm3526_vm1 = vcmp.ne.s32.totalorder %v1248_v45, 0  ;;  %v2585_v61 = vpack.c.bf16 %v3472_v16, %v3439_v29  ;;  %v611_v63 = vadd.f32 %v3344_v57, %v482_v22 }
 0x11c   : > { %v3533_v54 = vpop.eup %2789  ;;  %2538 = vmatmul.msk.bf16.vlgmr.msra.gmra.mxu2 %vm2536_vm15, %v2537_v37  ;;  %vm2560_vm2 = vmpackc.low %vm1280_vm14, %vm3516_vm13  ;;  %v612_v55 = vadd.f32 %v3348_v60, %v482_v22  ;;  %v633_v56 = vadd.f32 %v3344_v57, %v537_v46  ;;  %v634_v59 = vadd.f32 %v3348_v60, %v537_v46  ;;  %v635_v0 = vadd.f32 %v3344_v57, %v542_v9 }
 0x11d   : > { %v790_v1 = vmin.f32 %v662_v18, %v726_v33  ;;  %2562 = vmatmul.msk.bf16.vlgmr.msra.gmra.mxu1 %vm2560_vm2, %v2561_v42  ;;  %vm2584_vm3 = vmpackc.low %vm3526_vm1, %vm3522_vm0  ;;  %v675_v29 = vsub.f32 0.0, %v611_v63  ;;  %v739_v16 = vmul.f32 -0.2, %v611_v63  ;;  %v636_v2 = vadd.f32 %v3348_v60, %v542_v9  ;;  %v487_v18 = vpop.permute.xlu2 %486  ;;  %v462_v9 = vpop.permute.xlu0 %461 }
 0x11e   : > { %2586 = vmatmul.msk.bf16.vlgmr.msra.gmra.mxu3 %vm2584_vm3, %v2585_v61  ;;  %v676_v3 = vsub.f32 0.0, %v612_v55  ;;  %v740_v7 = vmul.f32 -0.2, %v612_v55  ;;  %v697_v11 = vsub.f32 0.0, %v633_v56  ;;  %v698_v13 = vsub.f32 0.0, %v634_v59  ;;  %v547_v55 = vpop.permute.xlu1 %546 }
 0x11f   : > { %v803_v14 = vmin.f32 %v675_v29, %v739_v16  ;;  %v761_v34 = vmul.f32 -0.2, %v633_v56  ;;  %v762_v22 = vmul.f32 -0.2, %v634_v59  ;;  %v699_v26 = vsub.f32 0.0, %v635_v0 }
 0x120   : > { %2791 = vpow2.f32 %v951_v17  ;;  %v861_v4 = vmul.f32 1.442695, %v789_v51  ;;  %v804_v62 = vmin.f32 %v676_v3, %v740_v7  ;;  %v763_v33 = vmul.f32 -0.2, %v635_v0 }
 0x121   : > { %2793 = vpow2.f32 %v929_v30  ;;  %v863_v36 = vmul.f32 1.442695, %v790_v1  ;;  %v825_v27 = vmin.f32 %v697_v11, %v761_v34  ;;  %v826_v37 = vmin.f32 %v698_v13, %v762_v22 }
 0x122   : > { %v700_v38 = vsub.f32 0.0, %v636_v2  ;;  %v764_v39 = vmul.f32 -0.2, %v636_v2  ;;  %v613_v41 = vadd.f32 %v3344_v57, %v487_v18  ;;  %2795 = vpow2.f32 %v931_v32 }
 0x123   : > { %v889_v42 = vmul.f32 1.442695, %v803_v14  ;;  %v827_v44 = vmin.f32 %v699_v26, %v763_v33  ;;  %v614_v45 = vadd.f32 %v3348_v60, %v487_v18  ;;  %2797 = vpow2.f32 %v861_v4 }
 0x124   : > { %v891_v46 = vmul.f32 1.442695, %v804_v62  ;;  %2799 = vpow2.f32 %v863_v36  ;;  %v933_v17 = vmul.f32 1.442695, %v825_v27  ;;  %v935_v30 = vmul.f32 1.442695, %v826_v37 }
 0x125   : > { %v828_v5 = vmin.f32 %v700_v38, %v764_v39  ;;  %v677_v31 = vsub.f32 0.0, %v613_v41  ;;  %v741_v19 = vmul.f32 -0.2, %v613_v41  ;;  %2801 = vpow2.f32 %v889_v42 }
 0x126   : > { %v3548_v51 = vpop.eup %2791  ;;  %v937_v63 = vmul.f32 1.442695, %v827_v44  ;;  %v678_v32 = vsub.f32 0.0, %v614_v45  ;;  %2803 = vpow2.f32 %v891_v46  ;;  %v742_v56 = vmul.f32 -0.2, %v614_v45 }
 0x127   : > { %v3550_v61 = vpop.eup %2793  ;;  %v603_v59 = vadd.f32 %v3344_v57, %v462_v9  ;;  %v604_v0 = vadd.f32 %v3348_v60, %v462_v9  ;;  %2805 = vpow2.f32 %v933_v17  ;;  %v3558_v16 = vmul.f32 1.442695, %v828_v5 }
 0x128   : > { %v3554_v1 = vpop.eup %2795  ;;  %2807 = vpow2.f32 %v935_v30  ;;  %v805_v2 = vmin.f32 %v677_v31, %v741_v19  ;;  %v637_v3 = vadd.f32 %v3344_v57, %v547_v55  ;;  %v3564_v11 = vadd.f32 %v3348_v60, %v547_v55 }
 0x129   : > { %v3556_v29 = vpop.eup %2797  ;;  %2809 = vpow2.f32 %v937_v63  ;;  %v1025_v13 = vunpack.c.2.s8 %v3361_v23  ;;  %v1026_v14 = vunpack.c.2.s8 %v3364_v25  ;;  %v806_v34 = vmin.f32 %v678_v32, %v742_v56  ;;  %v3589_v56 = vpop.permute.xlu2 %581 }
 0x12a   : > { %v3561_v7 = vpop.eup %2799  ;;  %v667_v22 = vsub.f32 0.0, %v603_v59  ;;  %v668_v26 = vsub.f32 0.0, %v604_v0  ;;  %v1027_v18 = vunpack.c.3.s8 %v3361_v23  ;;  %v731_v62 = vmul.f32 -0.2, %v603_v59 }
 0x12b   : > { %v3569_v4 = vpop.eup %2801  ;;  %v732_v33 = vmul.f32 -0.2, %v604_v0  ;;  %v1028_v36 = vunpack.c.3.s8 %v3364_v25  ;;  %v1089_v27 = vpack.c.b16 %v1026_v14, %v1025_v13  ;;  %v3574_v38 = vmul.f32 1.442695, %v805_v2 }
 0x12c   : > { %v3572_v37 = vpop.eup %2803  ;;  %v701_v39 = vsub.f32 0.0, %v637_v3  ;;  %v1057_v41 = vunpack.c.2.s8 %v3377_v47  ;;  %v1058_v42 = vunpack.c.2.s8 %v3380_v48  ;;  %v765_v45 = vmul.f32 -0.2, %v637_v3 }
 0x12d   : > { %v3578_v44 = vpop.eup %2805  ;;  %v1090_v23 = vpack.c.b8 %v1089_v27, %v1089_v27  ;;  %v1091_v46 = vpack.c.b16 %v1028_v36, %v1027_v18  ;;  %v1059_v17 = vunpack.c.3.s8 %v3377_v47  ;;  %v3583_v25 = vmul.f32 1.442695, %v806_v34 }
 0x12e   : > { %v3581_v9 = vpop.eup %2807  ;;  %v702_v30 = vsub.f32 0.0, %v3564_v11  ;;  %v1060_v5 = vunpack.c.3.s8 %v3380_v48  ;;  %v1121_v31 = vpack.c.b16 %v1058_v42, %v1057_v41  ;;  %v795_v63 = vmin.f32 %v667_v22, %v731_v62 }
 0x12f   : > { %v3587_v19 = vpop.eup %2809  ;;  %v796_v32 = vmin.f32 %v668_v26, %v732_v33  ;;  %v1092_v55 = vpack.c.b8 %v1091_v46, %v1091_v46  ;;  %vm1151_vm4 = vnez %v1090_v23  ;;  %v766_v59 = vmul.f32 -0.2, %v3564_v11  ;;  %v467_v26 = vpop.permute.xlu0 %466 }
 0x130   : > { %v1183_v47 = vsel %vm1151_vm4, 16843009, %v3098_v20  ;;  %v1122_v0 = vpack.c.b8 %v1121_v31, %v1121_v31  ;;  %v1123_v2 = vpack.c.b16 %v1060_v5, %v1059_v17  ;;  %v829_v3 = vmin.f32 %v701_v39, %v765_v45 }
 0x131   : > { %vm1152_vm5 = vnez %v1092_v55  ;;  %v1217_v13 = vunpack.c.0.s8 %v1183_v47  ;;  %v1218_v14 = vunpack.c.1.s8 %v1183_v47  ;;  %v651_v22 = vadd.f32 %v3344_v57, %v3589_v56  ;;  %v472_v47 = vpop.permute.xlu1 %471 }
 0x132   : > { %v1184_v48 = vsel %vm1152_vm5, 16843009, %v3098_v20  ;;  %v1124_v34 = vpack.c.b8 %v1123_v2, %v1123_v2  ;;  %vm1167_vm6 = vnez %v1122_v0  ;;  %v2516_v41 = vpack.c.bf16 %v3507_v40, %v3497_v49 }
 0x133   : > { %v1219_v18 = vunpack.c.0.s8 %v1184_v48  ;;  %vm3596_vm7 = vcmp.ne.s32.totalorder %v1217_v13, 0  ;;  %v1199_v11 = vsel %vm1167_vm6, 16843009, %v3098_v20  ;;  %v1220_v33 = vunpack.c.1.s8 %v1184_v48 }
 0x134   : > { %vm1168_vm8 = vnez %v1124_v34  ;;  %v1249_v36 = vunpack.c.0.s8 %v1199_v11  ;;  %vm3601_vm9 = vcmp.ne.s32.totalorder %v1218_v14, 0  ;;  %v1250_v39 = vunpack.c.1.s8 %v1199_v11 }
 0x135   : > { %vm1283_vm10 = vcmp.ne.s32.totalorder %v1219_v18, 0  ;;  %v1200_v42 = vsel %vm1168_vm8, 16843009, %v3098_v20  ;;  %vm3608_vm11 = vcmp.ne.s32.totalorder %v1220_v33, 0  ;;  %v2564_v17 = vpack.c.bf16 %v3514_v50, %v3501_v43  ;;  %v975_v18 = vld [vmem:[%s3256_s28 + $0x10] sm:$0xff] }
 0x136   : > { %vm2515_vm12 = vmpackc.low %vm1283_vm10, %vm3596_vm7  ;;  %v1251_v23 = vunpack.c.0.s8 %v1200_v42  ;;  %vm3614_vm13 = vcmp.ne.s32.totalorder %v1249_v36, 0  ;;  %v1252_v5 = vunpack.c.1.s8 %v1200_v42  ;;  %vm3624_vm15 = vcmp.ne.s32.totalorder %v1250_v39, 0 }
 0x137   : > { %2517 = vmatmul.msk.bf16.gmra.mxu0 %vm2515_vm12, %v2516_v41  ;;  %vm2563_vm14 = vmpackc.low %vm3608_vm11, %vm3601_vm9  ;;  %v715_v40 = vsub.f32 0.0, %v651_v22  ;;  %v779_v31 = vmul.f32 -0.2, %v651_v22  ;;  %v605_v55 = vadd.f32 %v3344_v57, %v467_v26  ;;  %v2540_v43 = vpack.c.bf16 %v3412_v15, %v3384_v53  ;;  %v562_v22 = vpop.permute.xlu0 %561 }
 0x138   : > { %vm1315_vm0 = vcmp.ne.s32.totalorder %v1251_v23, 0  ;;  %2565 = vmatmul.msk.bf16.gmra.mxu1 %vm2563_vm14, %v2564_v17  ;;  %vm1316_vm1 = vcmp.ne.s32.totalorder %v1252_v5, 0  ;;  %v606_v50 = vadd.f32 %v3348_v60, %v467_v26  ;;  %v830_v0 = vmin.f32 %v702_v30, %v766_v59  ;;  %v983_v5 = vld [vmem:[%s3256_s28 + $0x50] sm:$0xff] }
 0x139   : > { %vm2539_vm2 = vmpackc.low %vm1315_vm0, %vm3614_vm13  ;;  %v2588_v2 = vpack.c.bf16 %v3414_v21, %v3410_v10  ;;  %v669_v13 = vsub.f32 0.0, %v605_v55  ;;  %v733_v14 = vmul.f32 -0.2, %v605_v55  ;;  %2811 = vpow2.f32 %v3558_v16 }
 0x13a   : > { %2541 = vmatmul.msk.bf16.gmra.mxu2 %vm2539_vm2, %v2540_v43  ;;  %vm2587_vm3 = vmpackc.low %vm1316_vm1, %vm3624_vm15  ;;  %v607_v53 = vadd.f32 %v3344_v57, %v472_v47  ;;  %v608_v15 = vadd.f32 %v3348_v60, %v472_v47  ;;  %v873_v30 = vmul.f32 1.442695, %v795_v63  ;;  %v843_v59 = vmin.f32 %v715_v40, %v779_v31  ;;  %v477_v40 = vpop.permute.xlu1 %476 }
 0x13b   : > { %2589 = vmatmul.msk.bf16.gmra.mxu3 %vm2587_vm3, %v2588_v2  ;;  %v670_v48 = vsub.f32 0.0, %v606_v50  ;;  %v734_v34 = vmul.f32 -0.2, %v606_v50  ;;  %2813 = vpow2.f32 %v3574_v38  ;;  %v875_v10 = vmul.f32 1.442695, %v796_v32  ;;  %v976_v32 = vld [vmem:[%s3256_s28 + $0x18] sm:$0xff] }
 0x13c   : > { %v797_v21 = vmin.f32 %v669_v13, %v733_v14  ;;  %2815 = vpow2.f32 %v3583_v25  ;;  %v941_v16 = vmul.f32 1.442695, %v829_v3  ;;  %v943_v26 = vmul.f32 1.442695, %v830_v0  ;;  %v984_v13 = vld [vmem:[%s3256_s28 + $0x58] sm:$0xff] }
 0x13d   : > { %v671_v62 = vsub.f32 0.0, %v607_v53  ;;  %v672_v11 = vsub.f32 0.0, %v608_v15  ;;  %v735_v33 = vmul.f32 -0.2, %v607_v53  ;;  %v736_v36 = vmul.f32 -0.2, %v608_v15 }
 0x13e   : > { %2817 = vpow2.f32 %v873_v30  ;;  %v969_v63 = vmul.f32 1.442695, %v843_v59  ;;  %v798_v27 = vmin.f32 %v670_v48, %v734_v34  ;;  %v643_v39 = vadd.f32 %v3344_v57, %v562_v22 }
 0x13f   : > { %v3645_v41 = vpop.eup %2811  ;;  %2819 = vpow2.f32 %v875_v10  ;;  %v877_v38 = vmul.f32 1.442695, %v797_v21  ;;  %v644_v25 = vadd.f32 %v3348_v60, %v562_v22  ;;  %vm991_vm4 = vnez %v975_v18 }
 0x140   : > { %2821 = vpow2.f32 %v941_v16  ;;  %v799_v42 = vmin.f32 %v671_v62, %v735_v33  ;;  %v800_v45 = vmin.f32 %v672_v11, %v736_v36  ;;  %v3653_v46 = vmul.f32 1.442695, %v798_v27 }
 0x141   : > { %v3649_v3 = vpop.eup %2813  ;;  %2823 = vpow2.f32 %v943_v26  ;;  %v707_v17 = vsub.f32 0.0, %v643_v39  ;;  %vm992_vm5 = vnez %v976_v32  ;;  %v771_v49 = vmul.f32 -0.2, %v643_v39 }
 0x142   : > { %v3651_v23 = vpop.eup %2815  ;;  %2825 = vpow2.f32 %v969_v63  ;;  %v3657_v31 = vsel %vm991_vm4, 16843009, %v3098_v20  ;;  %v3660_v55 = vsel %vm992_vm5, 16843009, %v3098_v20  ;;  %v708_v43 = vsub.f32 0.0, %v644_v25 }
 0x143   : > { %2827 = vpow2.f32 %v877_v38  ;;  %v772_v50 = vmul.f32 -0.2, %v644_v25  ;;  %v1029_v0 = vunpack.c.0.s8 %v3657_v31  ;;  %v1030_v2 = vunpack.c.0.s8 %v3660_v55 }
 0x144   : > { %v3662_v47 = vpop.eup %2817  ;;  %v3669_v53 = vmul.f32 1.442695, %v799_v42  ;;  %v3671_v15 = vmul.f32 1.442695, %v800_v45  ;;  %v1031_v30 = vunpack.c.1.s8 %v3657_v31  ;;  %v1032_v59 = vunpack.c.1.s8 %v3660_v55 }
 0x145   : > { %v3667_v14 = vpop.eup %2819  ;;  %v609_v34 = vadd.f32 %v3344_v57, %v477_v40  ;;  %v610_v10 = vadd.f32 %v3348_v60, %v477_v40  ;;  %v1093_v21 = vpack.c.b16 %v1030_v2, %v1029_v0  ;;  %vm999_vm6 = vnez %v983_v5 }
 0x146   : > { %v3675_v48 = vpop.eup %2821  ;;  %v835_v16 = vmin.f32 %v707_v17, %v771_v49  ;;  %v1095_v26 = vpack.c.b16 %v1032_v59, %v1031_v30  ;;  %vm1000_vm7 = vnez %v984_v13  ;;  %v3682_v18 = vsel %vm999_vm6, 16843009, %v3098_v20 }
 0x147   : > { %v3679_v22 = vpop.eup %2823  ;;  %v836_v11 = vmin.f32 %v708_v43, %v772_v50  ;;  %v1094_v33 = vpack.c.b8 %v1093_v21, %v1093_v21  ;;  %v3687_v36 = vsel %vm1000_vm7, 16843009, %v3098_v20  ;;  %v1061_v63 = vunpack.c.0.s8 %v3682_v18 }
 0x148   : > { %v3684_v62 = vpop.eup %2825  ;;  %v1096_v39 = vpack.c.b8 %v1095_v26, %v1095_v26  ;;  %v1062_v38 = vunpack.c.0.s8 %v3687_v36  ;;  %v1063_v32 = vunpack.c.1.s8 %v3682_v18  ;;  %v1064_v25 = vunpack.c.1.s8 %v3687_v36  ;;  %v567_v26 = vpop.permute.xlu0 %566 }
 0x149   : > { %4445 = vst [vmem:[#allocation8_spill] sm:$0xff] %v3684_v62  ;;  %v3690_v27 = vpop.eup %2827  ;;  %v673_v42 = vsub.f32 0.0, %v609_v34  ;;  %v674_v45 = vsub.f32 0.0, %v610_v10  ;;  %v737_v17 = vmul.f32 -0.2, %v609_v34  ;;  %vm1153_vm8 = vnez %v1094_v33 }
 0x14a   : > { %vm1154_vm9 = vnez %v1096_v39  ;;  %v1185_v5 = vsel %vm1153_vm8, 16843009, %v3098_v20  ;;  %v1125_v49 = vpack.c.b16 %v1062_v38, %v1061_v63  ;;  %v1127_v40 = vpack.c.b16 %v1064_v25, %v1063_v32 }
 0x14b   : > { %v738_v43 = vmul.f32 -0.2, %v610_v10  ;;  %v1186_v50 = vsel %vm1154_vm9, 16843009, %v3098_v20  ;;  %v1221_v0 = vunpack.c.0.s8 %v1185_v5  ;;  %v1222_v2 = vunpack.c.1.s8 %v1185_v5 }
 0x14c   : > { %v1223_v13 = vunpack.c.0.s8 %v1186_v50  ;;  %v1126_v30 = vpack.c.b8 %v1125_v49, %v1125_v49  ;;  %v1128_v59 = vpack.c.b8 %v1127_v40, %v1127_v40  ;;  %v1224_v21 = vunpack.c.1.s8 %v1186_v50 }
 0x14d   : > { %v801_v62 = vmin.f32 %v673_v42, %v737_v17  ;;  %vm1285_vm10 = vcmp.ne.s32.totalorder %v1221_v0, 0  ;;  %v2519_v34 = vpack.c.bf16 %v3434_v12, %v3556_v29  ;;  %vm3699_vm11 = vcmp.ne.s32.totalorder %v1222_v2, 0  ;;  %v572_v29 = vpop.permute.xlu1 %571 }
 0x14e   : > { %vm1287_vm12 = vcmp.ne.s32.totalorder %v1223_v13, 0  ;;  %vm1169_vm13 = vnez %v1126_v30  ;;  %vm1170_vm14 = vnez %v1128_v59  ;;  %vm3703_vm15 = vcmp.ne.s32.totalorder %v1224_v21, 0 }
 0x14f   : > { %vm2518_vm0 = vmpackc.low %vm1287_vm12, %vm1285_vm10  ;;  %v1201_v63 = vsel %vm1169_vm13, 16843009, %v3098_v20  ;;  %v1202_v39 = vsel %vm1170_vm14, 16843009, %v3098_v20  ;;  %v2567_v38 = vpack.c.bf16 %v3441_v35, %v3561_v7  ;;  %v645_v12 = vadd.f32 %v3344_v57, %v567_v26 }
 0x150   : > { %2520 = vmatmul.msk.bf16.gmra.mxu0 %vm2518_vm0, %v2519_v34  ;;  %v1253_v32 = vunpack.c.0.s8 %v1201_v63  ;;  %v1255_v25 = vunpack.c.0.s8 %v1202_v39  ;;  %vm2566_vm1 = vmpackc.low %vm3703_vm15, %vm3699_vm11  ;;  %v1254_v42 = vunpack.c.1.s8 %v1201_v63  ;;  %v1256_v17 = vunpack.c.1.s8 %v1202_v39 }
 0x151   : > { %v953_v5 = vmul.f32 1.442695, %v835_v16  ;;  %v802_v49 = vmin.f32 %v674_v45, %v738_v43  ;;  %v2543_v40 = vpack.c.bf16 %v3550_v61, %v3428_v58  ;;  %2568 = vmatmul.msk.bf16.gmra.mxu1 %vm2566_vm1, %v2567_v38  ;;  %v646_v35 = vadd.f32 %v3348_v60, %v567_v26 }
 0x152   : > { %vm1317_vm2 = vcmp.ne.s32.totalorder %v1253_v32, 0  ;;  %vm1319_vm3 = vcmp.ne.s32.totalorder %v1255_v25, 0  ;;  %vm1318_vm4 = vcmp.ne.s32.totalorder %v1254_v42, 0  ;;  %vm1320_vm5 = vcmp.ne.s32.totalorder %v1256_v17, 0 }
 0x153   : > { %v3721_v7 = vadd.f32 %v3348_v60, %v3589_v56  ;;  %2829 = vpow2.f32 %v3653_v46  ;;  %v955_v50 = vmul.f32 1.442695, %v836_v11  ;;  %vm2542_vm6 = vmpackc.low %vm1319_vm3, %vm1317_vm2  ;;  %v2591_v16 = vpack.c.bf16 %v3554_v1, %v3431_v6  ;;  %v492_v11 = vpop.permute.xlu0 %491 }
 0x154   : > { %2831 = vpow2.f32 %v3669_v53  ;;  %v885_v58 = vmul.f32 1.442695, %v801_v62  ;;  %2544 = vmatmul.msk.bf16.gmra.mxu2 %vm2542_vm6, %v2543_v40  ;;  %vm2590_vm7 = vmpackc.low %vm1320_vm5, %vm1318_vm4  ;;  %v709_v61 = vsub.f32 0.0, %v645_v12  ;;  %v773_v45 = vmul.f32 -0.2, %v645_v12 }
 0x155   : > { %2833 = vpow2.f32 %v3671_v15  ;;  %2592 = vmatmul.msk.bf16.gmra.mxu3 %vm2590_vm7, %v2591_v16  ;;  %v710_v43 = vsub.f32 0.0, %v646_v35  ;;  %v774_v56 = vmul.f32 -0.2, %v646_v35  ;;  %v647_v0 = vadd.f32 %v3344_v57, %v572_v29  ;;  %v577_v59 = vpop.permute.xlu1 %576 }
 0x156   : > { %2835 = vpow2.f32 %v953_v5  ;;  %v887_v46 = vmul.f32 1.442695, %v802_v49  ;;  %v648_v6 = vadd.f32 %v3348_v60, %v572_v29  ;;  %v716_v1 = vsub.f32 0.0, %v3721_v7 }
 0x157   : > { %2837 = vpow2.f32 %v955_v50  ;;  %v837_v53 = vmin.f32 %v709_v61, %v773_v45  ;;  %v838_v2 = vmin.f32 %v710_v43, %v774_v56  ;;  %v711_v13 = vsub.f32 0.0, %v647_v0 }
 0x158   : > { %2839 = vpow2.f32 %v885_v58  ;;  %v775_v15 = vmul.f32 -0.2, %v647_v0  ;;  %v615_v30 = vadd.f32 %v3344_v57, %v492_v11  ;;  %v3737_v26 = vmul.f32 -0.2, %v3721_v7 }
 0x159   : > { %v3731_v62 = vpop.eup %2829  ;;  %2841 = vpow2.f32 %v887_v46  ;;  %v1033_v34 = vunpack.c.2.s8 %v3657_v31  ;;  %v1034_v33 = vunpack.c.2.s8 %v3660_v55  ;;  %v712_v63 = vsub.f32 0.0, %v648_v6 }
 0x15a   : > { %v3734_v21 = vpop.eup %2831  ;;  %v776_v39 = vmul.f32 -0.2, %v648_v6  ;;  %v616_v38 = vadd.f32 %v3348_v60, %v492_v11  ;;  %v1035_v12 = vunpack.c.3.s8 %v3657_v31  ;;  %v957_v32 = vmul.f32 1.442695, %v837_v53 }
 0x15b   : > { %v3741_v10 = vpop.eup %2833  ;;  %v3748_v25 = vadd.f32 %v3344_v57, %v577_v59  ;;  %v1036_v42 = vunpack.c.3.s8 %v3660_v55  ;;  %v1097_v17 = vpack.c.b16 %v1034_v33, %v1033_v34  ;;  %v959_v49 = vmul.f32 1.442695, %v838_v2 }
 0x15c   : > { %v3745_v29 = vpop.eup %2835  ;;  %v839_v40 = vmin.f32 %v711_v13, %v775_v15  ;;  %v679_v35 = vsub.f32 0.0, %v615_v30  ;;  %v1065_v50 = vunpack.c.2.s8 %v3682_v18  ;;  %v1066_v61 = vunpack.c.2.s8 %v3687_v36 }
 0x15d   : > { %v3751_v5 = vpop.eup %2837  ;;  %v1098_v58 = vpack.c.b8 %v1097_v17, %v1097_v17  ;;  %v1099_v31 = vpack.c.b16 %v1036_v42, %v1035_v12  ;;  %v1067_v45 = vunpack.c.3.s8 %v3682_v18  ;;  %v680_v43 = vsub.f32 0.0, %v616_v38 }
 0x15e   : > { %v3754_v16 = vpop.eup %2839  ;;  %v743_v56 = vmul.f32 -0.2, %v615_v30  ;;  %v744_v0 = vmul.f32 -0.2, %v616_v38  ;;  %v1068_v55 = vunpack.c.3.s8 %v3687_v36  ;;  %v3762_v11 = vadd.f32 %v3348_v60, %v577_v59 }
 0x15f   : > { %v3759_v46 = vpop.eup %2841  ;;  %v1100_v6 = vpack.c.b8 %v1099_v31, %v1099_v31  ;;  %vm1155_vm8 = vnez %v1098_v58  ;;  %v1129_v53 = vpack.c.b16 %v1066_v61, %v1065_v50  ;;  %2843 = vpow2.f32 %v957_v32 }
 0x160   : > { %v840_v2 = vmin.f32 %v712_v63, %v776_v39  ;;  %v1187_v13 = vsel %vm1155_vm8, 16843009, %v3098_v20  ;;  %v1131_v15 = vpack.c.b16 %v1068_v55, %v1067_v45  ;;  %v807_v33 = vmin.f32 %v679_v35, %v743_v56  ;;  %v977_v56 = vld [vmem:[%s3256_s28 + $0x20] sm:$0xff] }
 0x161   : > { %vm1156_vm9 = vnez %v1100_v6  ;;  %v1225_v18 = vunpack.c.0.s8 %v1187_v13  ;;  %v1130_v34 = vpack.c.b8 %v1129_v53, %v1129_v53  ;;  %v1226_v30 = vunpack.c.1.s8 %v1187_v13  ;;  %v497_v13 = vpop.permute.xlu0 %496 }
 0x162   : > { %v808_v38 = vmin.f32 %v680_v43, %v744_v0  ;;  %v1188_v36 = vsel %vm1156_vm9, 16843009, %v3098_v20  ;;  %v1132_v12 = vpack.c.b8 %v1131_v15, %v1131_v15  ;;  %v2522_v39 = vpack.c.bf16 %v3662_v47, %v3474_v24  ;;  %v978_v0 = vld [vmem:[%s3256_s28 + $0x28] sm:$0xff] }
 0x163   : > { %v1227_v42 = vunpack.c.0.s8 %v1188_v36  ;;  %vm3766_vm10 = vcmp.ne.s32.totalorder %v1225_v18, 0  ;;  %vm1171_vm11 = vnez %v1130_v34  ;;  %v1228_v63 = vunpack.c.1.s8 %v1188_v36 }
 0x164   : > { %vm1172_vm12 = vnez %v1132_v12  ;;  %v1203_v32 = vsel %vm1171_vm11, 16843009, %v3098_v20  ;;  %vm3773_vm13 = vcmp.ne.s32.totalorder %v1226_v30, 0  ;;  %v2570_v47 = vpack.c.bf16 %v3667_v14, %v3480_v28 }
 0x165   : > { %vm3777_vm14 = vcmp.ne.s32.totalorder %v1227_v42, 0  ;;  %v1204_v50 = vsel %vm1172_vm12, 16843009, %v3098_v20  ;;  %v1257_v58 = vunpack.c.0.s8 %v1203_v32  ;;  %vm3782_vm15 = vcmp.ne.s32.totalorder %v1228_v63, 0  ;;  %v3786_v61 = vpop.eup %2843 }
 0x166   : > { %vm2521_vm0 = vmpackc.low %vm3777_vm14, %vm3766_vm10  ;;  %v1259_v24 = vunpack.c.0.s8 %v1204_v50  ;;  %v1258_v45 = vunpack.c.1.s8 %v1203_v32  ;;  %v1260_v43 = vunpack.c.1.s8 %v1204_v50  ;;  %v961_v55 = vmul.f32 1.442695, %v839_v40 }
 0x167   : > { %v963_v6 = vmul.f32 1.442695, %v840_v2  ;;  %v713_v53 = vsub.f32 0.0, %v3748_v25  ;;  %2523 = vmatmul.msk.bf16.gmra.mxu0 %vm2521_vm0, %v2522_v39  ;;  %vm1321_vm1 = vcmp.ne.s32.totalorder %v1257_v58, 0  ;;  %vm2569_vm2 = vmpackc.low %vm3782_vm15, %vm3773_vm13  ;;  %v2546_v28 = vpack.c.bf16 %v3587_v19, %v3578_v44 }
 0x168   : > { %vm1323_vm3 = vcmp.ne.s32.totalorder %v1259_v24, 0  ;;  %2571 = vmatmul.msk.bf16.gmra.mxu1 %vm2569_vm2, %v2570_v47  ;;  %vm1322_vm4 = vcmp.ne.s32.totalorder %v1258_v45, 0  ;;  %vm1324_vm5 = vcmp.ne.s32.totalorder %v1260_v43, 0  ;;  %2845 = vpow2.f32 %v959_v49 }
 0x169   : > { %v897_v14 = vmul.f32 1.442695, %v807_v33  ;;  %v714_v40 = vsub.f32 0.0, %v3762_v11  ;;  %vm2545_vm6 = vmpackc.low %vm1323_vm3, %vm1321_vm1  ;;  %v2594_v2 = vpack.c.bf16 %v3645_v41, %v3581_v9  ;;  %v899_v15 = vmul.f32 1.442695, %v808_v38  ;;  %v985_v9 = vld [vmem:[%s3256_s28 + $0x60] sm:$0xff] }
 0x16a   : > { %2547 = vmatmul.msk.bf16.gmra.mxu2 %vm2545_vm6, %v2546_v28  ;;  %vm2593_vm7 = vmpackc.low %vm1324_vm5, %vm1322_vm4  ;;  %v3807_v18 = vadd.f32 %v3344_v57, %v497_v13  ;;  %vm993_vm8 = vnez %v977_v56  ;;  %vm994_vm9 = vnez %v978_v0  ;;  %2847 = vpow2.f32 %v961_v55  ;;  %v986_v33 = vld [vmem:[%s3256_s28 + $0x68] sm:$0xff] }
 0x16b   : > { %2595 = vmatmul.msk.bf16.gmra.mxu3 %vm2593_vm7, %v2594_v2  ;;  %v3810_v44 = vadd.f32 %v3348_v60, %v497_v13  ;;  %v3813_v19 = vsel %vm993_vm8, 16843009, %v3098_v20  ;;  %v3816_v49 = vsel %vm994_vm9, 16843009, %v3098_v20  ;;  %2849 = vpow2.f32 %v963_v6 }
 0x16c   : > { %v3820_v41 = vmul.f32 -0.2, %v3748_v25  ;;  %v1037_v34 = vunpack.c.0.s8 %v3813_v19  ;;  %v1038_v30 = vunpack.c.0.s8 %v3816_v49  ;;  %2851 = vpow2.f32 %v897_v14 }
 0x16d   : > { %v3826_v38 = vmul.f32 -0.2, %v3762_v11  ;;  %v1039_v36 = vunpack.c.1.s8 %v3813_v19  ;;  %v1040_v12 = vunpack.c.1.s8 %v3816_v49  ;;  %2853 = vpow2.f32 %v899_v15 }
 0x16e   : > { %v681_v42 = vsub.f32 0.0, %v3807_v18  ;;  %v1101_v59 = vpack.c.b16 %v1038_v30, %v1037_v34  ;;  %vm1001_vm10 = vnez %v985_v9  ;;  %v3831_v63 = vpop.eup %2845  ;;  %v682_v39 = vsub.f32 0.0, %v3810_v44 }
 0x16f   : > { %v1103_v32 = vpack.c.b16 %v1040_v12, %v1039_v36  ;;  %vm1002_vm11 = vnez %v986_v33  ;;  %v3835_v17 = vsel %vm1001_vm10, 16843009, %v3098_v20  ;;  %v3838_v35 = vmul.f32 -0.2, %v3807_v18 }
 0x170   : > { %v1102_v50 = vpack.c.b8 %v1101_v59, %v1101_v59  ;;  %v3841_v58 = vsel %vm1002_vm11, 16843009, %v3098_v20  ;;  %v1069_v31 = vunpack.c.0.s8 %v3835_v17  ;;  %v3844_v24 = vpop.eup %2847  ;;  %v1071_v43 = vunpack.c.1.s8 %v3835_v17 }
 0x171   : > { %v1104_v47 = vpack.c.b8 %v1103_v32, %v1103_v32  ;;  %v1070_v45 = vunpack.c.0.s8 %v3841_v58  ;;  %v1072_v56 = vunpack.c.1.s8 %v3841_v58  ;;  %v3849_v0 = vpop.eup %2849  ;;  %v2525_v55 = vpack.c.bf16 %v3734_v21, %v3690_v27 }
 0x172   : > { %vm1157_vm12 = vnez %v1102_v50  ;;  %v2549_v6 = vpack.c.bf16 %v3488_v8, %v3675_v48  ;;  %v2573_v13 = vpack.c.bf16 %v3741_v10, %v3731_v62  ;;  %v3857_v28 = vpop.eup %2851  ;;  %v1041_v27 = vunpack.c.2.s8 %v3813_v19 }
 0x173   : > { %vm1158_vm13 = vnez %v1104_v47  ;;  %v1189_v14 = vsel %vm1157_vm12, 16843009, %v3098_v20  ;;  %v1133_v2 = vpack.c.b16 %v1070_v45, %v1069_v31  ;;  %v1135_v15 = vpack.c.b16 %v1072_v56, %v1071_v43  ;;  %v3860_v9 = vpop.eup %2853  ;;  %v502_v56 = vpop.permute.xlu1 %501 }
 0x174   : > { %v1190_v34 = vsel %vm1158_vm13, 16843009, %v3098_v20  ;;  %v1229_v30 = vunpack.c.0.s8 %v1189_v14  ;;  %v1230_v33 = vunpack.c.1.s8 %v1189_v14  ;;  %v1042_v10 = vunpack.c.2.s8 %v3816_v49 }
 0x175   : > { %v1231_v21 = vunpack.c.0.s8 %v1190_v34  ;;  %v1134_v8 = vpack.c.b8 %v1133_v2, %v1133_v2  ;;  %v1136_v48 = vpack.c.b8 %v1135_v15, %v1135_v15  ;;  %v1232_v36 = vunpack.c.1.s8 %v1190_v34 }
 0x176   : > { %vm1293_vm14 = vcmp.ne.s32.totalorder %v1229_v30, 0  ;;  %vm3864_vm15 = vcmp.ne.s32.totalorder %v1230_v33, 0  ;;  %v1043_v12 = vunpack.c.3.s8 %v3813_v19  ;;  %v1044_v50 = vunpack.c.3.s8 %v3816_v49 }
 0x177   : > { %vm1295_vm0 = vcmp.ne.s32.totalorder %v1231_v21, 0  ;;  %vm1173_vm1 = vnez %v1134_v8  ;;  %vm1174_vm2 = vnez %v1136_v48  ;;  %vm1296_vm3 = vcmp.ne.s32.totalorder %v1232_v36, 0  ;;  %v980_v36 = vld [vmem:[%s3256_s28 + $0x38] sm:$0xff] }
 0x178   : > { %vm2524_vm4 = vmpackc.low %vm1295_vm0, %vm1293_vm14  ;;  %v1205_v59 = vsel %vm1173_vm1, 16843009, %v3098_v20  ;;  %v1206_v32 = vsel %vm1174_vm2, 16843009, %v3098_v20  ;;  %v1105_v31 = vpack.c.b16 %v1042_v10, %v1041_v27  ;;  %v2597_v14 = vpack.c.bf16 %v3494_v52, %v3679_v22 }
 0x179   : > { %2526 = vmatmul.msk.bf16.gmra.mxu0 %vm2524_vm4, %v2525_v55  ;;  %v1261_v47 = vunpack.c.0.s8 %v1205_v59  ;;  %v1263_v45 = vunpack.c.0.s8 %v1206_v32  ;;  %vm2572_vm5 = vmpackc.low %vm1296_vm3, %vm3864_vm15  ;;  %v1262_v43 = vunpack.c.1.s8 %v1205_v59  ;;  %v1264_v19 = vunpack.c.1.s8 %v1206_v32 }
 0x17a   : > { %2574 = vmatmul.msk.bf16.gmra.mxu1 %vm2572_vm5, %v2573_v13  ;;  %v1106_v2 = vpack.c.b8 %v1105_v31, %v1105_v31  ;;  %v1107_v15 = vpack.c.b16 %v1044_v50, %v1043_v12  ;;  %v1073_v34 = vunpack.c.2.s8 %v3835_v17  ;;  %v1074_v55 = vunpack.c.2.s8 %v3841_v58  ;;  %v979_v13 = vld [vmem:[%s3256_s28 + $0x30] sm:$0xff] }
 0x17b   : > { %vm1325_vm6 = vcmp.ne.s32.totalorder %v1261_v47, 0  ;;  %vm1327_vm7 = vcmp.ne.s32.totalorder %v1263_v45, 0  ;;  %vm1326_vm8 = vcmp.ne.s32.totalorder %v1262_v43, 0  ;;  %vm1328_vm9 = vcmp.ne.s32.totalorder %v1264_v19, 0 }
 0x17c   : > { %vm2548_vm10 = vmpackc.low %vm1327_vm7, %vm1325_vm6  ;;  %v1108_v49 = vpack.c.b8 %v1107_v15, %v1107_v15  ;;  %vm1159_vm11 = vnez %v1106_v2  ;;  %v1075_v30 = vunpack.c.3.s8 %v3835_v17  ;;  %v3882_v33 = vmul.f32 -0.2, %v3810_v44 }
 0x17d   : > { %v3885_v52 = vadd.f32 %v3344_v57, %v502_v56  ;;  %2550 = vmatmul.msk.bf16.gmra.mxu2 %vm2548_vm10, %v2549_v6  ;;  %vm2596_vm12 = vmpackc.low %vm1328_vm9, %vm1326_vm8  ;;  %v1191_v22 = vsel %vm1159_vm11, 16843009, %v3098_v20  ;;  %v1076_v27 = vunpack.c.3.s8 %v3841_v58  ;;  %v1137_v8 = vpack.c.b16 %v1074_v55, %v1073_v34 }
 0x17e   : > { %2598 = vmatmul.msk.bf16.gmra.mxu3 %vm2596_vm12, %v2597_v14  ;;  %vm1160_vm13 = vnez %v1108_v49  ;;  %v1233_v21 = vunpack.c.0.s8 %v1191_v22  ;;  %v1234_v48 = vunpack.c.1.s8 %v1191_v22  ;;  %v3891_v17 = vadd.f32 %v3348_v60, %v502_v56  ;;  %v987_v56 = vld [vmem:[%s3256_s28 + $0x70] sm:$0xff]  ;;  %v988_v22 = vld [vmem:[%s3256_s28 + $0x78] sm:$0xff] }
 0x17f   : > { %v1192_v62 = vsel %vm1160_vm13, 16843009, %v3098_v20  ;;  %v1139_v10 = vpack.c.b16 %v1076_v27, %v1075_v30  ;;  %vm995_vm14 = vnez %v979_v13  ;;  %v1138_v58 = vpack.c.b8 %v1137_v8, %v1137_v8 }
 0x180   : > { %v1235_v57 = vunpack.c.0.s8 %v1192_v62  ;;  %vm3894_vm15 = vcmp.ne.s32.totalorder %v1233_v21, 0  ;;  %v1236_v12 = vunpack.c.1.s8 %v1192_v62  ;;  %vm3898_vm0 = vcmp.ne.s32.totalorder %v1234_v48, 0 }
 0x181   : > { %v1140_v59 = vpack.c.b8 %v1139_v10, %v1139_v10  ;;  %vm996_vm1 = vnez %v980_v36  ;;  %v3903_v60 = vsel %vm995_vm14, 16843009, %v3098_v20  ;;  %vm1175_vm3 = vnez %v1138_v58 }
 0x182   : > { %vm3905_vm2 = vcmp.ne.s32.totalorder %v1235_v57, 0  ;;  %vm3909_vm4 = vcmp.ne.s32.totalorder %v1236_v12, 0  ;;  %v3914_v47 = vsel %vm996_vm1, 16843009, %v3098_v20  ;;  %v1207_v45 = vsel %vm1175_vm3, 16843009, %v3098_v20 }
 0x183   : > { %vm1176_vm5 = vnez %v1140_v59  ;;  %v1045_v43 = vunpack.c.0.s8 %v3903_v60  ;;  %v1046_v19 = vunpack.c.0.s8 %v3914_v47  ;;  %v1265_v2 = vunpack.c.0.s8 %v1207_v45  ;;  %vm2527_vm6 = vmpackc.low %vm3905_vm2, %vm3894_vm15 }
 0x184   : > { %v1208_v14 = vsel %vm1176_vm5, 16843009, %v3098_v20  ;;  %v1266_v15 = vunpack.c.1.s8 %v1207_v45  ;;  %v1047_v34 = vunpack.c.1.s8 %v3903_v60  ;;  %v1048_v30 = vunpack.c.1.s8 %v3914_v47  ;;  %vm2575_vm10 = vmpackc.low %vm3909_vm4, %vm3898_vm0 }
 0x185   : > { %v1267_v49 = vunpack.c.0.s8 %v1208_v14  ;;  %v1268_v55 = vunpack.c.1.s8 %v1208_v14  ;;  %v1109_v13 = vpack.c.b16 %v1046_v19, %v1045_v43  ;;  %v3927_v27 = vmin.f32 %v681_v42, %v3838_v35 }
 0x186   : > { %v2528_v21 = vpack.c.bf16 %v3569_v4, %v3754_v16  ;;  %v2576_v8 = vpack.c.bf16 %v3572_v37, %v3759_v46  ;;  %vm1003_vm7 = vnez %v987_v56  ;;  %vm3937_vm8 = vcmp.ne.s32.totalorder %v1265_v2, 0  ;;  %v1481_v37 = vld [vmem:[%s3245_s24 + $0x38] sm:$0xff] }
 0x187   : > { %vm3941_vm9 = vcmp.ne.s32.totalorder %v1267_v49, 0  ;;  %v1110_v42 = vpack.c.b8 %v1109_v13, %v1109_v13  ;;  %v1111_v35 = vpack.c.b16 %v1048_v30, %v1047_v34  ;;  %vm3949_vm11 = vcmp.ne.s32.totalorder %v1266_v15, 0 }
 0x188   : > { %vm3953_vm12 = vcmp.ne.s32.totalorder %v1268_v55, 0  ;;  %vm1004_vm13 = vnez %v988_v22  ;;  %v1019_v16 = vsel %vm1003_vm7, 16843009, %v3098_v20  ;;  %vm2551_vm15 = vmpackc.low %vm3941_vm9, %vm3937_vm8  ;;  %v810_v12 = vmin.f32 %v682_v39, %v3882_v33 }
 0x189   : > { %2529 = vmatmul.msk.bf16.gmra.mxu0 %vm2527_vm6, %v2528_v21  ;;  %v1112_v46 = vpack.c.b8 %v1111_v35, %v1111_v35  ;;  %vm1161_vm14 = vnez %v1110_v42  ;;  %v1020_v36 = vsel %vm1004_vm13, 16843009, %v3098_v20  ;;  %v1077_v62 = vunpack.c.0.s8 %v1019_v16  ;;  %vm2599_vm0 = vmpackc.low %vm3953_vm12, %vm3949_vm11 }
 0x18a   : > { %2577 = vmatmul.msk.bf16.gmra.mxu1 %vm2575_vm10, %v2576_v8  ;;  %v1193_v10 = vsel %vm1161_vm14, 16843009, %v3098_v20  ;;  %v1078_v57 = vunpack.c.0.s8 %v1020_v36  ;;  %v1079_v6 = vunpack.c.1.s8 %v1019_v16  ;;  %v1080_v58 = vunpack.c.1.s8 %v1020_v36 }
 0x18b   : > { %v2552_v59 = vpack.c.bf16 %v3745_v29, %v3533_v54  ;;  %v2600_v32 = vpack.c.bf16 %v3751_v5, %v3548_v51  ;;  %vm1162_vm1 = vnez %v1112_v46  ;;  %v1049_v43 = vunpack.c.2.s8 %v3903_v60 }
 0x18c   : > { %v1194_v50 = vsel %vm1162_vm1, 16843009, %v3098_v20  ;;  %v1141_v31 = vpack.c.b16 %v1078_v57, %v1077_v62  ;;  %v1143_v45 = vpack.c.b16 %v1080_v58, %v1079_v6  ;;  %v683_v44 = vsub.f32 0.0, %v3885_v52 }
 0x18d   : > { %v747_v39 = vmul.f32 -0.2, %v3885_v52  ;;  %2553 = vmatmul.msk.bf16.gmra.mxu2 %vm2551_vm15, %v2552_v59  ;;  %v1237_v54 = vunpack.c.0.s8 %v1193_v10  ;;  %v1239_v29 = vunpack.c.0.s8 %v1194_v50  ;;  %v1050_v33 = vunpack.c.2.s8 %v3914_v47 }
 0x18e   : > { %2601 = vmatmul.msk.bf16.gmra.mxu3 %vm2599_vm0, %v2600_v32  ;;  %v1142_v51 = vpack.c.b8 %v1141_v31, %v1141_v31  ;;  %v1144_v5 = vpack.c.b8 %v1143_v45, %v1143_v45  ;;  %v1051_v19 = vunpack.c.3.s8 %v3903_v60  ;;  %v684_v56 = vsub.f32 0.0, %v3891_v17  ;;  %v4512_v45 = vld [vmem:[#allocation8_spill] sm:$0xff] }
 0x18f   : > { %v1238_v14 = vunpack.c.1.s8 %v1193_v10  ;;  %v1240_v2 = vunpack.c.1.s8 %v1194_v50  ;;  %v1052_v52 = vunpack.c.3.s8 %v3914_v47  ;;  %v1113_v15 = vpack.c.b16 %v1050_v33, %v1049_v43 }
 0x190   : > { %vm1177_vm2 = vnez %v1142_v51  ;;  %vm1178_vm3 = vnez %v1144_v5  ;;  %v1081_v34 = vunpack.c.2.s8 %v1019_v16  ;;  %v1082_v13 = vunpack.c.2.s8 %v1020_v36  ;;  %v1475_v5 = vld [vmem:[%s3245_s24 + $0x8] sm:$0xff] }
 0x191   : > { %v1209_v49 = vsel %vm1177_vm2, 16843009, %v3098_v20  ;;  %v1210_v55 = vsel %vm1178_vm3, 16843009, %v3098_v20  ;;  %v1115_v30 = vpack.c.b16 %v1052_v52, %v1051_v19  ;;  %v748_v21 = vmul.f32 -0.2, %v3891_v17 }
 0x192   : > { %v1611_v22 = vpop.f32.mrf.mxu0  ;;  %v811_v60 = vmin.f32 %v683_v44, %v747_v39  ;;  %vm3991_vm4 = vcmp.ne.s32.totalorder %v1237_v54, 0  ;;  %vm3995_vm5 = vcmp.ne.s32.totalorder %v1239_v29, 0  ;;  %v1269_v48 = vunpack.c.0.s8 %v1209_v49 }
 0x193   : > { %v1271_v18 = vunpack.c.0.s8 %v1210_v55  ;;  %v1083_v42 = vunpack.c.3.s8 %v1019_v16  ;;  %v1084_v35 = vunpack.c.3.s8 %v1020_v36  ;;  %vm3999_vm6 = vcmp.ne.s32.totalorder %v1238_v14, 0  ;;  %vm2530_vm8 = vmpackc.low %vm3995_vm5, %vm3991_vm4 }
 0x194   : > { %vm4003_vm7 = vcmp.ne.s32.totalorder %v1240_v2, 0  ;;  %v1270_v17 = vunpack.c.1.s8 %v1209_v49  ;;  %v1272_v46 = vunpack.c.1.s8 %v1210_v55  ;;  %v1114_v62 = vpack.c.b8 %v1113_v15, %v1113_v15 }
 0x195   : > { %v1116_v10 = vpack.c.b8 %v1115_v30, %v1115_v30  ;;  %v1145_v57 = vpack.c.b16 %v1082_v13, %v1081_v34  ;;  %v1147_v6 = vpack.c.b16 %v1084_v35, %v1083_v42  ;;  %v841_v16 = vmin.f32 %v713_v53, %v3820_v41  ;;  %vm2578_vm11 = vmpackc.low %vm4003_vm7, %vm3999_vm6 }
 0x196   : > { %v901_v36 = vmul.f32 1.442695, %v3927_v27  ;;  %v903_v59 = vmul.f32 1.442695, %v810_v12  ;;  %v812_v32 = vmin.f32 %v684_v56, %v748_v21  ;;  %v905_v50 = vmul.f32 1.442695, %v811_v60 }
 0x197   : > { %v2531_v31 = vpack.c.bf16 %v3857_v28, %v3649_v3  ;;  %vm4017_vm9 = vcmp.ne.s32.totalorder %v1269_v48, 0  ;;  %vm4021_vm10 = vcmp.ne.s32.totalorder %v1271_v18, 0  ;;  %v2579_v53 = vpack.c.bf16 %v3860_v9, %v3651_v23  ;;  %v1474_v9 = vld [vmem:[%s3245_s24] sm:$0xff]  ;;  %v1476_v3 = vld [vmem:[%s3245_s24 + $0x10] sm:$0xff] }
 0x198   : > { %vm4031_vm12 = vcmp.ne.s32.totalorder %v1270_v17, 0  ;;  %vm4035_vm13 = vcmp.ne.s32.totalorder %v1272_v46, 0  ;;  %vm4039_vm14 = vnez %v1114_v62  ;;  %vm4043_vm15 = vnez %v1116_v10  ;;  %vm2554_vm0 = vmpackc.low %vm4021_vm10, %vm4017_vm9  ;;  %v1491_v62 = vld [vmem:[%s3245_s24 + $0x88] sm:$0xff]  ;;  %v1480_v48 = vld [vmem:[%s3245_s24 + $0x30] sm:$0xff] }
 0x199   : > { %2532 = vmatmul.msk.bf16.gmra.mxu0 %vm2530_vm8, %v2531_v31  ;;  %v1146_v43 = vpack.c.b8 %v1145_v57, %v1145_v57  ;;  %v1148_v23 = vpack.c.b8 %v1147_v6, %v1147_v6  ;;  %v842_v44 = vmin.f32 %v714_v40, %v3826_v38  ;;  %2855 = vpow2.f32 %v901_v36  ;;  %vm2602_vm1 = vmpackc.low %vm4035_vm13, %vm4031_vm12  ;;  %v1497_v36 = vld [vmem:[%s3245_s24 + $0xb8] sm:$0xff] }
 0x19a   : > { %v1700_v58 = vpop.f32.mrf.mxu1  ;;  %v907_v39 = vmul.f32 1.442695, %v812_v32  ;;  %2580 = vmatmul.msk.bf16.gmra.mxu1 %vm2578_vm11, %v2579_v53  ;;  %v844_v11 = vmin.f32 %v716_v1, %v3737_v26  ;;  %2857 = vpow2.f32 %v903_v59  ;;  %v2555_v40 = vpack.c.bf16 %v3844_v24, %v3786_v61  ;;  %v1613_v38 = vpop.f32.mrf.mxu0 }
 0x19b   : > { %v1701_v28 = vadd.f32 %v1700_v58, %v1611_v22  ;;  %v2603_v29 = vpack.c.bf16 %v3849_v0, %v3831_v63  ;;  %v1195_v7 = vsel %vm4039_vm14, 16843009, %v3098_v20  ;;  %v1196_v1 = vsel %vm4043_vm15, 16843009, %v3098_v20  ;;  %v1490_v0 = vld [vmem:[%s3245_s24 + $0x80] sm:$0xff] }
 0x19c   : > { %v965_v24 = vmul.f32 1.442695, %v841_v16  ;;  %2859 = vpow2.f32 %v905_v50  ;;  %vm4077_vm2 = vnez %v1146_v43  ;;  %vm4081_vm3 = vnez %v1148_v23  ;;  %v1478_v63 = vld [vmem:[%s3245_s24 + $0x20] sm:$0xff] }
 0x19d   : > { %v1780_v26 = vadd.f32 %v1701_v28, %v1474_v9  ;;  %2556 = vmatmul.msk.bf16.gmra.mxu2 %vm2554_vm0, %v2555_v40  ;;  %v967_v19 = vmul.f32 1.442695, %v842_v44  ;;  %2861 = vpow2.f32 %v907_v39  ;;  %v1241_v2 = vunpack.c.0.s8 %v1195_v7  ;;  %v1477_v9 = vld [vmem:[%s3245_s24 + $0x18] sm:$0xff]  ;;  %v1492_v39 = vld [vmem:[%s3245_s24 + $0x90] sm:$0xff] }
 0x19e   : > { %2604 = vmatmul.msk.bf16.gmra.mxu3 %vm2602_vm1, %v2603_v29  ;;  %v1243_v52 = vunpack.c.0.s8 %v1196_v1  ;;  %v1242_v15 = vunpack.c.1.s8 %v1195_v7  ;;  %v1244_v34 = vunpack.c.1.s8 %v1196_v1  ;;  %v1211_v55 = vsel %vm4077_vm2, 16843009, %v3098_v20  ;;  %v1493_v1 = vld [vmem:[%s3245_s24 + $0x98] sm:$0xff] }
 0x19f   : > { %v1651_v54 = vpop.f32.mrf.mxu2  ;;  %1812 = vst [vmem:[%s3245_s24] sm:$0xff] %v1780_v26  ;;  %v2856_v49 = vpop.eup %2855  ;;  %v1212_v30 = vsel %vm4081_vm3, 16843009, %v3098_v20  ;;  %v971_v60 = vmul.f32 1.442695, %v844_v11  ;;  %2863 = vpow2.f32 %v965_v24  ;;  %vm4100_vm4 = vcmp.ne.s32.totalorder %v1241_v2, 0 }
 0x1a0   : > { %v2858_v21 = vpop.eup %2857  ;;  %2865 = vpow2.f32 %v967_v19  ;;  %vm4104_vm5 = vcmp.ne.s32.totalorder %v1243_v52, 0  ;;  %v1273_v42 = vunpack.c.0.s8 %v1211_v55  ;;  %v1275_v20 = vunpack.c.0.s8 %v1212_v30 }
 0x1a1   : > { %v1740_v61 = vpop.f32.mrf.mxu3  ;;  %vm4109_vm6 = vcmp.ne.s32.totalorder %v1242_v15, 0  ;;  %vm4113_vm7 = vcmp.ne.s32.totalorder %v1244_v34, 0  ;;  %v1274_v17 = vunpack.c.1.s8 %v1211_v55  ;;  %v1276_v46 = vunpack.c.1.s8 %v1212_v30  ;;  %vm2533_vm8 = vmpackc.low %vm4104_vm5, %vm4100_vm4  ;;  %v1494_v15 = vld [vmem:[%s3245_s24 + $0xa0] sm:$0xff] }
 0x1a2   : > { %v1702_v33 = vpop.f32.mrf.mxu1  ;;  %v1741_v56 = vadd.f32 %v1740_v61, %v1651_v54  ;;  %v2860_v47 = vpop.eup %2859  ;;  %2867 = vpow2.f32 %v971_v60  ;;  %vm4122_vm9 = vcmp.ne.s32.totalorder %v1273_v42, 0  ;;  %vm4126_vm10 = vcmp.ne.s32.totalorder %v1275_v20, 0  ;;  %vm2581_vm11 = vmpackc.low %vm4113_vm7, %vm4109_vm6 }
 0x1a3   : > { %v1703_v14 = vadd.f32 %v1702_v33, %v1613_v38  ;;  %v2862_v35 = vpop.eup %2861  ;;  %v2534_v58 = vpack.c.bf16 %v2860_v47, %v2856_v49  ;;  %vm1338_vm12 = vcmp.ne.s32.totalorder %v1274_v17, 0  ;;  %vm1340_vm13 = vcmp.ne.s32.totalorder %v1276_v46, 0  ;;  %vm2557_vm14 = vmpackc.low %vm4126_vm10, %vm4122_vm9  ;;  %v1496_v46 = vld [vmem:[%s3245_s24 + $0xb0] sm:$0xff] }
 0x1a4   : > { %v1796_v13 = vadd.f32 %v1741_v56, %v1490_v0  ;;  %v2582_v50 = vpack.c.bf16 %v2862_v35, %v2858_v21  ;;  %vm2605_vm15 = vmpackc.low %vm1340_vm13, %vm1338_vm12  ;;  %v1479_v56 = vld [vmem:[%s3245_s24 + $0x28] sm:$0xff] }
 0x1a5   : > { %v1781_v22 = vadd.f32 %v1703_v14, %v1475_v5  ;;  %v2864_v6 = vpop.eup %2863 }
 0x1a6   : > { %1828 = vst [vmem:[%s3245_s24 + $0x80] sm:$0xff] %v1796_v13  ;;  %v2866_v32 = vpop.eup %2865  ;;  %v2558_v25 = vpack.c.bf16 %v4512_v45, %v2864_v6 }
 0x1a7   : > { %v1653_v8 = vpop.f32.mrf.mxu2  ;;  %1813 = vst [vmem:[%s3245_s24 + $0x8] sm:$0xff] %v1781_v22  ;;  %v1495_v22 = vld [vmem:[%s3245_s24 + $0xa8] sm:$0xff] }
 0x1a8   : > { %v2868_v31 = vpop.eup %2867 }
 0x1a9   : > { %v1742_v10 = vpop.f32.mrf.mxu3  ;;  %2535 = vmatmul.msk.bf16.gmra.mxu0 %vm2533_vm8, %v2534_v58  ;;  %v2606_v53 = vpack.c.bf16 %v2868_v31, %v2866_v32  ;;  %v1482_v31 = vld [vmem:[%s3245_s24 + $0x40] sm:$0xff] }
 0x1aa   : > { %v1743_v57 = vadd.f32 %v1742_v10, %v1653_v8  ;;  %2583 = vmatmul.msk.bf16.gmra.mxu1 %vm2581_vm11, %v2582_v50 }
 0x1ac   : > { %v1797_v59 = vadd.f32 %v1743_v57, %v1491_v62 }
 0x1ad   : > { %2559 = vmatmul.msk.bf16.gmra.mxu2 %vm2557_vm14, %v2558_v25 }
 0x1ae   : > { %1829 = vst [vmem:[%s3245_s24 + $0x88] sm:$0xff] %v1797_v59  ;;  %2607 = vmatmul.msk.bf16.gmra.mxu3 %vm2605_vm15, %v2606_v53 }
 0x1b4   : > { %v1616_v41 = vpop.f32.mrf.mxu0 }
 0x1b5   : > { %v1705_v28 = vpop.f32.mrf.mxu1 }
 0x1b6   : > { %v1706_v27 = vadd.f32 %v1705_v28, %v1616_v41  ;;  %v1483_v28 = vld [vmem:[%s3245_s24 + $0x48] sm:$0xff] }
 0x1b8   : > { %v1782_v12 = vadd.f32 %v1706_v27, %v1476_v3 }
 0x1ba   : > { %1814 = vst [vmem:[%s3245_s24 + $0x10] sm:$0xff] %v1782_v12 }
 0x1bc   : > { %v1618_v43 = vpop.f32.mrf.mxu0 }
 0x1bd   : > { %v1656_v23 = vpop.f32.mrf.mxu2  ;;  %v1707_v44 = vpop.f32.mrf.mxu1 }
 0x1be   : > { %v1745_v54 = vpop.f32.mrf.mxu3  ;;  %v1708_v11 = vadd.f32 %v1707_v44, %v1618_v43 }
 0x1bf   : > { %v1746_v40 = vadd.f32 %v1745_v54, %v1656_v23  ;;  %v1498_v23 = vld [vmem:[%s3245_s24 + $0xc0] sm:$0xff] }
 0x1c0   : > { %v1783_v38 = vadd.f32 %v1708_v11, %v1477_v9 }
 0x1c1   : > { %v1798_v29 = vadd.f32 %v1746_v40, %v1492_v39  ;;  %v1484_v40 = vld [vmem:[%s3245_s24 + $0x50] sm:$0xff] }
 0x1c2   : > { %1815 = vst [vmem:[%s3245_s24 + $0x18] sm:$0xff] %v1783_v38 }
 0x1c3   : > { %1830 = vst [vmem:[%s3245_s24 + $0x90] sm:$0xff] %v1798_v29 }
 0x1c5   : > { %v1658_v7 = vpop.f32.mrf.mxu2 }
 0x1c6   : > { %v1747_v26 = vpop.f32.mrf.mxu3 }
 0x1c7   : > { %v1748_v61 = vadd.f32 %v1747_v26, %v1658_v7 }
 0x1c9   : > { %v1799_v24 = vadd.f32 %v1748_v61, %v1493_v1  ;;  %v1499_v1 = vld [vmem:[%s3245_s24 + $0xc8] sm:$0xff] }
 0x1cb   : > { %1831 = vst [vmem:[%s3245_s24 + $0x98] sm:$0xff] %v1799_v24 }
 0x1cd   : > { %v1621_v51 = vpop.f32.mrf.mxu0 }
 0x1ce   : > { %v1710_v0 = vpop.f32.mrf.mxu1 }
 0x1cf   : > { %v1711_v5 = vadd.f32 %v1710_v0, %v1621_v51  ;;  %v1485_v0 = vld [vmem:[%s3245_s24 + $0x58] sm:$0xff] }
 0x1d1   : > { %v1784_v33 = vadd.f32 %v1711_v5, %v1478_v63 }
 0x1d3   : > { %1816 = vst [vmem:[%s3245_s24 + $0x20] sm:$0xff] %v1784_v33 }
 0x1d5   : > { %v1623_v19 = vpop.f32.mrf.mxu0 }
 0x1d6   : > { %v1712_v14 = vpop.f32.mrf.mxu1 }
 0x1d7   : > { %v1661_v2 = vpop.f32.mrf.mxu2  ;;  %v1713_v52 = vadd.f32 %v1712_v14, %v1623_v19 }
 0x1d8   : > { %v1750_v34 = vpop.f32.mrf.mxu3 }
 0x1d9   : > { %v1751_v49 = vadd.f32 %v1750_v34, %v1661_v2  ;;  %v1785_v55 = vadd.f32 %v1713_v52, %v1479_v56  ;;  %v1500_v56 = vld [vmem:[%s3245_s24 + $0xd0] sm:$0xff] }
 0x1db   : > { %v1800_v30 = vadd.f32 %v1751_v49, %v1494_v15  ;;  %1817 = vst [vmem:[%s3245_s24 + $0x28] sm:$0xff] %v1785_v55  ;;  %v1486_v49 = vld [vmem:[%s3245_s24 + $0x60] sm:$0xff] }
 0x1dd   : > { %1832 = vst [vmem:[%s3245_s24 + $0xa0] sm:$0xff] %v1800_v30 }
 0x1df   : > { %v1663_v13 = vpop.f32.mrf.mxu2 }
 0x1e0   : > { %v1752_v21 = vpop.f32.mrf.mxu3 }
 0x1e1   : > { %v1753_v60 = vadd.f32 %v1752_v21, %v1663_v13 }
 0x1e3   : > { %v1801_v8 = vadd.f32 %v1753_v60, %v1495_v22  ;;  %v1501_v22 = vld [vmem:[%s3245_s24 + $0xd8] sm:$0xff] }
 0x1e4   : > { %v1626_v47 = vpop.f32.mrf.mxu0 }
 0x1e5   : > { %1833 = vst [vmem:[%s3245_s24 + $0xa8] sm:$0xff] %v1801_v8  ;;  %v1715_v18 = vpop.f32.mrf.mxu1 }
 0x1e6   : > { %v1716_v42 = vadd.f32 %v1715_v18, %v1626_v47  ;;  %v1487_v18 = vld [vmem:[%s3245_s24 + $0x68] sm:$0xff] }
 0x1e8   : > { %v1786_v20 = vadd.f32 %v1716_v42, %v1480_v48 }
 0x1ea   : > { %1818 = vst [vmem:[%s3245_s24 + $0x30] sm:$0xff] %v1786_v20 }
 0x1ec   : > { %v1628_v35 = vpop.f32.mrf.mxu0 }
 0x1ed   : > { %v1666_v4 = vpop.f32.mrf.mxu2  ;;  %v1717_v17 = vpop.f32.mrf.mxu1 }
 0x1ee   : > { %v1755_v62 = vpop.f32.mrf.mxu3  ;;  %v1718_v10 = vadd.f32 %v1717_v17, %v1628_v35 }
 0x1ef   : > { %v1756_v57 = vadd.f32 %v1755_v62, %v1666_v4  ;;  %v1502_v4 = vld [vmem:[%s3245_s24 + $0xe0] sm:$0xff] }
 0x1f0   : > { %v1787_v6 = vadd.f32 %v1718_v10, %v1481_v37 }
 0x1f1   : > { %v1802_v58 = vadd.f32 %v1756_v57, %v1496_v46  ;;  %v1488_v57 = vld [vmem:[%s3245_s24 + $0x70] sm:$0xff] }
 0x1f2   : > { %1819 = vst [vmem:[%s3245_s24 + $0x38] sm:$0xff] %v1787_v6 }
 0x1f3   : > { %1834 = vst [vmem:[%s3245_s24 + $0xb0] sm:$0xff] %v1802_v58 }
 0x1f5   : > { %v1668_v16 = vpop.f32.mrf.mxu2 }
 0x1f6   : > { %v1757_v59 = vpop.f32.mrf.mxu3  ;;  %v1631_v32 = vpop.f32.mrf.mxu0 }
 0x1f7   : > { %v1758_v50 = vadd.f32 %v1757_v59, %v1668_v16  ;;  %v1720_v45 = vpop.f32.mrf.mxu1 }
 0x1f8   : > { %v1721_v25 = vadd.f32 %v1720_v45, %v1631_v32 }
 0x1f9   : > { %v1803_v53 = vadd.f32 %v1758_v50, %v1497_v36  ;;  %v1503_v36 = vld [vmem:[%s3245_s24 + $0xe8] sm:$0xff] }
 0x1fa   : > { %v1788_v41 = vadd.f32 %v1721_v25, %v1482_v31  ;;  %v1489_v25 = vld [vmem:[%s3245_s24 + $0x78] sm:$0xff] }
 0x1fb   : > { %1835 = vst [vmem:[%s3245_s24 + $0xb8] sm:$0xff] %v1803_v53 }
 0x1fc   : > { %1820 = vst [vmem:[%s3245_s24 + $0x40] sm:$0xff] %v1788_v41 }
 0x1fe   : > { %v1633_v3 = vpop.f32.mrf.mxu0 }
 0x1ff   : > { %v1722_v27 = vpop.f32.mrf.mxu1 }
 0x200   : > { %v1671_v12 = vpop.f32.mrf.mxu2  ;;  %v1723_v43 = vadd.f32 %v1722_v27, %v1633_v3 }
 0x201   : > { %v1760_v9 = vpop.f32.mrf.mxu3 }
 0x202   : > { %v1761_v44 = vadd.f32 %v1760_v9, %v1671_v12  ;;  %v1789_v39 = vadd.f32 %v1723_v43, %v1483_v28  ;;  %v1504_v28 = vld [vmem:[%s3245_s24 + $0xf0] sm:$0xff] }
 0x204   : > { %v1804_v54 = vadd.f32 %v1761_v44, %v1498_v23  ;;  %1821 = vst [vmem:[%s3245_s24 + $0x48] sm:$0xff] %v1789_v39  ;;  %v1505_v44 = vld [vmem:[%s3245_s24 + $0xf8] sm:$0xff] }
 0x206   : > { %1836 = vst [vmem:[%s3245_s24 + $0xc0] sm:$0xff] %v1804_v54  ;;  %v1636_v11 = vpop.f32.mrf.mxu0 }
 0x207   : > { %v1725_v38 = vpop.f32.mrf.mxu1 }
 0x208   : > { %v1673_v29 = vpop.f32.mrf.mxu2  ;;  %v1726_v7 = vadd.f32 %v1725_v38, %v1636_v11 }
 0x209   : > { %v1762_v26 = vpop.f32.mrf.mxu3 }
 0x20a   : > { %v1763_v61 = vadd.f32 %v1762_v26, %v1673_v29  ;;  %v1790_v24 = vadd.f32 %v1726_v7, %v1484_v40 }
 0x20c   : > { %v1805_v51 = vadd.f32 %v1763_v61, %v1499_v1  ;;  %1822 = vst [vmem:[%s3245_s24 + $0x50] sm:$0xff] %v1790_v24 }
 0x20e   : > { %1837 = vst [vmem:[%s3245_s24 + $0xc8] sm:$0xff] %v1805_v51  ;;  %v1638_v63 = vpop.f32.mrf.mxu0 }
 0x20f   : > { %v1727_v5 = vpop.f32.mrf.mxu1 }
 0x210   : > { %v1676_v33 = vpop.f32.mrf.mxu2  ;;  %v1728_v19 = vadd.f32 %v1727_v5, %v1638_v63 }
 0x211   : > { %v1765_v14 = vpop.f32.mrf.mxu3 }
 0x212   : > { %v1766_v2 = vadd.f32 %v1765_v14, %v1676_v33  ;;  %v1791_v52 = vadd.f32 %v1728_v19, %v1485_v0 }
 0x214   : > { %v1806_v15 = vadd.f32 %v1766_v2, %v1500_v56  ;;  %1823 = vst [vmem:[%s3245_s24 + $0x58] sm:$0xff] %v1791_v52 }
 0x216   : > { %1838 = vst [vmem:[%s3245_s24 + $0xd0] sm:$0xff] %v1806_v15  ;;  %v1641_v34 = vpop.f32.mrf.mxu0 }
 0x217   : > { %v1730_v55 = vpop.f32.mrf.mxu1 }
 0x218   : > { %v1678_v30 = vpop.f32.mrf.mxu2  ;;  %v1731_v13 = vadd.f32 %v1730_v55, %v1641_v34 }
 0x219   : > { %v1767_v21 = vpop.f32.mrf.mxu3 }
 0x21a   : > { %v1768_v60 = vadd.f32 %v1767_v21, %v1678_v30  ;;  %v1792_v8 = vadd.f32 %v1731_v13, %v1486_v49 }
 0x21c   : > { %v1807_v47 = vadd.f32 %v1768_v60, %v1501_v22  ;;  %1824 = vst [vmem:[%s3245_s24 + $0x60] sm:$0xff] %v1792_v8 }
 0x21e   : > { %1839 = vst [vmem:[%s3245_s24 + $0xd8] sm:$0xff] %v1807_v47  ;;  %v1643_v48 = vpop.f32.mrf.mxu0 }
 0x21f   : > { %v1732_v42 = vpop.f32.mrf.mxu1 }
 0x220   : > { %v1681_v20 = vpop.f32.mrf.mxu2  ;;  %v1733_v35 = vadd.f32 %v1732_v42, %v1643_v48 }
 0x221   : > { %v1770_v37 = vpop.f32.mrf.mxu3 }
 0x222   : > { %v1771_v17 = vadd.f32 %v1770_v37, %v1681_v20  ;;  %v1793_v46 = vadd.f32 %v1733_v35, %v1487_v18 }
 0x224   : > { %v1808_v62 = vadd.f32 %v1771_v17, %v1502_v4  ;;  %1825 = vst [vmem:[%s3245_s24 + $0x68] sm:$0xff] %v1793_v46 }
 0x226   : > { %1840 = vst [vmem:[%s3245_s24 + $0xe0] sm:$0xff] %v1808_v62  ;;  %v1646_v10 = vpop.f32.mrf.mxu0 }
 0x227   : > { %v1735_v6 = vpop.f32.mrf.mxu1 }
 0x228   : > { %v1683_v58 = vpop.f32.mrf.mxu2  ;;  %v1736_v16 = vadd.f32 %v1735_v6, %v1646_v10 }
 0x229   : > { %v1772_v59 = vpop.f32.mrf.mxu3 }
 0x22a   : > { %v1773_v32 = vadd.f32 %v1772_v59, %v1683_v58  ;;  %v1794_v50 = vadd.f32 %v1736_v16, %v1488_v57 }
 0x22c   : > { %v1809_v31 = vadd.f32 %v1773_v32, %v1503_v36  ;;  %1826 = vst [vmem:[%s3245_s24 + $0x70] sm:$0xff] %v1794_v50 }
 0x22e   : > { %1841 = vst [vmem:[%s3245_s24 + $0xe8] sm:$0xff] %v1809_v31  ;;  %v1648_v45 = vpop.f32.mrf.mxu0 }
 0x22f   : > { %v1737_v53 = vpop.f32.mrf.mxu1 }
 0x230   : > { %v1686_v41 = vpop.f32.mrf.mxu2  ;;  %v1738_v3 = vadd.f32 %v1737_v53, %v1648_v45 }
 0x231   : > { %v1775_v27 = vpop.f32.mrf.mxu3 }
 0x232   : > { %v1776_v12 = vadd.f32 %v1775_v27, %v1686_v41  ;;  %v1795_v43 = vadd.f32 %v1738_v3, %v1489_v25 }
 0x234   : > { %v1810_v23 = vadd.f32 %v1776_v12, %v1504_v28  ;;  %1827 = vst [vmem:[%s3245_s24 + $0x78] sm:$0xff] %v1795_v43 }
 0x236   : > { %1842 = vst [vmem:[%s3245_s24 + $0xf0] sm:$0xff] %v1810_v23 }
 0x238   : > { %v1688_v9 = vpop.f32.mrf.mxu2 }
 0x239   : > { %v1777_v39 = vpop.f32.mrf.mxu3 }
 0x23a   : > { %v1778_v54 = vadd.f32 %v1777_v39, %v1688_v9 }
 0x23c   : > { %v1811_v11 = vadd.f32 %v1778_v54, %v1505_v44 }
 0x23e   : > { %1843 = vst [vmem:[%s3245_s24 + $0xf8] sm:$0xff] %v1811_v11 }
 0x23f PF: > { %p2608_p0 = scmp.ne.s32.totalorder %s3076_s1, 2 }
 0x241   : > { %1847 = sbr.rel (%p2608_p0) target bundleno = 804 (0x324), region = 71 }
 0x246   : > { %v4198_v40 = vld [vmem:[%s3245_s24 + $0x20] sm:$0xff]  ;;  %v4201_v38 = vld [vmem:[%s3245_s24 + $0x10] sm:$0xff]  ;;  %v3099_v7 = vmov 32   ;;  %v4210_v24 = vld [vmem:[%s3245_s24 + $0x28] sm:$0xff] }
 0x247   : > { %v4204_v29 = vld [vmem:[%s3245_s24] sm:$0xff]  ;;  %2871 = vset.pattern.permute.xlu2 %v3099_v7  ;;  %2870 = vset.pattern.permute.xlu1 %v3099_v7  ;;  %v1884_v1 = vmax.f32 %v4198_v40, 1e-30  ;;  %v1882_v26 = vmax.f32 %v4201_v38, 1e-30  ;;  %v4213_v51 = vld [vmem:[%s3245_s24 + $0x18] sm:$0xff] }
 0x248   : > { %v1880_v61 = vmax.f32 %v4204_v29, 1e-30  ;;  %2869 = vset.pattern.permute.xlu0 %v3099_v7  ;;  %v4216_v63 = vld [vmem:[%s3245_s24 + $0x8] sm:$0xff]  ;;  %v1885_v0 = vmax.f32 %v4210_v24, 1e-30  ;;  %v4222_v14 = vld [vmem:[%s3245_s24 + $0x40] sm:$0xff] }
 0x249   : > { %2872 = vrcp.f32 %v1884_v1  ;;  %v1883_v5 = vmax.f32 %v4213_v51, 1e-30  ;;  %v1881_v33 = vmax.f32 %v4216_v63, 1e-30  ;;  %v4225_v52 = vld [vmem:[%s3245_s24 + $0x38] sm:$0xff]  ;;  %v4228_v15 = vld [vmem:[%s3245_s24 + $0x30] sm:$0xff] }
 0x24a   : > { %2874 = vrcp.f32 %v1882_v26  ;;  %v1888_v34 = vmax.f32 %v4222_v14, 1e-30  ;;  %v1887_v49 = vmax.f32 %v4225_v52, 1e-30  ;;  %v1886_v30 = vmax.f32 %v4228_v15, 1e-30 }
 0x24b   : > { %2876 = vrcp.f32 %v1880_v61  ;;  %v4234_v21 = vld [vmem:[%s3245_s24 + $0x58] sm:$0xff]  ;;  %v4237_v60 = vld [vmem:[%s3245_s24 + $0x50] sm:$0xff]  ;;  %v4240_v8 = vld [vmem:[%s3245_s24 + $0x48] sm:$0xff] }
 0x24c   : > { %2878 = vrcp.f32 %v1885_v0  ;;  %v1891_v47 = vmax.f32 %v4234_v21, 1e-30  ;;  %v1890_v48 = vmax.f32 %v4237_v60, 1e-30  ;;  %v1889_v42 = vmax.f32 %v4240_v8, 1e-30 }
 0x24d   : > { %2880 = vrcp.f32 %v1883_v5  ;;  %v4246_v4 = vld [vmem:[%s3245_s24 + $0x70] sm:$0xff]  ;;  %v4249_v37 = vld [vmem:[%s3245_s24 + $0x68] sm:$0xff]  ;;  %v4252_v17 = vld [vmem:[%s3245_s24 + $0x60] sm:$0xff] }
 0x24e   : > { %2882 = vrcp.f32 %v1881_v33  ;;  %v1894_v46 = vmax.f32 %v4246_v4, 1e-30  ;;  %v1893_v62 = vmax.f32 %v4249_v37, 1e-30  ;;  %v1892_v57 = vmax.f32 %v4252_v17, 1e-30 }
 0x24f   : > { %v2873_v19 = vpop.eup %2872  ;;  %2884 = vrcp.f32 %v1888_v34  ;;  %v4258_v16 = vld [vmem:[%s3245_s24 + $0x88] sm:$0xff]  ;;  %v4261_v36 = vld [vmem:[%s3245_s24 + $0x80] sm:$0xff]  ;;  %v4264_v59 = vld [vmem:[%s3245_s24 + $0x78] sm:$0xff] }
 0x250   : > { %v2875_v56 = vpop.eup %2874  ;;  %1966 = vperm.xlu2 %2871, %v2873_v19   ;;  %2886 = vrcp.f32 %v1887_v49  ;;  %v1897_v32 = vmax.f32 %v4258_v16, 1e-30  ;;  %v1896_v50 = vmax.f32 %v4261_v36, 1e-30  ;;  %v1895_v45 = vmax.f32 %v4264_v59, 1e-30 }
 0x251   : > { %v2877_v2 = vpop.eup %2876  ;;  %1956 = vperm.xlu1 %2870, %v2875_v56   ;;  %2888 = vrcp.f32 %v1886_v30  ;;  %v4270_v41 = vld [vmem:[%s3245_s24 + $0xa0] sm:$0xff]  ;;  %v4273_v3 = vld [vmem:[%s3245_s24 + $0x98] sm:$0xff]  ;;  %v4276_v28 = vld [vmem:[%s3245_s24 + $0x90] sm:$0xff] }
 0x252   : > { %1946 = vperm.xlu0 %2869, %v2877_v2   ;;  %v2879_v55 = vpop.eup %2878  ;;  %2890 = vrcp.f32 %v1891_v47  ;;  %v1900_v27 = vmax.f32 %v4270_v41, 1e-30  ;;  %v1899_v12 = vmax.f32 %v4273_v3, 1e-30  ;;  %v1898_v23 = vmax.f32 %v4276_v28, 1e-30 }
 0x253   : > { %v2881_v13 = vpop.eup %2880  ;;  %2892 = vrcp.f32 %v1890_v48  ;;  %v4282_v39 = vld [vmem:[%s3245_s24 + $0xb8] sm:$0xff]  ;;  %v4285_v54 = vld [vmem:[%s3245_s24 + $0xb0] sm:$0xff]  ;;  %v4288_v11 = vld [vmem:[%s3245_s24 + $0xa8] sm:$0xff] }
 0x254   : > { %v2883_v22 = vpop.eup %2882  ;;  %2894 = vrcp.f32 %v1889_v42  ;;  %v1903_v7 = vmax.f32 %v4282_v39, 1e-30  ;;  %v1902_v1 = vmax.f32 %v4285_v54, 1e-30  ;;  %v1901_v61 = vmax.f32 %v4288_v11, 1e-30 }
 0x255   : > { %v2885_v18 = vpop.eup %2884  ;;  %2896 = vrcp.f32 %v1894_v46  ;;  %v4294_v33 = vld [vmem:[%s3245_s24 + $0xd0] sm:$0xff]  ;;  %v4297_v19 = vld [vmem:[%s3245_s24 + $0xc8] sm:$0xff]  ;;  %v4300_v56 = vld [vmem:[%s3245_s24 + $0xc0] sm:$0xff] }
 0x256   : > { %v2887_v20 = vpop.eup %2886  ;;  %2898 = vrcp.f32 %v1893_v62  ;;  %v1906_v2 = vmax.f32 %v4294_v33, 1e-30  ;;  %v1905_v34 = vmax.f32 %v4297_v19, 1e-30  ;;  %v4309_v47 = vld [vmem:[%s3245_s24 + $0xe0] sm:$0xff]  ;;  %v4312_v48 = vld [vmem:[%s3245_s24 + $0xd8] sm:$0xff] }
 0x257   : > { %v2889_v35 = vpop.eup %2888  ;;  %2900 = vrcp.f32 %v1892_v57  ;;  %v1908_v42 = vmax.f32 %v4309_v47, 1e-30  ;;  %v4321_v57 = vld [vmem:[%s3245_s24 + $0xf0] sm:$0xff] }
 0x258   : > { %1971 = vperm.xlu2 %2871, %v2879_v55   ;;  %v2891_v10 = vpop.eup %2890  ;;  %2902 = vrcp.f32 %v1897_v32  ;;  %v1904_v55 = vmax.f32 %v4300_v56, 1e-30  ;;  %v1910_v32 = vmax.f32 %v4321_v57, 1e-30 }
 0x259   : > { %1961 = vperm.xlu1 %2870, %v2881_v13   ;;  %v2893_v6 = vpop.eup %2892  ;;  %2904 = vrcp.f32 %v1896_v50 }
 0x25a   : > { %1951 = vperm.xlu0 %2869, %v2883_v22   ;;  %v2895_v58 = vpop.eup %2894  ;;  %2906 = vrcp.f32 %v1895_v45  ;;  %v4306_v22 = vld [vmem:[%s3245_s24 + $0xe8] sm:$0xff] }
 0x25b   : > { %v2897_v31 = vpop.eup %2896  ;;  %2908 = vrcp.f32 %v1900_v27 }
 0x25c   : > { %v2899_v25 = vpop.eup %2898  ;;  %2910 = vrcp.f32 %v1899_v12 }
 0x25d   : > { %v2901_v53 = vpop.eup %2900  ;;  %2912 = vrcp.f32 %v1898_v23 }
 0x25e   : > { %v2903_v43 = vpop.eup %2902  ;;  %2914 = vrcp.f32 %v1903_v7 }
 0x25f   : > { %v2905_v9 = vpop.eup %2904  ;;  %2916 = vrcp.f32 %v1902_v1 }
 0x260   : > { %1986 = vperm.xlu2 %2871, %v2885_v18   ;;  %v2907_v44 = vpop.eup %2906  ;;  %2918 = vrcp.f32 %v1901_v61  ;;  %v1909_v18 = vmax.f32 %v4306_v22, 1e-30 }
 0x261   : > { %1981 = vperm.xlu1 %2870, %v2887_v20   ;;  %v2909_v26 = vpop.eup %2908  ;;  %2920 = vrcp.f32 %v1906_v2 }
 0x262   : > { %1976 = vperm.xlu0 %2869, %v2889_v35   ;;  %v2911_v0 = vpop.eup %2910  ;;  %2922 = vrcp.f32 %v1905_v34  ;;  %v1907_v35 = vmax.f32 %v4312_v48, 1e-30 }
 0x263   : > { %v2913_v5 = vpop.eup %2912  ;;  %2924 = vrcp.f32 %v1904_v55 }
 0x264   : > { %v2915_v49 = vpop.eup %2914  ;;  %2926 = vrcp.f32 %v1909_v18 }
 0x265   : > { %v2917_v30 = vpop.eup %2916  ;;  %2928 = vrcp.f32 %v1908_v42 }
 0x266   : > { %v2919_v13 = vpop.eup %2918  ;;  %2930 = vrcp.f32 %v1907_v35 }
 0x267   : > { %v2921_v20 = vpop.eup %2920 }
 0x268   : > { %2001 = vperm.xlu2 %2871, %v2891_v10   ;;  %v2923_v46 = vpop.eup %2922  ;;  %v4318_v10 = vld [vmem:[%s3245_s24 + $0xf8] sm:$0xff] }
 0x269   : > { %1996 = vperm.xlu1 %2870, %v2893_v6   ;;  %v2925_v62 = vpop.eup %2924  ;;  %v1911_v6 = vmax.f32 %v4318_v10, 1e-30 }
 0x26a   : > { %1991 = vperm.xlu0 %2869, %v2895_v58   ;;  %v2927_v58 = vpop.eup %2926 }
 0x26b   : > { %v2929_v50 = vpop.eup %2928  ;;  %2932 = vrcp.f32 %v1911_v6 }
 0x26c   : > { %2934 = vrcp.f32 %v1910_v32 }
 0x270   : > { %2016 = vperm.xlu2 %2871, %v2897_v31   ;;  %v2931_v31 = vpop.eup %2930 }
 0x271   : > { %2011 = vperm.xlu1 %2870, %v2899_v25   ;;  %v2933_v45 = vpop.eup %2932 }
 0x272   : > { %2006 = vperm.xlu0 %2869, %v2901_v53   ;;  %v2935_v25 = vpop.eup %2934 }
 0x278   : > { %2031 = vperm.xlu2 %2871, %v2903_v43  }
 0x279   : > { %2026 = vperm.xlu1 %2870, %v2905_v9  }
 0x27a   : > { %2021 = vperm.xlu0 %2869, %v2907_v44  }
 0x280   : > { %2046 = vperm.xlu2 %2871, %v2909_v26  }
 0x281   : > { %2041 = vperm.xlu1 %2870, %v2911_v0  }
 0x282   : > { %2036 = vperm.xlu0 %2869, %v2913_v5  }
 0x288   : > { %2061 = vperm.xlu2 %2871, %v2915_v49  }
 0x289   : > { %2056 = vperm.xlu1 %2870, %v2917_v30  }
 0x28a   : > { %2051 = vperm.xlu0 %2869, %v2919_v13  }
 0x290   : > { %2076 = vperm.xlu2 %2871, %v2921_v20  }
 0x291   : > { %2071 = vperm.xlu1 %2870, %v2923_v46  }
 0x292   : > { %2066 = vperm.xlu0 %2869, %v2925_v62  }
 0x298   : > { %2091 = vperm.xlu2 %2871, %v2927_v58  }
 0x299   : > { %2086 = vperm.xlu1 %2870, %v2929_v50  }
 0x29a   : > { %2081 = vperm.xlu0 %2869, %v2931_v31  }
 0x2a1   : > { %2101 = vperm.xlu1 %2870, %v2933_v45  }
 0x2a2   : > { %2096 = vperm.xlu0 %2869, %v2935_v25  }
 0x2aa   : > { %v1967_v53 = vpop.permute.xlu2 %1966 }
 0x2ab   : > { %v2108_v27 = vmul.f32 %v1967_v53, %v4198_v40 }
 0x2ad   : > { %v2176_v12 = vmul.f32 1.442695, %v2108_v27  ;;  %vm2140_vm0 = vcmp.gt.f32.partialorder %v2108_v27, 0.0 }
 0x2af   : > { %2936 = vpow2.f32 %v2176_v12 }
 0x2b2   : > { %v1972_v43 = vpop.permute.xlu2 %1971 }
 0x2b3   : > { %v2109_v23 = vmul.f32 %v1972_v43, %v4210_v24 }
 0x2b5   : > { %v2937_v9 = vpop.eup %2936  ;;  %v2178_v44 = vmul.f32 1.442695, %v2109_v23  ;;  %vm2141_vm1 = vcmp.gt.f32.partialorder %v2109_v23, 0.0 }
 0x2b6   : > { %v2613_v7 = vadd.f32 -1.0, %v2937_v9 }
 0x2b7   : > { %2938 = vpow2.f32 %v2178_v44 }
 0x2b8   : > { %v2268_v1 = vsel %vm2140_vm0, %v2108_v27, %v2613_v7 }
 0x2b9   : > { %2300 = vst [vmem:[%s3245_s24 + $0x20] sm:$0xff] %v2268_v1 }
 0x2ba   : > { %v1987_v26 = vpop.permute.xlu2 %1986 }
 0x2bb   : > { %v2112_v61 = vmul.f32 %v1987_v26, %v4222_v14 }
 0x2bd   : > { %v2939_v0 = vpop.eup %2938  ;;  %v2184_v5 = vmul.f32 1.442695, %v2112_v61  ;;  %vm2144_vm2 = vcmp.gt.f32.partialorder %v2112_v61, 0.0 }
 0x2be   : > { %v2614_v40 = vadd.f32 -1.0, %v2939_v0 }
 0x2bf   : > { %2940 = vpow2.f32 %v2184_v5 }
 0x2c0   : > { %v2269_v2 = vsel %vm2141_vm1, %v2109_v23, %v2614_v40 }
 0x2c1   : > { %2301 = vst [vmem:[%s3245_s24 + $0x28] sm:$0xff] %v2269_v2 }
 0x2c2   : > { %v2002_v24 = vpop.permute.xlu2 %2001 }
 0x2c3   : > { %v2115_v34 = vmul.f32 %v2002_v24, %v4234_v21  ;;  %v1957_v49 = vpop.permute.xlu1 %1956 }
 0x2c4   : > { %v2106_v55 = vmul.f32 %v1957_v49, %v4201_v38  ;;  %v1947_v30 = vpop.permute.xlu0 %1946 }
 0x2c5   : > { %v2941_v13 = vpop.eup %2940  ;;  %v2190_v18 = vmul.f32 1.442695, %v2115_v34  ;;  %v2104_v14 = vmul.f32 %v1947_v30, %v4204_v29  ;;  %vm2147_vm3 = vcmp.gt.f32.partialorder %v2115_v34, 0.0 }
 0x2c6   : > { %v2617_v42 = vadd.f32 -1.0, %v2941_v13  ;;  %v2172_v20 = vmul.f32 1.442695, %v2106_v55  ;;  %vm2138_vm4 = vcmp.gt.f32.partialorder %v2106_v55, 0.0 }
 0x2c7   : > { %2942 = vpow2.f32 %v2190_v18  ;;  %v2168_v35 = vmul.f32 1.442695, %v2104_v14  ;;  %vm2136_vm5 = vcmp.gt.f32.partialorder %v2104_v14, 0.0 }
 0x2c8   : > { %v2272_v46 = vsel %vm2144_vm2, %v2112_v61, %v2617_v42  ;;  %2944 = vpow2.f32 %v2172_v20 }
 0x2c9   : > { %2304 = vst [vmem:[%s3245_s24 + $0x40] sm:$0xff] %v2272_v46  ;;  %2946 = vpow2.f32 %v2168_v35 }
 0x2ca   : > { %v2017_v62 = vpop.permute.xlu2 %2016 }
 0x2cb   : > { %v2118_v21 = vmul.f32 %v2017_v62, %v4246_v4  ;;  %v1962_v6 = vpop.permute.xlu1 %1961 }
 0x2cc   : > { %v2107_v38 = vmul.f32 %v1962_v6, %v4213_v51  ;;  %v1952_v58 = vpop.permute.xlu0 %1951 }
 0x2cd   : > { %v2943_v32 = vpop.eup %2942  ;;  %v2196_v50 = vmul.f32 1.442695, %v2118_v21  ;;  %v2105_v29 = vmul.f32 %v1952_v58, %v4216_v63  ;;  %vm2150_vm6 = vcmp.gt.f32.partialorder %v2118_v21, 0.0 }
 0x2ce   : > { %v2945_v31 = vpop.eup %2944  ;;  %v2620_v45 = vadd.f32 -1.0, %v2943_v32  ;;  %v2174_v25 = vmul.f32 1.442695, %v2107_v38  ;;  %vm2139_vm7 = vcmp.gt.f32.partialorder %v2107_v38, 0.0 }
 0x2cf   : > { %v2947_v53 = vpop.eup %2946  ;;  %v2611_v27 = vadd.f32 -1.0, %v2945_v31  ;;  %2948 = vpow2.f32 %v2196_v50  ;;  %v2170_v12 = vmul.f32 1.442695, %v2105_v29  ;;  %vm2137_vm8 = vcmp.gt.f32.partialorder %v2105_v29, 0.0 }
 0x2d0   : > { %v2275_v4 = vsel %vm2147_vm3, %v2115_v34, %v2620_v45  ;;  %v2609_v43 = vadd.f32 -1.0, %v2947_v53  ;;  %2950 = vpow2.f32 %v2174_v25 }
 0x2d1   : > { %2307 = vst [vmem:[%s3245_s24 + $0x58] sm:$0xff] %v2275_v4  ;;  %v2266_v51 = vsel %vm2138_vm4, %v2106_v55, %v2611_v27  ;;  %2952 = vpow2.f32 %v2170_v12 }
 0x2d2   : > { %2298 = vst [vmem:[%s3245_s24 + $0x10] sm:$0xff] %v2266_v51  ;;  %v2264_v63 = vsel %vm2136_vm5, %v2104_v14, %v2609_v43  ;;  %v2032_v23 = vpop.permute.xlu2 %2031 }
 0x2d3   : > { %2296 = vst [vmem:[%s3245_s24] sm:$0xff] %v2264_v63  ;;  %v2121_v9 = vmul.f32 %v2032_v23, %v4258_v16  ;;  %v1982_v44 = vpop.permute.xlu1 %1981 }
 0x2d4   : > { %v2111_v7 = vmul.f32 %v1982_v44, %v4225_v52  ;;  %v1977_v1 = vpop.permute.xlu0 %1976 }
 0x2d5   : > { %v2949_v26 = vpop.eup %2948  ;;  %v2202_v61 = vmul.f32 1.442695, %v2121_v9  ;;  %v2110_v0 = vmul.f32 %v1977_v1, %v4228_v15  ;;  %vm2153_vm9 = vcmp.gt.f32.partialorder %v2121_v9, 0.0 }
 0x2d6   : > { %v2951_v5 = vpop.eup %2950  ;;  %v2623_v40 = vadd.f32 -1.0, %v2949_v26  ;;  %v2182_v2 = vmul.f32 1.442695, %v2111_v7  ;;  %vm2143_vm10 = vcmp.gt.f32.partialorder %v2111_v7, 0.0 }
 0x2d7   : > { %v2953_v24 = vpop.eup %2952  ;;  %v2612_v34 = vadd.f32 -1.0, %v2951_v5  ;;  %2954 = vpow2.f32 %v2202_v61  ;;  %v2180_v49 = vmul.f32 1.442695, %v2110_v0  ;;  %vm2142_vm11 = vcmp.gt.f32.partialorder %v2110_v0, 0.0 }
 0x2d8   : > { %v2278_v16 = vsel %vm2150_vm6, %v2118_v21, %v2623_v40  ;;  %v2610_v55 = vadd.f32 -1.0, %v2953_v24  ;;  %2956 = vpow2.f32 %v2182_v2 }
 0x2d9   : > { %2310 = vst [vmem:[%s3245_s24 + $0x70] sm:$0xff] %v2278_v16  ;;  %v2267_v52 = vsel %vm2139_vm7, %v2107_v38, %v2612_v34  ;;  %2958 = vpow2.f32 %v2180_v49 }
 0x2da   : > { %2299 = vst [vmem:[%s3245_s24 + $0x18] sm:$0xff] %v2267_v52  ;;  %v2265_v15 = vsel %vm2137_vm8, %v2105_v29, %v2610_v55  ;;  %v2047_v30 = vpop.permute.xlu2 %2046 }
 0x2db   : > { %2297 = vst [vmem:[%s3245_s24 + $0x8] sm:$0xff] %v2265_v15  ;;  %v2124_v13 = vmul.f32 %v2047_v30, %v4270_v41  ;;  %v1997_v18 = vpop.permute.xlu1 %1996 }
 0x2dc   : > { %v2114_v14 = vmul.f32 %v1997_v18, %v4237_v60  ;;  %v1992_v42 = vpop.permute.xlu0 %1991 }
 0x2dd   : > { %v2955_v20 = vpop.eup %2954  ;;  %v2208_v35 = vmul.f32 1.442695, %v2124_v13  ;;  %v2113_v46 = vmul.f32 %v1992_v42, %v4240_v8  ;;  %vm2156_vm12 = vcmp.gt.f32.partialorder %v2124_v13, 0.0 }
 0x2de   : > { %v2957_v62 = vpop.eup %2956  ;;  %v2626_v21 = vadd.f32 -1.0, %v2955_v20  ;;  %v2188_v6 = vmul.f32 1.442695, %v2114_v14  ;;  %vm2146_vm13 = vcmp.gt.f32.partialorder %v2114_v14, 0.0 }
 0x2df   : > { %v2959_v38 = vpop.eup %2958  ;;  %v2616_v58 = vadd.f32 -1.0, %v2957_v62  ;;  %2960 = vpow2.f32 %v2208_v35  ;;  %v2186_v32 = vmul.f32 1.442695, %v2113_v46  ;;  %vm2145_vm14 = vcmp.gt.f32.partialorder %v2113_v46, 0.0 }
 0x2e0   : > { %v2281_v41 = vsel %vm2153_vm9, %v2121_v9, %v2626_v21  ;;  %v2615_v50 = vadd.f32 -1.0, %v2959_v38  ;;  %2962 = vpow2.f32 %v2188_v6 }
 0x2e1   : > { %2313 = vst [vmem:[%s3245_s24 + $0x88] sm:$0xff] %v2281_v41  ;;  %v2271_v60 = vsel %vm2143_vm10, %v2111_v7, %v2616_v58  ;;  %2964 = vpow2.f32 %v2186_v32 }
 0x2e2   : > { %2303 = vst [vmem:[%s3245_s24 + $0x38] sm:$0xff] %v2271_v60  ;;  %v2270_v8 = vsel %vm2142_vm11, %v2110_v0, %v2615_v50  ;;  %v2062_v29 = vpop.permute.xlu2 %2061 }
 0x2e3   : > { %2302 = vst [vmem:[%s3245_s24 + $0x30] sm:$0xff] %v2270_v8  ;;  %v2127_v31 = vmul.f32 %v2062_v29, %v4282_v39  ;;  %v2012_v45 = vpop.permute.xlu1 %2011 }
 0x2e4   : > { %v2117_v25 = vmul.f32 %v2012_v45, %v4249_v37  ;;  %v2007_v53 = vpop.permute.xlu0 %2006 }
 0x2e5   : > { %v2961_v27 = vpop.eup %2960  ;;  %v2214_v12 = vmul.f32 1.442695, %v2127_v31  ;;  %v2116_v4 = vmul.f32 %v2007_v53, %v4252_v17  ;;  %vm2159_vm15 = vcmp.gt.f32.partialorder %v2127_v31, 0.0 }
 0x2e6   : > { %v2963_v43 = vpop.eup %2962  ;;  %v2629_v51 = vadd.f32 -1.0, %v2961_v27  ;;  %v2194_v63 = vmul.f32 1.442695, %v2117_v25  ;;  %vm2149_vm0 = vcmp.gt.f32.partialorder %v2117_v25, 0.0 }
 0x2e7   : > { %v2965_v23 = vpop.eup %2964  ;;  %v2619_v9 = vadd.f32 -1.0, %v2963_v43  ;;  %2966 = vpow2.f32 %v2214_v12  ;;  %v2192_v44 = vmul.f32 1.442695, %v2116_v4  ;;  %vm2148_vm1 = vcmp.gt.f32.partialorder %v2116_v4, 0.0 }
 0x2e8   : > { %v2284_v39 = vsel %vm2156_vm12, %v2124_v13, %v2629_v51  ;;  %v2618_v7 = vadd.f32 -1.0, %v2965_v23  ;;  %2968 = vpow2.f32 %v2194_v63 }
 0x2e9   : > { %2316 = vst [vmem:[%s3245_s24 + $0xa0] sm:$0xff] %v2284_v39  ;;  %v2274_v37 = vsel %vm2146_vm13, %v2114_v14, %v2619_v9  ;;  %2970 = vpow2.f32 %v2192_v44 }
 0x2ea   : > { %2306 = vst [vmem:[%s3245_s24 + $0x50] sm:$0xff] %v2274_v37  ;;  %v2273_v17 = vsel %vm2145_vm14, %v2113_v46, %v2618_v7  ;;  %v2077_v1 = vpop.permute.xlu2 %2076 }
 0x2eb   : > { %2305 = vst [vmem:[%s3245_s24 + $0x48] sm:$0xff] %v2273_v17  ;;  %v2130_v26 = vmul.f32 %v2077_v1, %v4294_v33  ;;  %v2027_v61 = vpop.permute.xlu1 %2026 }
 0x2ec   : > { %v2120_v0 = vmul.f32 %v2027_v61, %v4261_v36  ;;  %v2022_v5 = vpop.permute.xlu0 %2021 }
 0x2ed   : > { %v2967_v40 = vpop.eup %2966  ;;  %v2220_v2 = vmul.f32 1.442695, %v2130_v26  ;;  %v2119_v24 = vmul.f32 %v2022_v5, %v4264_v59  ;;  %vm2162_vm2 = vcmp.gt.f32.partialorder %v2130_v26, 0.0 }
 0x2ee   : > { %v2969_v34 = vpop.eup %2968  ;;  %v2632_v49 = vadd.f32 -1.0, %v2967_v40  ;;  %v2200_v16 = vmul.f32 1.442695, %v2120_v0  ;;  %vm2152_vm3 = vcmp.gt.f32.partialorder %v2120_v0, 0.0 }
 0x2ef   : > { %v2971_v55 = vpop.eup %2970  ;;  %v2622_v52 = vadd.f32 -1.0, %v2969_v34  ;;  %2972 = vpow2.f32 %v2220_v2  ;;  %v2198_v15 = vmul.f32 1.442695, %v2119_v24  ;;  %vm2151_vm4 = vcmp.gt.f32.partialorder %v2119_v24, 0.0 }
 0x2f0   : > { %v2287_v33 = vsel %vm2159_vm15, %v2127_v31, %v2632_v49  ;;  %v2621_v30 = vadd.f32 -1.0, %v2971_v55  ;;  %2974 = vpow2.f32 %v2200_v16 }
 0x2f1   : > { %2319 = vst [vmem:[%s3245_s24 + $0xb8] sm:$0xff] %v2287_v33  ;;  %v2277_v36 = vsel %vm2149_vm0, %v2117_v25, %v2622_v52  ;;  %2976 = vpow2.f32 %v2198_v15 }
 0x2f2   : > { %2309 = vst [vmem:[%s3245_s24 + $0x68] sm:$0xff] %v2277_v36  ;;  %v2276_v59 = vsel %vm2148_vm1, %v2116_v4, %v2621_v30  ;;  %v2092_v13 = vpop.permute.xlu2 %2091 }
 0x2f3   : > { %2308 = vst [vmem:[%s3245_s24 + $0x60] sm:$0xff] %v2276_v59  ;;  %v2133_v18 = vmul.f32 %v2092_v13, %v4306_v22  ;;  %v2042_v14 = vpop.permute.xlu1 %2041 }
 0x2f4   : > { %v2123_v42 = vmul.f32 %v2042_v14, %v4273_v3  ;;  %v2037_v20 = vpop.permute.xlu0 %2036 }
 0x2f5   : > { %v2973_v35 = vpop.eup %2972  ;;  %v2226_v46 = vmul.f32 1.442695, %v2133_v18  ;;  %v2122_v62 = vmul.f32 %v2037_v20, %v4276_v28  ;;  %vm2165_vm5 = vcmp.gt.f32.partialorder %v2133_v18, 0.0 }
 0x2f6   : > { %v2975_v21 = vpop.eup %2974  ;;  %v2635_v6 = vadd.f32 -1.0, %v2973_v35  ;;  %v2206_v38 = vmul.f32 1.442695, %v2123_v42  ;;  %vm2155_vm6 = vcmp.gt.f32.partialorder %v2123_v42, 0.0 }
 0x2f7   : > { %v2977_v58 = vpop.eup %2976  ;;  %v2625_v32 = vadd.f32 -1.0, %v2975_v21  ;;  %2978 = vpow2.f32 %v2226_v46  ;;  %v2204_v41 = vmul.f32 1.442695, %v2122_v62  ;;  %vm2154_vm7 = vcmp.gt.f32.partialorder %v2122_v62, 0.0 }
 0x2f8   : > { %v2290_v22 = vsel %vm2162_vm2, %v2130_v26, %v2635_v6  ;;  %v2624_v50 = vadd.f32 -1.0, %v2977_v58  ;;  %2980 = vpow2.f32 %v2206_v38 }
 0x2f9   : > { %2322 = vst [vmem:[%s3245_s24 + $0xd0] sm:$0xff] %v2290_v22  ;;  %v2280_v3 = vsel %vm2152_vm3, %v2120_v0, %v2625_v32  ;;  %2982 = vpow2.f32 %v2204_v41 }
 0x2fa   : > { %2312 = vst [vmem:[%s3245_s24 + $0x80] sm:$0xff] %v2280_v3  ;;  %v2279_v28 = vsel %vm2151_vm4, %v2119_v24, %v2624_v50 }
 0x2fb   : > { %2311 = vst [vmem:[%s3245_s24 + $0x78] sm:$0xff] %v2279_v28  ;;  %v2057_v60 = vpop.permute.xlu1 %2056 }
 0x2fc   : > { %v2126_v8 = vmul.f32 %v2057_v60, %v4285_v54  ;;  %v2052_v29 = vpop.permute.xlu0 %2051 }
 0x2fd   : > { %v2979_v31 = vpop.eup %2978  ;;  %v2125_v45 = vmul.f32 %v2052_v29, %v4288_v11 }
 0x2fe   : > { %v2981_v25 = vpop.eup %2980  ;;  %v2638_v53 = vadd.f32 -1.0, %v2979_v31  ;;  %v2212_v27 = vmul.f32 1.442695, %v2126_v8  ;;  %vm2158_vm8 = vcmp.gt.f32.partialorder %v2126_v8, 0.0 }
 0x2ff   : > { %v2983_v12 = vpop.eup %2982  ;;  %v2628_v4 = vadd.f32 -1.0, %v2981_v25  ;;  %v2210_v43 = vmul.f32 1.442695, %v2125_v45  ;;  %vm2157_vm9 = vcmp.gt.f32.partialorder %v2125_v45, 0.0 }
 0x300   : > { %v2293_v51 = vsel %vm2165_vm5, %v2133_v18, %v2638_v53  ;;  %v2627_v63 = vadd.f32 -1.0, %v2983_v12  ;;  %2984 = vpow2.f32 %v2212_v27 }
 0x301   : > { %2325 = vst [vmem:[%s3245_s24 + $0xe8] sm:$0xff] %v2293_v51  ;;  %v2283_v23 = vsel %vm2155_vm6, %v2123_v42, %v2628_v4  ;;  %2986 = vpow2.f32 %v2210_v43 }
 0x302   : > { %2315 = vst [vmem:[%s3245_s24 + $0x98] sm:$0xff] %v2283_v23  ;;  %v2282_v54 = vsel %vm2154_vm7, %v2122_v62, %v2627_v63 }
 0x303   : > { %2314 = vst [vmem:[%s3245_s24 + $0x90] sm:$0xff] %v2282_v54  ;;  %v2072_v11 = vpop.permute.xlu1 %2071 }
 0x304   : > { %v2129_v9 = vmul.f32 %v2072_v11, %v4297_v19  ;;  %v2067_v44 = vpop.permute.xlu0 %2066 }
 0x305   : > { %v2128_v39 = vmul.f32 %v2067_v44, %v4300_v56 }
 0x306   : > { %v2985_v7 = vpop.eup %2984  ;;  %v2218_v37 = vmul.f32 1.442695, %v2129_v9  ;;  %vm2161_vm10 = vcmp.gt.f32.partialorder %v2129_v9, 0.0 }
 0x307   : > { %v2987_v17 = vpop.eup %2986  ;;  %v2631_v1 = vadd.f32 -1.0, %v2985_v7  ;;  %v2216_v26 = vmul.f32 1.442695, %v2128_v39  ;;  %vm2160_vm11 = vcmp.gt.f32.partialorder %v2128_v39, 0.0 }
 0x308   : > { %v2630_v61 = vadd.f32 -1.0, %v2987_v17  ;;  %2988 = vpow2.f32 %v2218_v37 }
 0x309   : > { %v2286_v0 = vsel %vm2158_vm8, %v2126_v8, %v2631_v1  ;;  %2990 = vpow2.f32 %v2216_v26 }
 0x30a   : > { %2318 = vst [vmem:[%s3245_s24 + $0xb0] sm:$0xff] %v2286_v0  ;;  %v2285_v5 = vsel %vm2157_vm9, %v2125_v45, %v2630_v61 }
 0x30b   : > { %2317 = vst [vmem:[%s3245_s24 + $0xa8] sm:$0xff] %v2285_v5  ;;  %v2087_v19 = vpop.permute.xlu1 %2086 }
 0x30c   : > { %v2132_v40 = vmul.f32 %v2087_v19, %v4309_v47  ;;  %v2082_v56 = vpop.permute.xlu0 %2081 }
 0x30d   : > { %v2131_v2 = vmul.f32 %v2082_v56, %v4312_v48 }
 0x30e   : > { %v2989_v24 = vpop.eup %2988  ;;  %v2224_v34 = vmul.f32 1.442695, %v2132_v40  ;;  %vm2164_vm12 = vcmp.gt.f32.partialorder %v2132_v40, 0.0 }
 0x30f   : > { %v2991_v49 = vpop.eup %2990  ;;  %v2634_v16 = vadd.f32 -1.0, %v2989_v24  ;;  %v2222_v55 = vmul.f32 1.442695, %v2131_v2  ;;  %vm2163_vm13 = vcmp.gt.f32.partialorder %v2131_v2, 0.0 }
 0x310   : > { %v2633_v52 = vadd.f32 -1.0, %v2991_v49  ;;  %2992 = vpow2.f32 %v2224_v34 }
 0x311   : > { %v2289_v15 = vsel %vm2161_vm10, %v2129_v9, %v2634_v16  ;;  %2994 = vpow2.f32 %v2222_v55 }
 0x312   : > { %2321 = vst [vmem:[%s3245_s24 + $0xc8] sm:$0xff] %v2289_v15  ;;  %v2288_v33 = vsel %vm2160_vm11, %v2128_v39, %v2633_v52 }
 0x313   : > { %2320 = vst [vmem:[%s3245_s24 + $0xc0] sm:$0xff] %v2288_v33  ;;  %v2102_v47 = vpop.permute.xlu1 %2101 }
 0x314   : > { %v2135_v30 = vmul.f32 %v2102_v47, %v4318_v10  ;;  %v2097_v48 = vpop.permute.xlu0 %2096 }
 0x315   : > { %v2134_v36 = vmul.f32 %v2097_v48, %v4321_v57 }
 0x316   : > { %v2993_v59 = vpop.eup %2992  ;;  %v2230_v13 = vmul.f32 1.442695, %v2135_v30  ;;  %vm2167_vm14 = vcmp.gt.f32.partialorder %v2135_v30, 0.0 }
 0x317   : > { %v2995_v18 = vpop.eup %2994  ;;  %v2637_v14 = vadd.f32 -1.0, %v2993_v59  ;;  %v2228_v42 = vmul.f32 1.442695, %v2134_v36  ;;  %vm2166_vm15 = vcmp.gt.f32.partialorder %v2134_v36, 0.0 }
 0x318   : > { %v2636_v20 = vadd.f32 -1.0, %v2995_v18  ;;  %2996 = vpow2.f32 %v2230_v13 }
 0x319   : > { %v2292_v35 = vsel %vm2164_vm12, %v2132_v40, %v2637_v14  ;;  %2998 = vpow2.f32 %v2228_v42 }
 0x31a   : > { %2324 = vst [vmem:[%s3245_s24 + $0xe0] sm:$0xff] %v2292_v35  ;;  %v2291_v46 = vsel %vm2163_vm13, %v2131_v2, %v2636_v20 }
 0x31b   : > { %2323 = vst [vmem:[%s3245_s24 + $0xd8] sm:$0xff] %v2291_v46 }
 0x31e   : > { %v2997_v10 = vpop.eup %2996 }
 0x31f   : > { %v2999_v62 = vpop.eup %2998  ;;  %v2640_v21 = vadd.f32 -1.0, %v2997_v10 }
 0x320   : > { %v2639_v57 = vadd.f32 -1.0, %v2999_v62 }
 0x321   : > { %v2295_v6 = vsel %vm2167_vm14, %v2135_v30, %v2640_v21 }
 0x322   : > { %2327 = vst [vmem:[%s3245_s24 + $0xf8] sm:$0xff] %v2295_v6  ;;  %v2294_v38 = vsel %vm2166_vm15, %v2134_v36, %v2639_v57 }
 0x323   : > { %2326 = vst [vmem:[%s3245_s24 + $0xf0] sm:$0xff] %v2294_v38 }
 0x324 PF: > { %s35_s17 = sadd.s32 1, %s3092_s17   ;;  %s4513_s0 = smov %s3072_s13 }
 0x325   : > { %p32_p1 = scmp.ge.s32.totalorder %s35_s17, 11   ;;  %s4514_s13 = smov %s3204_s9 }
 0x326   : > { %s4515_s1 = smov %s3084_s15  ;;  %s4516_s14 = smov %s3088_s16 }
 0x327   : > { %s4517_s15 = smov %s4520_s2  ;;  %s4518_s16 = smov %s4524_s18 }
 0x328   :  { %34 = sbr.rel (!%p32_p1) target bundleno = 13 (0xd), region = 113 }

</bundles_post_ra>
